<compile_context>
chip_gen: v6e
topology: v6e:2x2x1
jax: 0.10.0
libtpu: 0.0.40
codegen_flags: <defaults>
</compile_context>

<pallas_src>
import functools
import math

import jax
import jax.numpy as jnp
from jax import lax
from jax.experimental import pallas as pl
from jax.experimental.pallas import tpu as pltpu

# ---- ViT-tiny (WinKawaks/vit-tiny-patch16-224) config ----
HIDDEN = 192
NUM_LAYERS = 12
NUM_HEADS = 3
HEAD_DIM = HIDDEN // NUM_HEADS      # 64
MLP_DIM = 768
PATCH = 16
LN_EPS = 1e-12
BN_EPS = 1e-5
NUM_CLASSES = 4                     # OCTMNIST has 4 classes

LAYERS_PER_STEP = 2                 # grid=(6,); good balance on v5e/v6e, fine on v7x
NUM_STEPS = NUM_LAYERS // LAYERS_PER_STEP
MASK_NEG = -1e30                    # additive attention mask for padded / cross-batch keys


# ----------------------------- in-kernel helpers ---------------------------

def _layernorm(x, g, b):
    # x: (M, D) f32, g/b: (1, D) f32
    mu = jnp.mean(x, axis=-1, keepdims=True)
    xc = x - mu
    var = jnp.mean(xc * xc, axis=-1, keepdims=True)
    return xc * lax.rsqrt(var + LN_EPS) * g + b


def _gelu(y):
    # TODO(synk): HF ViT uses exact erf GELU; tanh approximation kept for guaranteed
    # Mosaic lowering (max abs deviation ~1e-3 vs erf).
    c = 0.7978845608028654  # sqrt(2/pi)
    y2 = y * y
    return 0.5 * y * (1.0 + jnp.tanh(c * y * (1.0 + 0.044715 * y2)))


def _attention(qkv, mask, wo, bo):
    """Multi-head attention over the folded (B*S_pad) row dim.

    qkv:  (BT, 3*HIDDEN) f32, column layout [Q_h0|Q_h1|Q_h2|K_h0|...|V_h2]
    mask: (BT, BT) f32 additive mask (0 for valid same-image keys, -1e30 otherwise),
          which makes attention block-diagonal per image and ignores padded tokens.
    """
    D = HIDDEN
    scale = 1.0 / math.sqrt(HEAD_DIM)
    ctx_heads = []
    for hh in range(NUM_HEADS):                           # static, 3 heads
        c0 = hh * HEAD_DIM
        qh = qkv[:, c0:c0 + HEAD_DIM].astype(jnp.bfloat16)            # (BT, Dh)
        kh = qkv[:, D + c0:D + c0 + HEAD_DIM].astype(jnp.bfloat16)    # (BT, Dh)
        vh = qkv[:, 2 * D + c0:2 * D + c0 + HEAD_DIM].astype(jnp.bfloat16)
        s = lax.dot_general(qh, kh, (((1,), (1,)), ((), ())),
                            preferred_element_type=jnp.float32) * scale + mask
        s = s - jnp.max(s, axis=-1, keepdims=True)
        p = jnp.exp(s)
        p = p * pl.reciprocal(jnp.sum(p, axis=-1, keepdims=True))     # exact
        ctx_heads.append(jnp.dot(p.astype(jnp.bfloat16), vh,
                                 preferred_element_type=jnp.float32))
    ctx = jnp.concatenate(ctx_heads, axis=-1)                         # (BT, D)
    return jnp.dot(ctx.astype(jnp.bfloat16), wo,
                   preferred_element_type=jnp.float32) + bo


# ----------------------------- fused Pallas kernel --------------------------

def _vit_kernel(patches_ref, pw_ref, pb_ref, posadd_ref, mask_ref,
                ln1g_ref, ln1b_ref, wqkv_ref, bqkv_ref, wo_ref, bo_ref,
                ln2g_ref, ln2b_ref, w1_ref, b1_ref, w2_ref, b2_ref,
                fc1w_ref, fc1b_ref, bns_ref, bnsh_ref, fc2w_ref, fc2b_ref,
                out_ref, h_ref,
                *, batch, n_patches, seq_pad, seq_real):
    step = pl.program_id(0)
    B, P, S, Sr = batch, n_patches, seq_pad, seq_real

    # ---------- step 0: patch embedding + cls/pos, seed the residual stream ----------
    @pl.when(step == 0)
    def _():
        tok = jnp.dot(patches_ref[...].astype(jnp.bfloat16), pw_ref[...],
                      preferred_element_type=jnp.float32) + pb_ref[...]   # (B*P, D)
        posadd = posadd_ref[...]          # (S, D): row0 = cls+pos0, rows 1..P = pos, rest 0
        rows = []
        for b in range(B):                # static, tiny B
            rows.append(posadd[0:1, :])
            rows.append(tok[b * P:(b + 1) * P, :] + posadd[1:1 + P, :])
            if S > P + 1:
                rows.append(jnp.zeros((S - P - 1, HIDDEN), jnp.float32))
        h_ref[...] = jnp.concatenate(rows, axis=0)                        # (B*S, D)

    mask = mask_ref[...]
    h = h_ref[...]                                                        # (B*S, D) f32

    # ---------- LAYERS_PER_STEP encoder layers for this grid step ----------
    for i in range(LAYERS_PER_STEP):                      # static unrolled
        # attention block (pre-LN)
        xn = _layernorm(h, ln1g_ref[i], ln1b_ref[i])
        qkv = jnp.dot(xn.astype(jnp.bfloat16), wqkv_ref[i],
                      preferred_element_type=jnp.float32) + bqkv_ref[i]   # (B*S, 3D)
        h = h + _attention(qkv, mask, wo_ref[i], bo_ref[i])
        # MLP block (pre-LN)
        xn2 = _layernorm(h, ln2g_ref[i], ln2b_ref[i])
        m = jnp.dot(xn2.astype(jnp.bfloat16), w1_ref[i],
                    preferred_element_type=jnp.float32) + b1_ref[i]
        m = _gelu(m)
        h = h + jnp.dot(m.astype(jnp.bfloat16), w2_ref[i],
                        preferred_element_type=jnp.float32) + b2_ref[i]
    h_ref[...] = h

    # ---------- last step: mean-pool over real tokens + classification head ----------
    @pl.when(step == pl.num_programs(0) - 1)
    def _():
        feat = jnp.concatenate(
            [jnp.sum(h[b * S:b * S + Sr, :], axis=0, keepdims=True) for b in range(B)],
            axis=0) * (1.0 / Sr)                                          # (B, D)
        z = jnp.dot(feat.astype(jnp.bfloat16), fc1w_ref[...],
                    preferred_element_type=jnp.float32) + fc1b_ref[...]
        z = z * bns_ref[...] + bnsh_ref[...]     # BatchNorm1d (eval, running stats) folded
        z = jnp.maximum(z, 0.0)                  # ReLU; Dropout(0.5) is identity in eval
        out_ref[...] = (jnp.dot(z.astype(jnp.bfloat16), fc2w_ref[...],
                                preferred_element_type=jnp.float32)
                        + fc2b_ref[...]).astype(out_ref.dtype)


# ------------------------------- model glue --------------------------------

def init_params(key, seq_len):
    keys = iter(jax.random.split(key, 64))

    def nrm(shape, scale=0.02, dtype=jnp.float32):
        return (scale * jax.random.normal(next(keys), shape)).astype(dtype)

    encoder_p = {
        "ln1_g": jnp.ones((NUM_LAYERS, 1, HIDDEN), jnp.float32),
        "ln1_b": jnp.zeros((NUM_LAYERS, 1, HIDDEN), jnp.float32),
        "wqkv": nrm((NUM_LAYERS, HIDDEN, 3 * HIDDEN), dtype=jnp.bfloat16),
        "bqkv": jnp.zeros((NUM_LAYERS, 1, 3 * HIDDEN), jnp.float32),
        "wo": nrm((NUM_LAYERS, HIDDEN, HIDDEN), dtype=jnp.bfloat16),
        "bo": jnp.zeros((NUM_LAYERS, 1, HIDDEN), jnp.float32),
        "ln2_g": jnp.ones((NUM_LAYERS, 1, HIDDEN), jnp.float32),
        "ln2_b": jnp.zeros((NUM_LAYERS, 1, HIDDEN), jnp.float32),
        "w1": nrm((NUM_LAYERS, HIDDEN, MLP_DIM), dtype=jnp.bfloat16),
        "b1": jnp.zeros((NUM_LAYERS, 1, MLP_DIM), jnp.float32),
        "w2": nrm((NUM_LAYERS, MLP_DIM, HIDDEN), dtype=jnp.bfloat16),
        "b2": jnp.zeros((NUM_LAYERS, 1, HIDDEN), jnp.float32),
    }
    return {
        "patch_w": nrm((3 * PATCH * PATCH, HIDDEN), dtype=jnp.bfloat16),
        "patch_b": jnp.zeros((HIDDEN,), jnp.float32),
        "cls": nrm((1, 1, HIDDEN)),
        "pos": nrm((1, seq_len, HIDDEN)),
        "encoder": encoder_p,
        "head": {
            "fc1_w": nrm((HIDDEN, 128), dtype=jnp.bfloat16),
            "fc1_b": jnp.zeros((128,), jnp.float32),
            "bn_g": jnp.ones((128,), jnp.float32),
            "bn_b": jnp.zeros((128,), jnp.float32),
            "bn_rm": jnp.zeros((128,), jnp.float32),
            "bn_rv": jnp.ones((128,), jnp.float32),
            "fc2_w": nrm((128, NUM_CLASSES), dtype=jnp.bfloat16),
            "fc2_b": jnp.zeros((NUM_CLASSES,), jnp.float32),
        },
    }


def fine_tuned_model_fn(x, params):
    B, C, H, W = x.shape
    nh, nw = H // PATCH, W // PATCH
    P = nh * nw
    S_real = P + 1
    S_pad = ((S_real + 7) // 8) * 8     # pad tokens to a sublane multiple (5 -> 8)

    # Patch extraction (channel-major order matching flattened conv weight (c, kh, kw)).
    # TODO(synk): checkpoint conversion must flatten the conv weight in the same order.
    patches = (x.reshape(B, C, nh, PATCH, nw, PATCH)
                 .transpose(0, 2, 4, 1, 3, 5)
                 .reshape(B * P, C * PATCH * PATCH))

    # Per-token additive rows: row 0 = cls + pos[0], rows 1..P = pos[1..P], pad rows = 0.
    posadd = jnp.concatenate(
        [params["cls"][0] + params["pos"][0, :1],
         params["pos"][0, 1:],
         jnp.zeros((S_pad - S_real, HIDDEN), jnp.float32)], axis=0)       # (S_pad, D)

    # Additive attention mask over the folded (B*S_pad) rows: keys must belong to the
    # same image and be real (non-padded) tokens.  Constant, folded at compile time.
    idx = jnp.arange(B * S_pad)
    same_img = (idx[:, None] // S_pad) == (idx[None, :] // S_pad)
    real_key = (idx[None, :] % S_pad) < S_real
    attn_mask = jnp.where(same_img & real_key, 0.0, MASK_NEG).astype(jnp.float32)

    head = params["head"]
    enc = params["encoder"]
    H1 = head["fc1_w"].shape[1]
    # Fold BatchNorm1d (eval) into scale/shift: (z - rm)/sqrt(rv+eps)*g + b.
    bn_scale = head["bn_g"] * lax.rsqrt(head["bn_rv"] + BN_EPS)
    bn_shift = head["bn_b"] - head["bn_rm"] * bn_scale

    kernel = functools.partial(_vit_kernel, batch=B, n_patches=P,
                               seq_pad=S_pad, seq_real=S_real)

    full = lambda shape: pl.BlockSpec(shape, lambda s, n=len(shape): (0,) * n)
    stack = lambda shape: pl.BlockSpec((LAYERS_PER_STEP,) + shape, lambda s: (s, 0, 0))

    return pl.pallas_call(
        kernel,
        out_shape=jax.ShapeDtypeStruct((B, NUM_CLASSES), jnp.float32),
        grid=(NUM_STEPS,),
        in_specs=[
            # constant-index inputs (DMA'd once, stay VMEM resident)
            full((B * P, C * PATCH * PATCH)),            # patches
            full((C * PATCH * PATCH, HIDDEN)),           # patch_w (bf16)
            full((1, HIDDEN)),                           # patch_b
            full((S_pad, HIDDEN)),                       # cls+pos rows
            full((B * S_pad, B * S_pad)),                # attention mask
            # per-step stacked encoder weights (LAYERS_PER_STEP layers per grid step)
            stack((1, HIDDEN)), stack((1, HIDDEN)),                      # ln1 g/b
            stack((HIDDEN, 3 * HIDDEN)), stack((1, 3 * HIDDEN)),         # wqkv/bqkv
            stack((HIDDEN, HIDDEN)), stack((1, HIDDEN)),                 # wo/bo
            stack((1, HIDDEN)), stack((1, HIDDEN)),                      # ln2 g/b
            stack((HIDDEN, MLP_DIM)), stack((1, MLP_DIM)),               # w1/b1
            stack((MLP_DIM, HIDDEN)), stack((1, HIDDEN)),                # w2/b2
            # constant-index head params
            full((HIDDEN, H1)), full((1, H1)), full((1, H1)), full((1, H1)),
            full((H1, NUM_CLASSES)), full((1, NUM_CLASSES)),
        ],
        out_specs=pl.BlockSpec((B, NUM_CLASSES), lambda s: (0, 0)),
        scratch_shapes=[pltpu.VMEM((B * S_pad, HIDDEN), jnp.float32)],   # residual stream
        compiler_params=pltpu.CompilerParams(dimension_semantics=("arbitrary",)),
    )(patches, params["patch_w"], params["patch_b"].reshape(1, HIDDEN),
      posadd, attn_mask,
      enc["ln1_g"], enc["ln1_b"], enc["wqkv"], enc["bqkv"], enc["wo"], enc["bo"],
      enc["ln2_g"], enc["ln2_b"], enc["w1"], enc["b1"], enc["w2"], enc["b2"],
      head["fc1_w"], head["fc1_b"].reshape(1, H1),
      bn_scale.reshape(1, H1), bn_shift.reshape(1, H1),
      head["fc2_w"], head["fc2_b"].reshape(1, NUM_CLASSES))


fine_tuned_model = jax.jit(fine_tuned_model_fn)


# --------------------------------- main -------------------------------------

if __name__ == "__main__":
    key = jax.random.PRNGKey(0)
    kx, kp = jax.random.split(key)

    # Small image (32x32, patch 16 -> 4 patches + CLS = 5 real tokens); NCHW like PyTorch.
    B, C, H, W = 2, 3, 32, 32
    x = jax.random.normal(kx, (B, C, H, W), dtype=jnp.float32)

    seq_len = (H // PATCH) * (W // PATCH) + 1
    params = init_params(kp, seq_len)

    out = fine_tuned_model(x, params)
    out = jax.block_until_ready(out)
    assert out.shape == (B, NUM_CLASSES) and out.dtype == jnp.float32
    assert bool(jnp.all(jnp.isfinite(out)))
    print("KERNEL_OK")
</pallas_src>

<mosaic_0001>
module attributes {stable_mosaic.version = 11 : i64} {
  func.func @_vit_kernel(%arg0: i32, %arg1: memref<8x768xf32, #tpu.memory_space<vmem>>, %arg2: memref<768x192xbf16, #tpu.memory_space<vmem>>, %arg3: memref<1x192xf32, #tpu.memory_space<vmem>>, %arg4: memref<8x192xf32, #tpu.memory_space<vmem>>, %arg5: memref<16x16xf32, #tpu.memory_space<vmem>>, %arg6: memref<2x1x192xf32, #tpu.memory_space<vmem>>, %arg7: memref<2x1x192xf32, #tpu.memory_space<vmem>>, %arg8: memref<2x192x576xbf16, #tpu.memory_space<vmem>>, %arg9: memref<2x1x576xf32, #tpu.memory_space<vmem>>, %arg10: memref<2x192x192xbf16, #tpu.memory_space<vmem>>, %arg11: memref<2x1x192xf32, #tpu.memory_space<vmem>>, %arg12: memref<2x1x192xf32, #tpu.memory_space<vmem>>, %arg13: memref<2x1x192xf32, #tpu.memory_space<vmem>>, %arg14: memref<2x192x768xbf16, #tpu.memory_space<vmem>>, %arg15: memref<2x1x768xf32, #tpu.memory_space<vmem>>, %arg16: memref<2x768x192xbf16, #tpu.memory_space<vmem>>, %arg17: memref<2x1x192xf32, #tpu.memory_space<vmem>>, %arg18: memref<192x128xbf16, #tpu.memory_space<vmem>>, %arg19: memref<1x128xf32, #tpu.memory_space<vmem>>, %arg20: memref<1x128xf32, #tpu.memory_space<vmem>>, %arg21: memref<1x128xf32, #tpu.memory_space<vmem>>, %arg22: memref<128x4xbf16, #tpu.memory_space<vmem>>, %arg23: memref<1x4xf32, #tpu.memory_space<vmem>>, %arg24: memref<2x4xf32, #tpu.memory_space<vmem>>, %arg25: memref<16x192xf32, #tpu.memory_space<vmem>>) attributes {dimension_semantics = [#tpu.dimension_semantics<arbitrary>], iteration_bounds = array<i64: 6>, scalar_prefetch = 0 : i64, scratch_operands = 1 : i64, tpu.core_type = #tpu.core_type<tc>, window_params = [{pipeline_mode = #tpu.pipeline_mode<synchronous>, transform_indices = @transform_0, window_bounds = array<i64: 8, 768>}, {pipeline_mode = #tpu.pipeline_mode<synchronous>, transform_indices = @transform_1, window_bounds = array<i64: 768, 192>}, {pipeline_mode = #tpu.pipeline_mode<synchronous>, transform_indices = @transform_2, window_bounds = array<i64: 1, 192>}, {pipeline_mode = #tpu.pipeline_mode<synchronous>, transform_indices = @transform_3, window_bounds = array<i64: 8, 192>}, {pipeline_mode = #tpu.pipeline_mode<synchronous>, transform_indices = @transform_4, window_bounds = array<i64: 16, 16>}, {transform_indices = @transform_5, window_bounds = array<i64: 2, 1, 192>}, {transform_indices = @transform_6, window_bounds = array<i64: 2, 1, 192>}, {transform_indices = @transform_7, window_bounds = array<i64: 2, 192, 576>}, {transform_indices = @transform_8, window_bounds = array<i64: 2, 1, 576>}, {transform_indices = @transform_9, window_bounds = array<i64: 2, 192, 192>}, {transform_indices = @transform_10, window_bounds = array<i64: 2, 1, 192>}, {transform_indices = @transform_11, window_bounds = array<i64: 2, 1, 192>}, {transform_indices = @transform_12, window_bounds = array<i64: 2, 1, 192>}, {transform_indices = @transform_13, window_bounds = array<i64: 2, 192, 768>}, {transform_indices = @transform_14, window_bounds = array<i64: 2, 1, 768>}, {transform_indices = @transform_15, window_bounds = array<i64: 2, 768, 192>}, {transform_indices = @transform_16, window_bounds = array<i64: 2, 1, 192>}, {pipeline_mode = #tpu.pipeline_mode<synchronous>, transform_indices = @transform_17, window_bounds = array<i64: 192, 128>}, {pipeline_mode = #tpu.pipeline_mode<synchronous>, transform_indices = @transform_18, window_bounds = array<i64: 1, 128>}, {pipeline_mode = #tpu.pipeline_mode<synchronous>, transform_indices = @transform_19, window_bounds = array<i64: 1, 128>}, {pipeline_mode = #tpu.pipeline_mode<synchronous>, transform_indices = @transform_20, window_bounds = array<i64: 1, 128>}, {pipeline_mode = #tpu.pipeline_mode<synchronous>, transform_indices = @transform_21, window_bounds = array<i64: 128, 4>}, {pipeline_mode = #tpu.pipeline_mode<synchronous>, transform_indices = @transform_22, window_bounds = array<i64: 1, 4>}, {pipeline_mode = #tpu.pipeline_mode<synchronous>, transform_indices = @transform_23, window_bounds = array<i64: 2, 4>}]} {
    %c0_i32 = arith.constant 0 : i32
    %0 = arith.cmpi eq, %arg0, %c0_i32 : i32
    %1 = arith.extui %0 : i1 to i32
    %c0_i32_0 = arith.constant 0 : i32
    %2 = arith.cmpi ne, %1, %c0_i32_0 : i32
    scf.if %2 {
      %c0_145 = arith.constant 0 : index
      %c0_146 = arith.constant 0 : index
      %335 = vector.load %arg1[%c0_145, %c0_146] : memref<8x768xf32, #tpu.memory_space<vmem>>, vector<8x768xf32>
      %336 = arith.truncf %335 : vector<8x768xf32> to vector<8x768xbf16>
      %c0_147 = arith.constant 0 : index
      %c0_148 = arith.constant 0 : index
      %337 = vector.load %arg2[%c0_147, %c0_148] : memref<768x192xbf16, #tpu.memory_space<vmem>>, vector<768x192xbf16>
      %cst_149 = arith.constant dense<0.000000e+00> : vector<8x192xf32>
      %338 = tpu.matmul %336, %337, %cst_149 {dimension_numbers = #tpu.dot_dimension_numbers<[1], [0], [0], [1], [0, 0, 1, 1], [], []>} : vector<8x768xbf16>, vector<768x192xbf16>, vector<8x192xf32> -> vector<8x192xf32>
      %c0_150 = arith.constant 0 : index
      %c0_151 = arith.constant 0 : index
      %339 = vector.load %arg3[%c0_150, %c0_151] : memref<1x192xf32, #tpu.memory_space<vmem>>, vector<1x192xf32>
      %340 = vector.broadcast %339 : vector<1x192xf32> to vector<8x192xf32>
      %341 = arith.addf %338, %340 : vector<8x192xf32>
      %c0_152 = arith.constant 0 : index
      %c0_153 = arith.constant 0 : index
      %342 = vector.load %arg4[%c0_152, %c0_153] : memref<8x192xf32, #tpu.memory_space<vmem>>, vector<8x192xf32>
      %343 = vector.extract_strided_slice %342 {offsets = [0, 0], sizes = [1, 192], strides = [1, 1]} : vector<8x192xf32> to vector<1x192xf32>
      %344 = vector.extract_strided_slice %341 {offsets = [0, 0], sizes = [4, 192], strides = [1, 1]} : vector<8x192xf32> to vector<4x192xf32>
      %345 = vector.extract_strided_slice %342 {offsets = [1, 0], sizes = [4, 192], strides = [1, 1]} : vector<8x192xf32> to vector<4x192xf32>
      %346 = arith.addf %344, %345 : vector<4x192xf32>
      %cst_154 = arith.constant 0.000000e+00 : f32
      %347 = vector.broadcast %cst_154 : f32 to vector<3x192xf32>
      %348 = vector.extract_strided_slice %342 {offsets = [0, 0], sizes = [1, 192], strides = [1, 1]} : vector<8x192xf32> to vector<1x192xf32>
      %349 = vector.extract_strided_slice %341 {offsets = [4, 0], sizes = [4, 192], strides = [1, 1]} : vector<8x192xf32> to vector<4x192xf32>
      %350 = vector.extract_strided_slice %342 {offsets = [1, 0], sizes = [4, 192], strides = [1, 1]} : vector<8x192xf32> to vector<4x192xf32>
      %351 = arith.addf %349, %350 : vector<4x192xf32>
      %cst_155 = arith.constant 0.000000e+00 : f32
      %352 = vector.broadcast %cst_155 : f32 to vector<3x192xf32>
      %353 = tpu.concatenate %343, %346, %347, %348, %351, %352 in 0 : vector<1x192xf32>, vector<4x192xf32>, vector<3x192xf32>, vector<1x192xf32>, vector<4x192xf32>, vector<3x192xf32> -> vector<16x192xf32>
      %c0_156 = arith.constant 0 : index
      %c0_157 = arith.constant 0 : index
      %354 = vector.load %arg25[%c0_156, %c0_157] : memref<16x192xf32, #tpu.memory_space<vmem>>, vector<16x192xf32>
      tpu.vector_store %arg25[%c0_156, %c0_157], %353 {strides = array<i32>} : memref<16x192xf32, #tpu.memory_space<vmem>>, vector<16x192xf32>,
    } else {
    }
    %c0 = arith.constant 0 : index
    %c0_1 = arith.constant 0 : index
    %3 = vector.load %arg5[%c0, %c0_1] : memref<16x16xf32, #tpu.memory_space<vmem>>, vector<16x16xf32>
    %c0_2 = arith.constant 0 : index
    %c0_3 = arith.constant 0 : index
    %4 = vector.load %arg25[%c0_2, %c0_3] : memref<16x192xf32, #tpu.memory_space<vmem>>, vector<16x192xf32>
    %c0_4 = arith.constant 0 : index
    %c0_5 = arith.constant 0 : index
    %c0_6 = arith.constant 0 : index
    %5 = vector.load %arg6[%c0_4, %c0_5, %c0_6] : memref<2x1x192xf32, #tpu.memory_space<vmem>>, vector<1x1x192xf32>
    %6 = vector.shape_cast %5 : vector<1x1x192xf32> to vector<1x192xf32>
    %c0_7 = arith.constant 0 : index
    %c0_8 = arith.constant 0 : index
    %c0_9 = arith.constant 0 : index
    %7 = vector.load %arg7[%c0_7, %c0_8, %c0_9] : memref<2x1x192xf32, #tpu.memory_space<vmem>>, vector<1x1x192xf32>
    %8 = vector.shape_cast %7 : vector<1x1x192xf32> to vector<1x192xf32>
    %cst = arith.constant dense<0.000000e+00> : vector<16xf32>
    %9 = vector.multi_reduction <add>, %4, %cst [1] : vector<16x192xf32> to vector<16xf32>
    %10 = vector.shape_cast %9 : vector<16xf32> to vector<16x1xf32>
    %cst_10 = arith.constant 1.920000e+02 : f32
    %11 = vector.broadcast %cst_10 : f32 to vector<16x1xf32>
    %12 = arith.divf %10, %11 : vector<16x1xf32>
    %13 = vector.broadcast %12 : vector<16x1xf32> to vector<16x192xf32>
    %14 = arith.subf %4, %13 : vector<16x192xf32>
    %15 = arith.mulf %14, %14 : vector<16x192xf32>
    %cst_11 = arith.constant dense<0.000000e+00> : vector<16xf32>
    %16 = vector.multi_reduction <add>, %15, %cst_11 [1] : vector<16x192xf32> to vector<16xf32>
    %17 = vector.shape_cast %16 : vector<16xf32> to vector<16x1xf32>
    %cst_12 = arith.constant 1.920000e+02 : f32
    %18 = vector.broadcast %cst_12 : f32 to vector<16x1xf32>
    %19 = arith.divf %17, %18 : vector<16x1xf32>
    %cst_13 = arith.constant 9.99999996E-13 : f32
    %20 = vector.broadcast %cst_13 : f32 to vector<16x1xf32>
    %21 = arith.addf %19, %20 : vector<16x1xf32>
    %22 = math.rsqrt %21 : vector<16x1xf32>
    %23 = vector.broadcast %22 : vector<16x1xf32> to vector<16x192xf32>
    %24 = arith.mulf %14, %23 : vector<16x192xf32>
    %25 = vector.broadcast %6 : vector<1x192xf32> to vector<16x192xf32>
    %26 = arith.mulf %24, %25 : vector<16x192xf32>
    %27 = vector.broadcast %8 : vector<1x192xf32> to vector<16x192xf32>
    %28 = arith.addf %26, %27 : vector<16x192xf32>
    %29 = arith.truncf %28 : vector<16x192xf32> to vector<16x192xbf16>
    %c0_14 = arith.constant 0 : index
    %c0_15 = arith.constant 0 : index
    %c0_16 = arith.constant 0 : index
    %30 = vector.load %arg8[%c0_14, %c0_15, %c0_16] : memref<2x192x576xbf16, #tpu.memory_space<vmem>>, vector<1x192x576xbf16>
    %31 = vector.shape_cast %30 : vector<1x192x576xbf16> to vector<192x576xbf16>
    %cst_17 = arith.constant dense<0.000000e+00> : vector<16x576xf32>
    %32 = tpu.matmul %29, %31, %cst_17 {dimension_numbers = #tpu.dot_dimension_numbers<[1], [0], [0], [1], [0, 0, 1, 1], [], []>} : vector<16x192xbf16>, vector<192x576xbf16>, vector<16x576xf32> -> vector<16x576xf32>
    %c0_18 = arith.constant 0 : index
    %c0_19 = arith.constant 0 : index
    %c0_20 = arith.constant 0 : index
    %33 = vector.load %arg9[%c0_18, %c0_19, %c0_20] : memref<2x1x576xf32, #tpu.memory_space<vmem>>, vector<1x1x576xf32>
    %34 = vector.shape_cast %33 : vector<1x1x576xf32> to vector<1x576xf32>
    %35 = vector.broadcast %34 : vector<1x576xf32> to vector<16x576xf32>
    %36 = arith.addf %32, %35 : vector<16x576xf32>
    %c0_21 = arith.constant 0 : index
    %c0_22 = arith.constant 0 : index
    %c0_23 = arith.constant 0 : index
    %37 = vector.load %arg10[%c0_21, %c0_22, %c0_23] : memref<2x192x192xbf16, #tpu.memory_space<vmem>>, vector<1x192x192xbf16>
    %38 = vector.shape_cast %37 : vector<1x192x192xbf16> to vector<192x192xbf16>
    %c0_24 = arith.constant 0 : index
    %c0_25 = arith.constant 0 : index
    %c0_26 = arith.constant 0 : index
    %39 = vector.load %arg11[%c0_24, %c0_25, %c0_26] : memref<2x1x192xf32, #tpu.memory_space<vmem>>, vector<1x1x192xf32>
    %40 = vector.shape_cast %39 : vector<1x1x192xf32> to vector<1x192xf32>
    %41 = vector.extract_strided_slice %36 {offsets = [0, 0], sizes = [16, 64], strides = [1, 1]} : vector<16x576xf32> to vector<16x64xf32>
    %42 = arith.truncf %41 : vector<16x64xf32> to vector<16x64xbf16>
    %43 = vector.extract_strided_slice %36 {offsets = [0, 192], sizes = [16, 64], strides = [1, 1]} : vector<16x576xf32> to vector<16x64xf32>
    %44 = arith.truncf %43 : vector<16x64xf32> to vector<16x64xbf16>
    %45 = vector.extract_strided_slice %36 {offsets = [0, 384], sizes = [16, 64], strides = [1, 1]} : vector<16x576xf32> to vector<16x64xf32>
    %46 = arith.truncf %45 : vector<16x64xf32> to vector<16x64xbf16>
    %cst_27 = arith.constant dense<0.000000e+00> : vector<16x16xf32>
    %47 = tpu.matmul %42, %44, %cst_27 {dimension_numbers = #tpu.dot_dimension_numbers<[1], [1], [0], [0], [0, 0, 1, 0], [], []>} : vector<16x64xbf16>, vector<16x64xbf16>, vector<16x16xf32> -> vector<16x16xf32>
    %cst_28 = arith.constant 1.250000e-01 : f32
    %48 = vector.broadcast %cst_28 : f32 to vector<16x16xf32>
    %49 = arith.mulf %47, %48 : vector<16x16xf32>
    %50 = arith.addf %49, %3 : vector<16x16xf32>
    %cst_29 = arith.constant dense<0xFF800000> : vector<16xf32>
    %51 = vector.multi_reduction <maximumf>, %50, %cst_29 [1] : vector<16x16xf32> to vector<16xf32>
    %52 = vector.shape_cast %51 : vector<16xf32> to vector<16x1xf32>
    %53 = vector.broadcast %52 : vector<16x1xf32> to vector<16x16xf32>
    %54 = arith.subf %50, %53 : vector<16x16xf32>
    %55 = math.exp %54 : vector<16x16xf32>
    %cst_30 = arith.constant dense<0.000000e+00> : vector<16xf32>
    %56 = vector.multi_reduction <add>, %55, %cst_30 [1] : vector<16x16xf32> to vector<16xf32>
    %57 = vector.shape_cast %56 : vector<16xf32> to vector<16x1xf32>
    %58 = tpu.reciprocal %57 : vector<16x1xf32> -> vector<16x1xf32>
    %59 = vector.broadcast %58 : vector<16x1xf32> to vector<16x16xf32>
    %60 = arith.mulf %55, %59 : vector<16x16xf32>
    %61 = arith.truncf %60 : vector<16x16xf32> to vector<16x16xbf16>
    %cst_31 = arith.constant dense<0.000000e+00> : vector<16x64xf32>
    %62 = tpu.matmul %61, %46, %cst_31 {dimension_numbers = #tpu.dot_dimension_numbers<[1], [0], [0], [1], [0, 0, 1, 1], [], []>} : vector<16x16xbf16>, vector<16x64xbf16>, vector<16x64xf32> -> vector<16x64xf32>
    %63 = vector.extract_strided_slice %36 {offsets = [0, 64], sizes = [16, 64], strides = [1, 1]} : vector<16x576xf32> to vector<16x64xf32>
    %64 = arith.truncf %63 : vector<16x64xf32> to vector<16x64xbf16>
    %65 = vector.extract_strided_slice %36 {offsets = [0, 256], sizes = [16, 64], strides = [1, 1]} : vector<16x576xf32> to vector<16x64xf32>
    %66 = arith.truncf %65 : vector<16x64xf32> to vector<16x64xbf16>
    %67 = vector.extract_strided_slice %36 {offsets = [0, 448], sizes = [16, 64], strides = [1, 1]} : vector<16x576xf32> to vector<16x64xf32>
    %68 = arith.truncf %67 : vector<16x64xf32> to vector<16x64xbf16>
    %cst_32 = arith.constant dense<0.000000e+00> : vector<16x16xf32>
    %69 = tpu.matmul %64, %66, %cst_32 {dimension_numbers = #tpu.dot_dimension_numbers<[1], [1], [0], [0], [0, 0, 1, 0], [], []>} : vector<16x64xbf16>, vector<16x64xbf16>, vector<16x16xf32> -> vector<16x16xf32>
    %cst_33 = arith.constant 1.250000e-01 : f32
    %70 = vector.broadcast %cst_33 : f32 to vector<16x16xf32>
    %71 = arith.mulf %69, %70 : vector<16x16xf32>
    %72 = arith.addf %71, %3 : vector<16x16xf32>
    %cst_34 = arith.constant dense<0xFF800000> : vector<16xf32>
    %73 = vector.multi_reduction <maximumf>, %72, %cst_34 [1] : vector<16x16xf32> to vector<16xf32>
    %74 = vector.shape_cast %73 : vector<16xf32> to vector<16x1xf32>
    %75 = vector.broadcast %74 : vector<16x1xf32> to vector<16x16xf32>
    %76 = arith.subf %72, %75 : vector<16x16xf32>
    %77 = math.exp %76 : vector<16x16xf32>
    %cst_35 = arith.constant dense<0.000000e+00> : vector<16xf32>
    %78 = vector.multi_reduction <add>, %77, %cst_35 [1] : vector<16x16xf32> to vector<16xf32>
    %79 = vector.shape_cast %78 : vector<16xf32> to vector<16x1xf32>
    %80 = tpu.reciprocal %79 : vector<16x1xf32> -> vector<16x1xf32>
    %81 = vector.broadcast %80 : vector<16x1xf32> to vector<16x16xf32>
    %82 = arith.mulf %77, %81 : vector<16x16xf32>
    %83 = arith.truncf %82 : vector<16x16xf32> to vector<16x16xbf16>
    %cst_36 = arith.constant dense<0.000000e+00> : vector<16x64xf32>
    %84 = tpu.matmul %83, %68, %cst_36 {dimension_numbers = #tpu.dot_dimension_numbers<[1], [0], [0], [1], [0, 0, 1, 1], [], []>} : vector<16x16xbf16>, vector<16x64xbf16>, vector<16x64xf32> -> vector<16x64xf32>
    %85 = vector.extract_strided_slice %36 {offsets = [0, 128], sizes = [16, 64], strides = [1, 1]} : vector<16x576xf32> to vector<16x64xf32>
    %86 = arith.truncf %85 : vector<16x64xf32> to vector<16x64xbf16>
    %87 = vector.extract_strided_slice %36 {offsets = [0, 320], sizes = [16, 64], strides = [1, 1]} : vector<16x576xf32> to vector<16x64xf32>
    %88 = arith.truncf %87 : vector<16x64xf32> to vector<16x64xbf16>
    %89 = vector.extract_strided_slice %36 {offsets = [0, 512], sizes = [16, 64], strides = [1, 1]} : vector<16x576xf32> to vector<16x64xf32>
    %90 = arith.truncf %89 : vector<16x64xf32> to vector<16x64xbf16>
    %cst_37 = arith.constant dense<0.000000e+00> : vector<16x16xf32>
    %91 = tpu.matmul %86, %88, %cst_37 {dimension_numbers = #tpu.dot_dimension_numbers<[1], [1], [0], [0], [0, 0, 1, 0], [], []>} : vector<16x64xbf16>, vector<16x64xbf16>, vector<16x16xf32> -> vector<16x16xf32>
    %cst_38 = arith.constant 1.250000e-01 : f32
    %92 = vector.broadcast %cst_38 : f32 to vector<16x16xf32>
    %93 = arith.mulf %91, %92 : vector<16x16xf32>
    %94 = arith.addf %93, %3 : vector<16x16xf32>
    %cst_39 = arith.constant dense<0xFF800000> : vector<16xf32>
    %95 = vector.multi_reduction <maximumf>, %94, %cst_39 [1] : vector<16x16xf32> to vector<16xf32>
    %96 = vector.shape_cast %95 : vector<16xf32> to vector<16x1xf32>
    %97 = vector.broadcast %96 : vector<16x1xf32> to vector<16x16xf32>
    %98 = arith.subf %94, %97 : vector<16x16xf32>
    %99 = math.exp %98 : vector<16x16xf32>
    %cst_40 = arith.constant dense<0.000000e+00> : vector<16xf32>
    %100 = vector.multi_reduction <add>, %99, %cst_40 [1] : vector<16x16xf32> to vector<16xf32>
    %101 = vector.shape_cast %100 : vector<16xf32> to vector<16x1xf32>
    %102 = tpu.reciprocal %101 : vector<16x1xf32> -> vector<16x1xf32>
    %103 = vector.broadcast %102 : vector<16x1xf32> to vector<16x16xf32>
    %104 = arith.mulf %99, %103 : vector<16x16xf32>
    %105 = arith.truncf %104 : vector<16x16xf32> to vector<16x16xbf16>
    %cst_41 = arith.constant dense<0.000000e+00> : vector<16x64xf32>
    %106 = tpu.matmul %105, %90, %cst_41 {dimension_numbers = #tpu.dot_dimension_numbers<[1], [0], [0], [1], [0, 0, 1, 1], [], []>} : vector<16x16xbf16>, vector<16x64xbf16>, vector<16x64xf32> -> vector<16x64xf32>
    %107 = tpu.concatenate %62, %84, %106 in 1 : vector<16x64xf32>, vector<16x64xf32>, vector<16x64xf32> -> vector<16x192xf32>
    %108 = arith.truncf %107 : vector<16x192xf32> to vector<16x192xbf16>
    %cst_42 = arith.constant dense<0.000000e+00> : vector<16x192xf32>
    %109 = tpu.matmul %108, %38, %cst_42 {dimension_numbers = #tpu.dot_dimension_numbers<[1], [0], [0], [1], [0, 0, 1, 1], [], []>} : vector<16x192xbf16>, vector<192x192xbf16>, vector<16x192xf32> -> vector<16x192xf32>
    %110 = vector.broadcast %40 : vector<1x192xf32> to vector<16x192xf32>
    %111 = arith.addf %109, %110 : vector<16x192xf32>
    %112 = arith.addf %4, %111 : vector<16x192xf32>
    %c0_43 = arith.constant 0 : index
    %c0_44 = arith.constant 0 : index
    %c0_45 = arith.constant 0 : index
    %113 = vector.load %arg12[%c0_43, %c0_44, %c0_45] : memref<2x1x192xf32, #tpu.memory_space<vmem>>, vector<1x1x192xf32>
    %114 = vector.shape_cast %113 : vector<1x1x192xf32> to vector<1x192xf32>
    %c0_46 = arith.constant 0 : index
    %c0_47 = arith.constant 0 : index
    %c0_48 = arith.constant 0 : index
    %115 = vector.load %arg13[%c0_46, %c0_47, %c0_48] : memref<2x1x192xf32, #tpu.memory_space<vmem>>, vector<1x1x192xf32>
    %116 = vector.shape_cast %115 : vector<1x1x192xf32> to vector<1x192xf32>
    %cst_49 = arith.constant dense<0.000000e+00> : vector<16xf32>
    %117 = vector.multi_reduction <add>, %112, %cst_49 [1] : vector<16x192xf32> to vector<16xf32>
    %118 = vector.shape_cast %117 : vector<16xf32> to vector<16x1xf32>
    %cst_50 = arith.constant 1.920000e+02 : f32
    %119 = vector.broadcast %cst_50 : f32 to vector<16x1xf32>
    %120 = arith.divf %118, %119 : vector<16x1xf32>
    %121 = vector.broadcast %120 : vector<16x1xf32> to vector<16x192xf32>
    %122 = arith.subf %112, %121 : vector<16x192xf32>
    %123 = arith.mulf %122, %122 : vector<16x192xf32>
    %cst_51 = arith.constant dense<0.000000e+00> : vector<16xf32>
    %124 = vector.multi_reduction <add>, %123, %cst_51 [1] : vector<16x192xf32> to vector<16xf32>
    %125 = vector.shape_cast %124 : vector<16xf32> to vector<16x1xf32>
    %cst_52 = arith.constant 1.920000e+02 : f32
    %126 = vector.broadcast %cst_52 : f32 to vector<16x1xf32>
    %127 = arith.divf %125, %126 : vector<16x1xf32>
    %cst_53 = arith.constant 9.99999996E-13 : f32
    %128 = vector.broadcast %cst_53 : f32 to vector<16x1xf32>
    %129 = arith.addf %127, %128 : vector<16x1xf32>
    %130 = math.rsqrt %129 : vector<16x1xf32>
    %131 = vector.broadcast %130 : vector<16x1xf32> to vector<16x192xf32>
    %132 = arith.mulf %122, %131 : vector<16x192xf32>
    %133 = vector.broadcast %114 : vector<1x192xf32> to vector<16x192xf32>
    %134 = arith.mulf %132, %133 : vector<16x192xf32>
    %135 = vector.broadcast %116 : vector<1x192xf32> to vector<16x192xf32>
    %136 = arith.addf %134, %135 : vector<16x192xf32>
    %137 = arith.truncf %136 : vector<16x192xf32> to vector<16x192xbf16>
    %c0_54 = arith.constant 0 : index
    %c0_55 = arith.constant 0 : index
    %c0_56 = arith.constant 0 : index
    %138 = vector.load %arg14[%c0_54, %c0_55, %c0_56] : memref<2x192x768xbf16, #tpu.memory_space<vmem>>, vector<1x192x768xbf16>
    %139 = vector.shape_cast %138 : vector<1x192x768xbf16> to vector<192x768xbf16>
    %cst_57 = arith.constant dense<0.000000e+00> : vector<16x768xf32>
    %140 = tpu.matmul %137, %139, %cst_57 {dimension_numbers = #tpu.dot_dimension_numbers<[1], [0], [0], [1], [0, 0, 1, 1], [], []>} : vector<16x192xbf16>, vector<192x768xbf16>, vector<16x768xf32> -> vector<16x768xf32>
    %c0_58 = arith.constant 0 : index
    %c0_59 = arith.constant 0 : index
    %c0_60 = arith.constant 0 : index
    %141 = vector.load %arg15[%c0_58, %c0_59, %c0_60] : memref<2x1x768xf32, #tpu.memory_space<vmem>>, vector<1x1x768xf32>
    %142 = vector.shape_cast %141 : vector<1x1x768xf32> to vector<1x768xf32>
    %143 = vector.broadcast %142 : vector<1x768xf32> to vector<16x768xf32>
    %144 = arith.addf %140, %143 : vector<16x768xf32>
    %145 = arith.mulf %144, %144 : vector<16x768xf32>
    %cst_61 = arith.constant 5.000000e-01 : f32
    %146 = vector.broadcast %cst_61 : f32 to vector<16x768xf32>
    %147 = arith.mulf %146, %144 : vector<16x768xf32>
    %cst_62 = arith.constant 0.797884583 : f32
    %148 = vector.broadcast %cst_62 : f32 to vector<16x768xf32>
    %149 = arith.mulf %148, %144 : vector<16x768xf32>
    %cst_63 = arith.constant 4.471500e-02 : f32
    %150 = vector.broadcast %cst_63 : f32 to vector<16x768xf32>
    %151 = arith.mulf %150, %145 : vector<16x768xf32>
    %cst_64 = arith.constant 1.000000e+00 : f32
    %152 = vector.broadcast %cst_64 : f32 to vector<16x768xf32>
    %153 = arith.addf %152, %151 : vector<16x768xf32>
    %154 = arith.mulf %149, %153 : vector<16x768xf32>
    %155 = math.tanh %154 : vector<16x768xf32>
    %cst_65 = arith.constant 1.000000e+00 : f32
    %156 = vector.broadcast %cst_65 : f32 to vector<16x768xf32>
    %157 = arith.addf %156, %155 : vector<16x768xf32>
    %158 = arith.mulf %147, %157 : vector<16x768xf32>
    %159 = arith.truncf %158 : vector<16x768xf32> to vector<16x768xbf16>
    %c0_66 = arith.constant 0 : index
    %c0_67 = arith.constant 0 : index
    %c0_68 = arith.constant 0 : index
    %160 = vector.load %arg16[%c0_66, %c0_67, %c0_68] : memref<2x768x192xbf16, #tpu.memory_space<vmem>>, vector<1x768x192xbf16>
    %161 = vector.shape_cast %160 : vector<1x768x192xbf16> to vector<768x192xbf16>
    %cst_69 = arith.constant dense<0.000000e+00> : vector<16x192xf32>
    %162 = tpu.matmul %159, %161, %cst_69 {dimension_numbers = #tpu.dot_dimension_numbers<[1], [0], [0], [1], [0, 0, 1, 1], [], []>} : vector<16x768xbf16>, vector<768x192xbf16>, vector<16x192xf32> -> vector<16x192xf32>
    %163 = arith.addf %112, %162 : vector<16x192xf32>
    %c0_70 = arith.constant 0 : index
    %c0_71 = arith.constant 0 : index
    %c0_72 = arith.constant 0 : index
    %164 = vector.load %arg17[%c0_70, %c0_71, %c0_72] : memref<2x1x192xf32, #tpu.memory_space<vmem>>, vector<1x1x192xf32>
    %165 = vector.shape_cast %164 : vector<1x1x192xf32> to vector<1x192xf32>
    %166 = vector.broadcast %165 : vector<1x192xf32> to vector<16x192xf32>
    %167 = arith.addf %163, %166 : vector<16x192xf32>
    %c1 = arith.constant 1 : index
    %c0_73 = arith.constant 0 : index
    %c0_74 = arith.constant 0 : index
    %168 = vector.load %arg6[%c1, %c0_73, %c0_74] : memref<2x1x192xf32, #tpu.memory_space<vmem>>, vector<1x1x192xf32>
    %169 = vector.shape_cast %168 : vector<1x1x192xf32> to vector<1x192xf32>
    %c1_75 = arith.constant 1 : index
    %c0_76 = arith.constant 0 : index
    %c0_77 = arith.constant 0 : index
    %170 = vector.load %arg7[%c1_75, %c0_76, %c0_77] : memref<2x1x192xf32, #tpu.memory_space<vmem>>, vector<1x1x192xf32>
    %171 = vector.shape_cast %170 : vector<1x1x192xf32> to vector<1x192xf32>
    %cst_78 = arith.constant dense<0.000000e+00> : vector<16xf32>
    %172 = vector.multi_reduction <add>, %167, %cst_78 [1] : vector<16x192xf32> to vector<16xf32>
    %173 = vector.shape_cast %172 : vector<16xf32> to vector<16x1xf32>
    %cst_79 = arith.constant 1.920000e+02 : f32
    %174 = vector.broadcast %cst_79 : f32 to vector<16x1xf32>
    %175 = arith.divf %173, %174 : vector<16x1xf32>
    %176 = vector.broadcast %175 : vector<16x1xf32> to vector<16x192xf32>
    %177 = arith.subf %167, %176 : vector<16x192xf32>
    %178 = arith.mulf %177, %177 : vector<16x192xf32>
    %cst_80 = arith.constant dense<0.000000e+00> : vector<16xf32>
    %179 = vector.multi_reduction <add>, %178, %cst_80 [1] : vector<16x192xf32> to vector<16xf32>
    %180 = vector.shape_cast %179 : vector<16xf32> to vector<16x1xf32>
    %cst_81 = arith.constant 1.920000e+02 : f32
    %181 = vector.broadcast %cst_81 : f32 to vector<16x1xf32>
    %182 = arith.divf %180, %181 : vector<16x1xf32>
    %cst_82 = arith.constant 9.99999996E-13 : f32
    %183 = vector.broadcast %cst_82 : f32 to vector<16x1xf32>
    %184 = arith.addf %182, %183 : vector<16x1xf32>
    %185 = math.rsqrt %184 : vector<16x1xf32>
    %186 = vector.broadcast %185 : vector<16x1xf32> to vector<16x192xf32>
    %187 = arith.mulf %177, %186 : vector<16x192xf32>
    %188 = vector.broadcast %169 : vector<1x192xf32> to vector<16x192xf32>
    %189 = arith.mulf %187, %188 : vector<16x192xf32>
    %190 = vector.broadcast %171 : vector<1x192xf32> to vector<16x192xf32>
    %191 = arith.addf %189, %190 : vector<16x192xf32>
    %192 = arith.truncf %191 : vector<16x192xf32> to vector<16x192xbf16>
    %c1_83 = arith.constant 1 : index
    %c0_84 = arith.constant 0 : index
    %c0_85 = arith.constant 0 : index
    %193 = vector.load %arg8[%c1_83, %c0_84, %c0_85] : memref<2x192x576xbf16, #tpu.memory_space<vmem>>, vector<1x192x576xbf16>
    %194 = vector.shape_cast %193 : vector<1x192x576xbf16> to vector<192x576xbf16>
    %cst_86 = arith.constant dense<0.000000e+00> : vector<16x576xf32>
    %195 = tpu.matmul %192, %194, %cst_86 {dimension_numbers = #tpu.dot_dimension_numbers<[1], [0], [0], [1], [0, 0, 1, 1], [], []>} : vector<16x192xbf16>, vector<192x576xbf16>, vector<16x576xf32> -> vector<16x576xf32>
    %c1_87 = arith.constant 1 : index
    %c0_88 = arith.constant 0 : index
    %c0_89 = arith.constant 0 : index
    %196 = vector.load %arg9[%c1_87, %c0_88, %c0_89] : memref<2x1x576xf32, #tpu.memory_space<vmem>>, vector<1x1x576xf32>
    %197 = vector.shape_cast %196 : vector<1x1x576xf32> to vector<1x576xf32>
    %198 = vector.broadcast %197 : vector<1x576xf32> to vector<16x576xf32>
    %199 = arith.addf %195, %198 : vector<16x576xf32>
    %c1_90 = arith.constant 1 : index
    %c0_91 = arith.constant 0 : index
    %c0_92 = arith.constant 0 : index
    %200 = vector.load %arg10[%c1_90, %c0_91, %c0_92] : memref<2x192x192xbf16, #tpu.memory_space<vmem>>, vector<1x192x192xbf16>
    %201 = vector.shape_cast %200 : vector<1x192x192xbf16> to vector<192x192xbf16>
    %c1_93 = arith.constant 1 : index
    %c0_94 = arith.constant 0 : index
    %c0_95 = arith.constant 0 : index
    %202 = vector.load %arg11[%c1_93, %c0_94, %c0_95] : memref<2x1x192xf32, #tpu.memory_space<vmem>>, vector<1x1x192xf32>
    %203 = vector.shape_cast %202 : vector<1x1x192xf32> to vector<1x192xf32>
    %204 = vector.extract_strided_slice %199 {offsets = [0, 0], sizes = [16, 64], strides = [1, 1]} : vector<16x576xf32> to vector<16x64xf32>
    %205 = arith.truncf %204 : vector<16x64xf32> to vector<16x64xbf16>
    %206 = vector.extract_strided_slice %199 {offsets = [0, 192], sizes = [16, 64], strides = [1, 1]} : vector<16x576xf32> to vector<16x64xf32>
    %207 = arith.truncf %206 : vector<16x64xf32> to vector<16x64xbf16>
    %208 = vector.extract_strided_slice %199 {offsets = [0, 384], sizes = [16, 64], strides = [1, 1]} : vector<16x576xf32> to vector<16x64xf32>
    %209 = arith.truncf %208 : vector<16x64xf32> to vector<16x64xbf16>
    %cst_96 = arith.constant dense<0.000000e+00> : vector<16x16xf32>
    %210 = tpu.matmul %205, %207, %cst_96 {dimension_numbers = #tpu.dot_dimension_numbers<[1], [1], [0], [0], [0, 0, 1, 0], [], []>} : vector<16x64xbf16>, vector<16x64xbf16>, vector<16x16xf32> -> vector<16x16xf32>
    %cst_97 = arith.constant 1.250000e-01 : f32
    %211 = vector.broadcast %cst_97 : f32 to vector<16x16xf32>
    %212 = arith.mulf %210, %211 : vector<16x16xf32>
    %213 = arith.addf %212, %3 : vector<16x16xf32>
    %cst_98 = arith.constant dense<0xFF800000> : vector<16xf32>
    %214 = vector.multi_reduction <maximumf>, %213, %cst_98 [1] : vector<16x16xf32> to vector<16xf32>
    %215 = vector.shape_cast %214 : vector<16xf32> to vector<16x1xf32>
    %216 = vector.broadcast %215 : vector<16x1xf32> to vector<16x16xf32>
    %217 = arith.subf %213, %216 : vector<16x16xf32>
    %218 = math.exp %217 : vector<16x16xf32>
    %cst_99 = arith.constant dense<0.000000e+00> : vector<16xf32>
    %219 = vector.multi_reduction <add>, %218, %cst_99 [1] : vector<16x16xf32> to vector<16xf32>
    %220 = vector.shape_cast %219 : vector<16xf32> to vector<16x1xf32>
    %221 = tpu.reciprocal %220 : vector<16x1xf32> -> vector<16x1xf32>
    %222 = vector.broadcast %221 : vector<16x1xf32> to vector<16x16xf32>
    %223 = arith.mulf %218, %222 : vector<16x16xf32>
    %224 = arith.truncf %223 : vector<16x16xf32> to vector<16x16xbf16>
    %cst_100 = arith.constant dense<0.000000e+00> : vector<16x64xf32>
    %225 = tpu.matmul %224, %209, %cst_100 {dimension_numbers = #tpu.dot_dimension_numbers<[1], [0], [0], [1], [0, 0, 1, 1], [], []>} : vector<16x16xbf16>, vector<16x64xbf16>, vector<16x64xf32> -> vector<16x64xf32>
    %226 = vector.extract_strided_slice %199 {offsets = [0, 64], sizes = [16, 64], strides = [1, 1]} : vector<16x576xf32> to vector<16x64xf32>
    %227 = arith.truncf %226 : vector<16x64xf32> to vector<16x64xbf16>
    %228 = vector.extract_strided_slice %199 {offsets = [0, 256], sizes = [16, 64], strides = [1, 1]} : vector<16x576xf32> to vector<16x64xf32>
    %229 = arith.truncf %228 : vector<16x64xf32> to vector<16x64xbf16>
    %230 = vector.extract_strided_slice %199 {offsets = [0, 448], sizes = [16, 64], strides = [1, 1]} : vector<16x576xf32> to vector<16x64xf32>
    %231 = arith.truncf %230 : vector<16x64xf32> to vector<16x64xbf16>
    %cst_101 = arith.constant dense<0.000000e+00> : vector<16x16xf32>
    %232 = tpu.matmul %227, %229, %cst_101 {dimension_numbers = #tpu.dot_dimension_numbers<[1], [1], [0], [0], [0, 0, 1, 0], [], []>} : vector<16x64xbf16>, vector<16x64xbf16>, vector<16x16xf32> -> vector<16x16xf32>
    %cst_102 = arith.constant 1.250000e-01 : f32
    %233 = vector.broadcast %cst_102 : f32 to vector<16x16xf32>
    %234 = arith.mulf %232, %233 : vector<16x16xf32>
    %235 = arith.addf %234, %3 : vector<16x16xf32>
    %cst_103 = arith.constant dense<0xFF800000> : vector<16xf32>
    %236 = vector.multi_reduction <maximumf>, %235, %cst_103 [1] : vector<16x16xf32> to vector<16xf32>
    %237 = vector.shape_cast %236 : vector<16xf32> to vector<16x1xf32>
    %238 = vector.broadcast %237 : vector<16x1xf32> to vector<16x16xf32>
    %239 = arith.subf %235, %238 : vector<16x16xf32>
    %240 = math.exp %239 : vector<16x16xf32>
    %cst_104 = arith.constant dense<0.000000e+00> : vector<16xf32>
    %241 = vector.multi_reduction <add>, %240, %cst_104 [1] : vector<16x16xf32> to vector<16xf32>
    %242 = vector.shape_cast %241 : vector<16xf32> to vector<16x1xf32>
    %243 = tpu.reciprocal %242 : vector<16x1xf32> -> vector<16x1xf32>
    %244 = vector.broadcast %243 : vector<16x1xf32> to vector<16x16xf32>
    %245 = arith.mulf %240, %244 : vector<16x16xf32>
    %246 = arith.truncf %245 : vector<16x16xf32> to vector<16x16xbf16>
    %cst_105 = arith.constant dense<0.000000e+00> : vector<16x64xf32>
    %247 = tpu.matmul %246, %231, %cst_105 {dimension_numbers = #tpu.dot_dimension_numbers<[1], [0], [0], [1], [0, 0, 1, 1], [], []>} : vector<16x16xbf16>, vector<16x64xbf16>, vector<16x64xf32> -> vector<16x64xf32>
    %248 = vector.extract_strided_slice %199 {offsets = [0, 128], sizes = [16, 64], strides = [1, 1]} : vector<16x576xf32> to vector<16x64xf32>
    %249 = arith.truncf %248 : vector<16x64xf32> to vector<16x64xbf16>
    %250 = vector.extract_strided_slice %199 {offsets = [0, 320], sizes = [16, 64], strides = [1, 1]} : vector<16x576xf32> to vector<16x64xf32>
    %251 = arith.truncf %250 : vector<16x64xf32> to vector<16x64xbf16>
    %252 = vector.extract_strided_slice %199 {offsets = [0, 512], sizes = [16, 64], strides = [1, 1]} : vector<16x576xf32> to vector<16x64xf32>
    %253 = arith.truncf %252 : vector<16x64xf32> to vector<16x64xbf16>
    %cst_106 = arith.constant dense<0.000000e+00> : vector<16x16xf32>
    %254 = tpu.matmul %249, %251, %cst_106 {dimension_numbers = #tpu.dot_dimension_numbers<[1], [1], [0], [0], [0, 0, 1, 0], [], []>} : vector<16x64xbf16>, vector<16x64xbf16>, vector<16x16xf32> -> vector<16x16xf32>
    %cst_107 = arith.constant 1.250000e-01 : f32
    %255 = vector.broadcast %cst_107 : f32 to vector<16x16xf32>
    %256 = arith.mulf %254, %255 : vector<16x16xf32>
    %257 = arith.addf %256, %3 : vector<16x16xf32>
    %cst_108 = arith.constant dense<0xFF800000> : vector<16xf32>
    %258 = vector.multi_reduction <maximumf>, %257, %cst_108 [1] : vector<16x16xf32> to vector<16xf32>
    %259 = vector.shape_cast %258 : vector<16xf32> to vector<16x1xf32>
    %260 = vector.broadcast %259 : vector<16x1xf32> to vector<16x16xf32>
    %261 = arith.subf %257, %260 : vector<16x16xf32>
    %262 = math.exp %261 : vector<16x16xf32>
    %cst_109 = arith.constant dense<0.000000e+00> : vector<16xf32>
    %263 = vector.multi_reduction <add>, %262, %cst_109 [1] : vector<16x16xf32> to vector<16xf32>
    %264 = vector.shape_cast %263 : vector<16xf32> to vector<16x1xf32>
    %265 = tpu.reciprocal %264 : vector<16x1xf32> -> vector<16x1xf32>
    %266 = vector.broadcast %265 : vector<16x1xf32> to vector<16x16xf32>
    %267 = arith.mulf %262, %266 : vector<16x16xf32>
    %268 = arith.truncf %267 : vector<16x16xf32> to vector<16x16xbf16>
    %cst_110 = arith.constant dense<0.000000e+00> : vector<16x64xf32>
    %269 = tpu.matmul %268, %253, %cst_110 {dimension_numbers = #tpu.dot_dimension_numbers<[1], [0], [0], [1], [0, 0, 1, 1], [], []>} : vector<16x16xbf16>, vector<16x64xbf16>, vector<16x64xf32> -> vector<16x64xf32>
    %270 = tpu.concatenate %225, %247, %269 in 1 : vector<16x64xf32>, vector<16x64xf32>, vector<16x64xf32> -> vector<16x192xf32>
    %271 = arith.truncf %270 : vector<16x192xf32> to vector<16x192xbf16>
    %cst_111 = arith.constant dense<0.000000e+00> : vector<16x192xf32>
    %272 = tpu.matmul %271, %201, %cst_111 {dimension_numbers = #tpu.dot_dimension_numbers<[1], [0], [0], [1], [0, 0, 1, 1], [], []>} : vector<16x192xbf16>, vector<192x192xbf16>, vector<16x192xf32> -> vector<16x192xf32>
    %273 = vector.broadcast %203 : vector<1x192xf32> to vector<16x192xf32>
    %274 = arith.addf %272, %273 : vector<16x192xf32>
    %275 = arith.addf %167, %274 : vector<16x192xf32>
    %c1_112 = arith.constant 1 : index
    %c0_113 = arith.constant 0 : index
    %c0_114 = arith.constant 0 : index
    %276 = vector.load %arg12[%c1_112, %c0_113, %c0_114] : memref<2x1x192xf32, #tpu.memory_space<vmem>>, vector<1x1x192xf32>
    %277 = vector.shape_cast %276 : vector<1x1x192xf32> to vector<1x192xf32>
    %c1_115 = arith.constant 1 : index
    %c0_116 = arith.constant 0 : index
    %c0_117 = arith.constant 0 : index
    %278 = vector.load %arg13[%c1_115, %c0_116, %c0_117] : memref<2x1x192xf32, #tpu.memory_space<vmem>>, vector<1x1x192xf32>
    %279 = vector.shape_cast %278 : vector<1x1x192xf32> to vector<1x192xf32>
    %cst_118 = arith.constant dense<0.000000e+00> : vector<16xf32>
    %280 = vector.multi_reduction <add>, %275, %cst_118 [1] : vector<16x192xf32> to vector<16xf32>
    %281 = vector.shape_cast %280 : vector<16xf32> to vector<16x1xf32>
    %cst_119 = arith.constant 1.920000e+02 : f32
    %282 = vector.broadcast %cst_119 : f32 to vector<16x1xf32>
    %283 = arith.divf %281, %282 : vector<16x1xf32>
    %284 = vector.broadcast %283 : vector<16x1xf32> to vector<16x192xf32>
    %285 = arith.subf %275, %284 : vector<16x192xf32>
    %286 = arith.mulf %285, %285 : vector<16x192xf32>
    %cst_120 = arith.constant dense<0.000000e+00> : vector<16xf32>
    %287 = vector.multi_reduction <add>, %286, %cst_120 [1] : vector<16x192xf32> to vector<16xf32>
    %288 = vector.shape_cast %287 : vector<16xf32> to vector<16x1xf32>
    %cst_121 = arith.constant 1.920000e+02 : f32
    %289 = vector.broadcast %cst_121 : f32 to vector<16x1xf32>
    %290 = arith.divf %288, %289 : vector<16x1xf32>
    %cst_122 = arith.constant 9.99999996E-13 : f32
    %291 = vector.broadcast %cst_122 : f32 to vector<16x1xf32>
    %292 = arith.addf %290, %291 : vector<16x1xf32>
    %293 = math.rsqrt %292 : vector<16x1xf32>
    %294 = vector.broadcast %293 : vector<16x1xf32> to vector<16x192xf32>
    %295 = arith.mulf %285, %294 : vector<16x192xf32>
    %296 = vector.broadcast %277 : vector<1x192xf32> to vector<16x192xf32>
    %297 = arith.mulf %295, %296 : vector<16x192xf32>
    %298 = vector.broadcast %279 : vector<1x192xf32> to vector<16x192xf32>
    %299 = arith.addf %297, %298 : vector<16x192xf32>
    %300 = arith.truncf %299 : vector<16x192xf32> to vector<16x192xbf16>
    %c1_123 = arith.constant 1 : index
    %c0_124 = arith.constant 0 : index
    %c0_125 = arith.constant 0 : index
    %301 = vector.load %arg14[%c1_123, %c0_124, %c0_125] : memref<2x192x768xbf16, #tpu.memory_space<vmem>>, vector<1x192x768xbf16>
    %302 = vector.shape_cast %301 : vector<1x192x768xbf16> to vector<192x768xbf16>
    %cst_126 = arith.constant dense<0.000000e+00> : vector<16x768xf32>
    %303 = tpu.matmul %300, %302, %cst_126 {dimension_numbers = #tpu.dot_dimension_numbers<[1], [0], [0], [1], [0, 0, 1, 1], [], []>} : vector<16x192xbf16>, vector<192x768xbf16>, vector<16x768xf32> -> vector<16x768xf32>
    %c1_127 = arith.constant 1 : index
    %c0_128 = arith.constant 0 : index
    %c0_129 = arith.constant 0 : index
    %304 = vector.load %arg15[%c1_127, %c0_128, %c0_129] : memref<2x1x768xf32, #tpu.memory_space<vmem>>, vector<1x1x768xf32>
    %305 = vector.shape_cast %304 : vector<1x1x768xf32> to vector<1x768xf32>
    %306 = vector.broadcast %305 : vector<1x768xf32> to vector<16x768xf32>
    %307 = arith.addf %303, %306 : vector<16x768xf32>
    %308 = arith.mulf %307, %307 : vector<16x768xf32>
    %cst_130 = arith.constant 5.000000e-01 : f32
    %309 = vector.broadcast %cst_130 : f32 to vector<16x768xf32>
    %310 = arith.mulf %309, %307 : vector<16x768xf32>
    %cst_131 = arith.constant 0.797884583 : f32
    %311 = vector.broadcast %cst_131 : f32 to vector<16x768xf32>
    %312 = arith.mulf %311, %307 : vector<16x768xf32>
    %cst_132 = arith.constant 4.471500e-02 : f32
    %313 = vector.broadcast %cst_132 : f32 to vector<16x768xf32>
    %314 = arith.mulf %313, %308 : vector<16x768xf32>
    %cst_133 = arith.constant 1.000000e+00 : f32
    %315 = vector.broadcast %cst_133 : f32 to vector<16x768xf32>
    %316 = arith.addf %315, %314 : vector<16x768xf32>
    %317 = arith.mulf %312, %316 : vector<16x768xf32>
    %318 = math.tanh %317 : vector<16x768xf32>
    %cst_134 = arith.constant 1.000000e+00 : f32
    %319 = vector.broadcast %cst_134 : f32 to vector<16x768xf32>
    %320 = arith.addf %319, %318 : vector<16x768xf32>
    %321 = arith.mulf %310, %320 : vector<16x768xf32>
    %322 = arith.truncf %321 : vector<16x768xf32> to vector<16x768xbf16>
    %c1_135 = arith.constant 1 : index
    %c0_136 = arith.constant 0 : index
    %c0_137 = arith.constant 0 : index
    %323 = vector.load %arg16[%c1_135, %c0_136, %c0_137] : memref<2x768x192xbf16, #tpu.memory_space<vmem>>, vector<1x768x192xbf16>
    %324 = vector.shape_cast %323 : vector<1x768x192xbf16> to vector<768x192xbf16>
    %cst_138 = arith.constant dense<0.000000e+00> : vector<16x192xf32>
    %325 = tpu.matmul %322, %324, %cst_138 {dimension_numbers = #tpu.dot_dimension_numbers<[1], [0], [0], [1], [0, 0, 1, 1], [], []>} : vector<16x768xbf16>, vector<768x192xbf16>, vector<16x192xf32> -> vector<16x192xf32>
    %326 = arith.addf %275, %325 : vector<16x192xf32>
    %c1_139 = arith.constant 1 : index
    %c0_140 = arith.constant 0 : index
    %c0_141 = arith.constant 0 : index
    %327 = vector.load %arg17[%c1_139, %c0_140, %c0_141] : memref<2x1x192xf32, #tpu.memory_space<vmem>>, vector<1x1x192xf32>
    %328 = vector.shape_cast %327 : vector<1x1x192xf32> to vector<1x192xf32>
    %329 = vector.broadcast %328 : vector<1x192xf32> to vector<16x192xf32>
    %330 = arith.addf %326, %329 : vector<16x192xf32>
    %c0_142 = arith.constant 0 : index
    %c0_143 = arith.constant 0 : index
    %331 = vector.load %arg25[%c0_142, %c0_143] : memref<16x192xf32, #tpu.memory_space<vmem>>, vector<16x192xf32>
    tpu.vector_store %arg25[%c0_142, %c0_143], %330 {strides = array<i32>} : memref<16x192xf32, #tpu.memory_space<vmem>>, vector<16x192xf32>,
    %c5_i32 = arith.constant 5 : i32
    %332 = arith.cmpi eq, %arg0, %c5_i32 : i32
    %333 = arith.extui %332 : i1 to i32
    %c0_i32_144 = arith.constant 0 : i32
    %334 = arith.cmpi ne, %333, %c0_i32_144 : i32
    scf.if %334 {
      %335 = vector.extract_strided_slice %330 {offsets = [0, 0], sizes = [5, 192], strides = [1, 1]} : vector<16x192xf32> to vector<5x192xf32>
      %cst_145 = arith.constant dense<0.000000e+00> : vector<192xf32>
      %336 = vector.multi_reduction <add>, %335, %cst_145 [0] : vector<5x192xf32> to vector<192xf32>
      %337 = vector.shape_cast %336 : vector<192xf32> to vector<1x192xf32>
      %338 = vector.extract_strided_slice %330 {offsets = [8, 0], sizes = [5, 192], strides = [1, 1]} : vector<16x192xf32> to vector<5x192xf32>
      %cst_146 = arith.constant dense<0.000000e+00> : vector<192xf32>
      %339 = vector.multi_reduction <add>, %338, %cst_146 [0] : vector<5x192xf32> to vector<192xf32>
      %340 = vector.shape_cast %339 : vector<192xf32> to vector<1x192xf32>
      %341 = tpu.concatenate %337, %340 in 0 : vector<1x192xf32>, vector<1x192xf32> -> vector<2x192xf32>
      %cst_147 = arith.constant 2.000000e-01 : f32
      %342 = vector.broadcast %cst_147 : f32 to vector<2x192xf32>
      %343 = arith.mulf %341, %342 : vector<2x192xf32>
      %344 = arith.truncf %343 : vector<2x192xf32> to vector<2x192xbf16>
      %c0_148 = arith.constant 0 : index
      %c0_149 = arith.constant 0 : index
      %345 = vector.load %arg18[%c0_148, %c0_149] : memref<192x128xbf16, #tpu.memory_space<vmem>>, vector<192x128xbf16>
      %cst_150 = arith.constant dense<0.000000e+00> : vector<2x128xf32>
      %346 = tpu.matmul %344, %345, %cst_150 {dimension_numbers = #tpu.dot_dimension_numbers<[1], [0], [0], [1], [0, 0, 1, 1], [], []>} : vector<2x192xbf16>, vector<192x128xbf16>, vector<2x128xf32> -> vector<2x128xf32>
      %c0_151 = arith.constant 0 : index
      %c0_152 = arith.constant 0 : index
      %347 = vector.load %arg19[%c0_151, %c0_152] : memref<1x128xf32, #tpu.memory_space<vmem>>, vector<1x128xf32>
      %348 = vector.broadcast %347 : vector<1x128xf32> to vector<2x128xf32>
      %349 = arith.addf %346, %348 : vector<2x128xf32>
      %c0_153 = arith.constant 0 : index
      %c0_154 = arith.constant 0 : index
      %350 = vector.load %arg20[%c0_153, %c0_154] : memref<1x128xf32, #tpu.memory_space<vmem>>, vector<1x128xf32>
      %351 = vector.broadcast %350 : vector<1x128xf32> to vector<2x128xf32>
      %352 = arith.mulf %349, %351 : vector<2x128xf32>
      %c0_155 = arith.constant 0 : index
      %c0_156 = arith.constant 0 : index
      %353 = vector.load %arg21[%c0_155, %c0_156] : memref<1x128xf32, #tpu.memory_space<vmem>>, vector<1x128xf32>
      %354 = vector.broadcast %353 : vector<1x128xf32> to vector<2x128xf32>
      %355 = arith.addf %352, %354 : vector<2x128xf32>
      %cst_157 = arith.constant 0.000000e+00 : f32
      %356 = vector.broadcast %cst_157 : f32 to vector<2x128xf32>
      %357 = arith.maximumf %355, %356 : vector<2x128xf32>
      %358 = arith.truncf %357 : vector<2x128xf32> to vector<2x128xbf16>
      %c0_158 = arith.constant 0 : index
      %c0_159 = arith.constant 0 : index
      %359 = vector.load %arg22[%c0_158, %c0_159] : memref<128x4xbf16, #tpu.memory_space<vmem>>, vector<128x4xbf16>
      %cst_160 = arith.constant dense<0.000000e+00> : vector<2x4xf32>
      %360 = tpu.matmul %358, %359, %cst_160 {dimension_numbers = #tpu.dot_dimension_numbers<[1], [0], [0], [1], [0, 0, 1, 1], [], []>} : vector<2x128xbf16>, vector<128x4xbf16>, vector<2x4xf32> -> vector<2x4xf32>
      %c0_161 = arith.constant 0 : index
      %c0_162 = arith.constant 0 : index
      %361 = vector.load %arg23[%c0_161, %c0_162] : memref<1x4xf32, #tpu.memory_space<vmem>>, vector<1x4xf32>
      %362 = vector.broadcast %361 : vector<1x4xf32> to vector<2x4xf32>
      %363 = arith.addf %360, %362 : vector<2x4xf32>
      %c0_163 = arith.constant 0 : index
      %c0_164 = arith.constant 0 : index
      %364 = vector.load %arg24[%c0_163, %c0_164] : memref<2x4xf32, #tpu.memory_space<vmem>>, vector<2x4xf32>
      tpu.vector_store %arg24[%c0_163, %c0_164], %363 {strides = array<i32>} : memref<2x4xf32, #tpu.memory_space<vmem>>, vector<2x4xf32>,
    } else {
    }
    return
  }
  func.func @transform_0(%arg0: i32) -> (i32, i32) {
    %c0_i32 = arith.constant 0 : i32
    %c0_i32_0 = arith.constant 0 : i32
    %c0_i32_1 = arith.constant 0 : i32
    return %c0_i32, %c0_i32_0 : i32, i32
  }
  func.func @transform_1(%arg0: i32) -> (i32, i32) {
    %c0_i32 = arith.constant 0 : i32
    %c0_i32_0 = arith.constant 0 : i32
    %c0_i32_1 = arith.constant 0 : i32
    return %c0_i32, %c0_i32_0 : i32, i32
  }
  func.func @transform_2(%arg0: i32) -> (i32, i32) {
    %c0_i32 = arith.constant 0 : i32
    %c0_i32_0 = arith.constant 0 : i32
    %c0_i32_1 = arith.constant 0 : i32
    return %c0_i32, %c0_i32_0 : i32, i32
  }
  func.func @transform_3(%arg0: i32) -> (i32, i32) {
    %c0_i32 = arith.constant 0 : i32
    %c0_i32_0 = arith.constant 0 : i32
    %c0_i32_1 = arith.constant 0 : i32
    return %c0_i32, %c0_i32_0 : i32, i32
  }
  func.func @transform_4(%arg0: i32) -> (i32, i32) {
    %c0_i32 = arith.constant 0 : i32
    %c0_i32_0 = arith.constant 0 : i32
    %c0_i32_1 = arith.constant 0 : i32
    return %c0_i32, %c0_i32_0 : i32, i32
  }
  func.func @transform_5(%arg0: i32) -> (i32, i32, i32) {
    %c0_i32 = arith.constant 0 : i32
    %c0_i32_0 = arith.constant 0 : i32
    %c0_i32_1 = arith.constant 0 : i32
    return %arg0, %c0_i32, %c0_i32_0 : i32, i32, i32
  }
  func.func @transform_6(%arg0: i32) -> (i32, i32, i32) {
    %c0_i32 = arith.constant 0 : i32
    %c0_i32_0 = arith.constant 0 : i32
    %c0_i32_1 = arith.constant 0 : i32
    return %arg0, %c0_i32, %c0_i32_0 : i32, i32, i32
  }
  func.func @transform_7(%arg0: i32) -> (i32, i32, i32) {
    %c0_i32 = arith.constant 0 : i32
    %c0_i32_0 = arith.constant 0 : i32
    %c0_i32_1 = arith.constant 0 : i32
    return %arg0, %c0_i32, %c0_i32_0 : i32, i32, i32
  }
  func.func @transform_8(%arg0: i32) -> (i32, i32, i32) {
    %c0_i32 = arith.constant 0 : i32
    %c0_i32_0 = arith.constant 0 : i32
    %c0_i32_1 = arith.constant 0 : i32
    return %arg0, %c0_i32, %c0_i32_0 : i32, i32, i32
  }
  func.func @transform_9(%arg0: i32) -> (i32, i32, i32) {
    %c0_i32 = arith.constant 0 : i32
    %c0_i32_0 = arith.constant 0 : i32
    %c0_i32_1 = arith.constant 0 : i32
    return %arg0, %c0_i32, %c0_i32_0 : i32, i32, i32
  }
  func.func @transform_10(%arg0: i32) -> (i32, i32, i32) {
    %c0_i32 = arith.constant 0 : i32
    %c0_i32_0 = arith.constant 0 : i32
    %c0_i32_1 = arith.constant 0 : i32
    return %arg0, %c0_i32, %c0_i32_0 : i32, i32, i32
  }
  func.func @transform_11(%arg0: i32) -> (i32, i32, i32) {
    %c0_i32 = arith.constant 0 : i32
    %c0_i32_0 = arith.constant 0 : i32
    %c0_i32_1 = arith.constant 0 : i32
    return %arg0, %c0_i32, %c0_i32_0 : i32, i32, i32
  }
  func.func @transform_12(%arg0: i32) -> (i32, i32, i32) {
    %c0_i32 = arith.constant 0 : i32
    %c0_i32_0 = arith.constant 0 : i32
    %c0_i32_1 = arith.constant 0 : i32
    return %arg0, %c0_i32, %c0_i32_0 : i32, i32, i32
  }
  func.func @transform_13(%arg0: i32) -> (i32, i32, i32) {
    %c0_i32 = arith.constant 0 : i32
    %c0_i32_0 = arith.constant 0 : i32
    %c0_i32_1 = arith.constant 0 : i32
    return %arg0, %c0_i32, %c0_i32_0 : i32, i32, i32
  }
  func.func @transform_14(%arg0: i32) -> (i32, i32, i32) {
    %c0_i32 = arith.constant 0 : i32
    %c0_i32_0 = arith.constant 0 : i32
    %c0_i32_1 = arith.constant 0 : i32
    return %arg0, %c0_i32, %c0_i32_0 : i32, i32, i32
  }
  func.func @transform_15(%arg0: i32) -> (i32, i32, i32) {
    %c0_i32 = arith.constant 0 : i32
    %c0_i32_0 = arith.constant 0 : i32
    %c0_i32_1 = arith.constant 0 : i32
    return %arg0, %c0_i32, %c0_i32_0 : i32, i32, i32
  }
  func.func @transform_16(%arg0: i32) -> (i32, i32, i32) {
    %c0_i32 = arith.constant 0 : i32
    %c0_i32_0 = arith.constant 0 : i32
    %c0_i32_1 = arith.constant 0 : i32
    return %arg0, %c0_i32, %c0_i32_0 : i32, i32, i32
  }
  func.func @transform_17(%arg0: i32) -> (i32, i32) {
    %c0_i32 = arith.constant 0 : i32
    %c0_i32_0 = arith.constant 0 : i32
    %c0_i32_1 = arith.constant 0 : i32
    return %c0_i32, %c0_i32_0 : i32, i32
  }
  func.func @transform_18(%arg0: i32) -> (i32, i32) {
    %c0_i32 = arith.constant 0 : i32
    %c0_i32_0 = arith.constant 0 : i32
    %c0_i32_1 = arith.constant 0 : i32
    return %c0_i32, %c0_i32_0 : i32, i32
  }
  func.func @transform_19(%arg0: i32) -> (i32, i32) {
    %c0_i32 = arith.constant 0 : i32
    %c0_i32_0 = arith.constant 0 : i32
    %c0_i32_1 = arith.constant 0 : i32
    return %c0_i32, %c0_i32_0 : i32, i32
  }
  func.func @transform_20(%arg0: i32) -> (i32, i32) {
    %c0_i32 = arith.constant 0 : i32
    %c0_i32_0 = arith.constant 0 : i32
    %c0_i32_1 = arith.constant 0 : i32
    return %c0_i32, %c0_i32_0 : i32, i32
  }
  func.func @transform_21(%arg0: i32) -> (i32, i32) {
    %c0_i32 = arith.constant 0 : i32
    %c0_i32_0 = arith.constant 0 : i32
    %c0_i32_1 = arith.constant 0 : i32
    return %c0_i32, %c0_i32_0 : i32, i32
  }
  func.func @transform_22(%arg0: i32) -> (i32, i32) {
    %c0_i32 = arith.constant 0 : i32
    %c0_i32_0 = arith.constant 0 : i32
    %c0_i32_1 = arith.constant 0 : i32
    return %c0_i32, %c0_i32_0 : i32, i32
  }
  func.func @transform_23(%arg0: i32) -> (i32, i32) {
    %c0_i32 = arith.constant 0 : i32
    %c0_i32_0 = arith.constant 0 : i32
    %c0_i32_1 = arith.constant 0 : i32
    return %c0_i32, %c0_i32_0 : i32, i32
  }
}

</mosaic_0001>

<bundles_post_ra>
// kernel: fine_tuned_model_fn.1
= control target key start
LH: loop header
LB: loop body
LE: loop exit
PB: predicated region body
PF: predicated region fallthrough
CT: control target
= control target key end

     0   :  { %s11504_s0 = inlined_call_operand.vmem [shape: f32[8,768], index: 0, kind: input, shape index: {}]   ;;  %s11505_s1 = inlined_call_operand.vmem [shape: bf16[768,192], index: 1, kind: input, shape index: {}]   ;;  %s11506_s2 = inlined_call_operand.vmem [shape: f32[1,192], index: 2, kind: input, shape index: {}]   ;;  %s11507_s3 = inlined_call_operand.vmem [shape: f32[8,192], index: 3, kind: input, shape index: {}]   ;;  %s11508_s4 = inlined_call_operand.vmem [shape: f32[16,16], index: 4, kind: input, shape index: {}]   ;;  %s11509_s5 = inlined_call_operand.vmem [shape: f32[12,1,192], index: 5, kind: input, shape index: {}]   ;;  %s11510_s6 = inlined_call_operand.vmem [shape: f32[12,1,192], index: 6, kind: input, shape index: {}]   ;;  %s11511_s7 = inlined_call_operand.vmem [shape: bf16[12,192,576], index: 7, kind: input, shape index: {}]   ;;  %s11512_s8 = inlined_call_operand.vmem [shape: f32[12,1,576], index: 8, kind: input, shape index: {}]   ;;  %s11513_s9 = inlined_call_operand.vmem [shape: bf16[12,192,192], index: 9, kind: input, shape index: {}]   ;;  %s11514_s10 = inlined_call_operand.vmem [shape: f32[12,1,192], index: 10, kind: input, shape index: {}]   ;;  %s11515_s11 = inlined_call_operand.vmem [shape: f32[12,1,192], index: 11, kind: input, shape index: {}]   ;;  %s11516_s12 = inlined_call_operand.vmem [shape: f32[12,1,192], index: 12, kind: input, shape index: {}]   ;;  %s11517_s13 = inlined_call_operand.vmem [shape: bf16[12,192,768], index: 13, kind: input, shape index: {}]   ;;  %s11518_s14 = inlined_call_operand.vmem [shape: f32[12,1,768], index: 14, kind: input, shape index: {}]   ;;  %s11519_s15 = inlined_call_operand.vmem [shape: bf16[12,768,192], index: 15, kind: input, shape index: {}]   ;;  %s11520_s16 = inlined_call_operand.vmem [shape: f32[12,1,192], index: 16, kind: input, shape index: {}]   ;;  %s11521_s17 = inlined_call_operand.vmem [shape: bf16[192,128], index: 17, kind: input, shape index: {}]   ;;  %s11522_s18 = inlined_call_operand.vmem [shape: f32[1,128], index: 18, kind: input, shape index: {}]   ;;  %s11523_s19 = inlined_call_operand.vmem [shape: f32[1,128], index: 19, kind: input, shape index: {}]   ;;  %s11524_s20 = inlined_call_operand.vmem [shape: f32[1,128], index: 20, kind: input, shape index: {}]   ;;  %s11525_s21 = inlined_call_operand.vmem [shape: bf16[128,4], index: 21, kind: input, shape index: {}]   ;;  %s11526_s22 = inlined_call_operand.vmem [shape: f32[1,4], index: 22, kind: input, shape index: {}]   ;;  %s11527_s23 = inlined_call_operand.hbm [shape: f32[2,4], index: 23, kind: output, shape index: {}]  }
   0x1   :  { %11535 = sst [smem:[#allocation7_spill]] %s11504_s0 }
   0x2   :  { %11536 = sst [smem:[#allocation8_spill]] %s11505_s1 }
   0x3   :  { %11537 = sst [smem:[#allocation9_spill]] %s11506_s2 }
   0x4   :  { %11538 = sst [smem:[#allocation10_spill]] %s11507_s3 }
   0x5   :  { %11539 = sst [smem:[#allocation11_spill]] %s11508_s4 }
   0x6   :  { %11540 = sst [smem:[#allocation12_spill]] %s11509_s5 }
   0x7   :  { %11541 = sst [smem:[#allocation13_spill]] %s11510_s6 }
   0x8   :  { %11542 = sst [smem:[#allocation14_spill]] %s11511_s7 }
   0x9   :  { %11543 = sst [smem:[#allocation15_spill]] %s11512_s8 }
   0xa   :  { %11544 = sst [smem:[#allocation16_spill]] %s11513_s9 }
   0xb   :  { %11545 = sst [smem:[#allocation17_spill]] %s11514_s10 }
   0xc   :  { %11546 = sst [smem:[#allocation18_spill]] %s11515_s11 }
   0xd   :  { %11547 = sst [smem:[#allocation19_spill]] %s11521_s17 }
   0xe   :  { %11548 = sst [smem:[#allocation20_spill]] %s11522_s18 }
   0xf   :  { %11549 = sst [smem:[#allocation21_spill]] %s11523_s19 }
  0x10   :  { %11550 = sst [smem:[#allocation22_spill]] %s11524_s20 }
  0x11   :  { %11551 = sst [smem:[#allocation23_spill]] %s11525_s21 }
  0x12   :  { %11552 = sst [smem:[#allocation24_spill]] %s11526_s22 }
  0x13   :  { %11553 = sst [smem:[#allocation25_spill]] %s11527_s23 }
  0x14   :  { %28 = vsyncpa [#allocation4], 0  ;;  %s9965_s4 = smov 0  }
  0x15 LB: > { %11554 = sst [smem:[#allocation6_spill]] %s9835_s4  ;;  %s9971_s30 = sadd.s32 4294967295, %s9835_s4   ;;  %s9835_s4 = sphi %s9965_s4, %s34_s4  }
  0x16   : > { %p7660_p0 = scmp.ge.s32.totalorder %s9835_s4, 1  ;;  %p759_p1 = scmp.lt.s32.totalorder %s9835_s4, 7 }
  0x18   : > { %p760_p2 = pnand %p7660_p0, %p759_p1 }
  0x19   : > { %s7661_s24 = sshll.u32 (!%p760_p2), %s9971_s30, 1  ;;  %s11555_s2 = sld [smem:[#allocation12_spill]] (!%p760_p2) }
  0x1a   : > { %763 = sbr.rel (%p760_p2) target bundleno = 6263 (0x1877), region = 112  ;;  %p878_p3 = scmp.lt.s32.totalorder (!%p760_p2), %s7661_s24, 11 }
  0x1b   : > { %s11556_s28 = sld [smem:[#allocation13_spill]] (!%p760_p2)  ;;  %p7683_p4 = scmp.ne.s32.totalorder (!%p760_p2), %s9971_s30, 0 }
  0x1c   : > { %s11557_s4 = sld [smem:[#allocation14_spill]] (!%p760_p2) }
  0x1d   : > { %s11558_s10 = sld [smem:[#allocation17_spill]] (!%p760_p2) }
  0x1e   : > { %s11559_s8 = sld [smem:[#allocation15_spill]] (!%p760_p2) }
  0x1f   : > { %s11576_s24 = smov (!%p878_p3, %s7661_s24), 11  ;;  %s11560_s11 = sld [smem:[#allocation18_spill]] }
  0x20   : > { %s7662_s25 = sshll.u32 %s11576_s24, 1  ;;  %s8737_s5 = smul.u32 480, %s11576_s24 }
  0x21   : > { %s9979_s6 = scalar_lea.vmem %s11555_s2, %s7662_s25  ;;  %s9984_s29 = scalar_lea.vmem %s11556_s28, %s7662_s25 }
  0x22   : > { %s9989_s23 = scalar_lea.vmem %s11557_s4, %s8737_s5  ;;  %s8738_s22 = smul.u32 5, %s11576_s24 }
  0x23   : > { %s8739_s20 = smul.u32 192, %s11576_s24  ;;  %s9994_s21 = scalar_lea.vmem %s11558_s10, %s7662_s25 }
  0x24   : > { %s9999_s2 = scalar_lea.vmem %s11559_s8, %s8738_s22  ;;  %s11561_s9 = sld [smem:[#allocation16_spill]] }
  0x25   : > { %s10004_s28 = scalar_lea.vmem %s11560_s11, %s7662_s25  ;;  %s10014_s18 = scalar_lea.vmem %s11516_s12, %s7662_s25 }
  0x26   : > { %s8740_s19 = smul.u32 576, %s11576_s24  ;;  %s10019_s22 = scalar_lea.vmem %s11520_s16, %s7662_s25 }
  0x27   : > { %s8741_s26 = smul.u32 6, %s11576_s24  ;;  %s11562_s1 = sld [smem:[#allocation8_spill]] (!%p7683_p4) }
  0x28   : > { %s10024_s8 = scalar_lea.vmem %s11517_s13, %s8740_s19  ;;  %s8742_s3 = smul.u32 768, %s11576_s24 }
  0x29   : > { %957 = sbr.rel (%p7683_p4) target bundleno = 379 (0x17b), region = 116  ;;  %s11563_s17 = sld [smem:[#allocation7_spill]] (!%p7683_p4) }
  0x2a   : > { %s10009_s5 = scalar_lea.vmem %s11561_s9, %s8739_s20  ;;  %s10029_s9 = scalar_lea.vmem %s11518_s14, %s8741_s26 }
  0x2b   : > { %s10034_s11 = scalar_lea.vmem %s11519_s15, %s8742_s3  ;;  %s11564_s25 = sld [smem:[#allocation9_spill]] (!%p7683_p4) }
  0x2c   : > { %s11565_s24 = sld [smem:[#allocation10_spill]] (!%p7683_p4) }
  0x2e   : > { %v8765_v0 = vld [vmem:[%s11562_s1 + $0x74] ss:$8 sps:$4 sm:$0xff]   ;;  %v8767_v1 = vld [vmem:[%s11562_s1 + $0x70] ss:$8 sps:$4 sm:$0xff]   ;;  %v8771_v4 = vld [vmem:[%s11562_s1 + $0x64] ss:$8 sps:$4 sm:$0xff]  }
  0x2f   : > { %1558 = vmatprep.subr.bf16.mxu0 %v8765_v0  ;;  %v8768_v2 = vld [vmem:[%s11562_s1 + $0x174] ss:$8 sps:$4 sm:$0xff]   ;;  %v8770_v3 = vld [vmem:[%s11562_s1 + $0x170] ss:$8 sps:$4 sm:$0xff]   ;;  %v8773_v5 = vld [vmem:[%s11562_s1 + $0x60] ss:$8 sps:$4 sm:$0xff]  }
  0x30   : > { %1559 = vmatpush1.bf16.msra.mxu0 %v8767_v1  ;;  %1599 = vmatprep.subr.bf16.mxu1 %v8768_v2  ;;  %v8774_v6 = vld [vmem:[%s11562_s1 + $0x164] ss:$8 sps:$4 sm:$0xff]   ;;  %v8776_v7 = vld [vmem:[%s11562_s1 + $0x160] ss:$8 sps:$4 sm:$0xff]   ;;  %v8777_v8 = vld [vmem:[%s11562_s1 + $0x54] ss:$8 sps:$4 sm:$0xff]  }
  0x31   : > { %1600 = vmatpush1.bf16.msra.mxu1 %v8770_v3  ;;  %1560 = vmatprep.subr.bf16.mxu0 %v8771_v4  ;;  %v8779_v9 = vld [vmem:[%s11562_s1 + $0x50] ss:$8 sps:$4 sm:$0xff]   ;;  %v8780_v10 = vld [vmem:[%s11562_s1 + $0x154] ss:$8 sps:$4 sm:$0xff]   ;;  %v8783_v11 = vld [vmem:[%s11562_s1 + $0x44] ss:$8 sps:$4 sm:$0xff]  }
  0x32   : > { %1601 = vmatprep.subr.bf16.mxu1 %v8774_v6  ;;  %v8782_v12 = vld [vmem:[%s11562_s1 + $0x150] ss:$8 sps:$4 sm:$0xff]   ;;  %v8786_v13 = vld [vmem:[%s11562_s1 + $0x144] ss:$8 sps:$4 sm:$0xff]   ;;  %v8785_v14 = vld [vmem:[%s11562_s1 + $0x40] ss:$8 sps:$4 sm:$0xff]  }
  0x33   : > { %v8789_v15 = vld [vmem:[%s11562_s1 + $0x34] ss:$8 sps:$4 sm:$0xff]   ;;  %v8788_v16 = vld [vmem:[%s11562_s1 + $0x140] ss:$8 sps:$4 sm:$0xff]   ;;  %v8791_v18 = vld [vmem:[%s11562_s1 + $0x30] ss:$8 sps:$4 sm:$0xff]  }
  0x34   : > { %1561 = vmatpush1.bf16.msra.mxu0 %v8773_v5  ;;  %v8792_v17 = vld [vmem:[%s11562_s1 + $0x134] ss:$8 sps:$4 sm:$0xff]   ;;  %v8795_v19 = vld [vmem:[%s11562_s1 + $0x24] ss:$8 sps:$4 sm:$0xff]   ;;  %v8794_v20 = vld [vmem:[%s11562_s1 + $0x130] ss:$8 sps:$4 sm:$0xff]  }
  0x35   : > { %1562 = vmatprep.subr.bf16.mxu0 %v8777_v8  ;;  %1602 = vmatpush1.bf16.msra.mxu1 %v8776_v7  ;;  %v8798_v21 = vld [vmem:[%s11562_s1 + $0x124] ss:$8 sps:$4 sm:$0xff]   ;;  %v8797_v22 = vld [vmem:[%s11562_s1 + $0x20] ss:$8 sps:$4 sm:$0xff]   ;;  %v8801_v23 = vld [vmem:[%s11562_s1 + $0x14] ss:$8 sps:$4 sm:$0xff]  }
  0x36   : > { %1603 = vmatprep.subr.bf16.mxu1 %v8780_v10  ;;  %v8800_v24 = vld [vmem:[%s11562_s1 + $0x120] ss:$8 sps:$4 sm:$0xff]   ;;  %v8804_v25 = vld [vmem:[%s11562_s1 + $0x114] ss:$8 sps:$4 sm:$0xff]   ;;  %v8803_v26 = vld [vmem:[%s11562_s1 + $0x10] ss:$8 sps:$4 sm:$0xff]  }
  0x37   : > { %v8807_v27 = vld [vmem:[%s11562_s1 + $0x4] ss:$8 sps:$4 sm:$0xff]   ;;  %v8806_v28 = vld [vmem:[%s11562_s1 + $0x110] ss:$8 sps:$4 sm:$0xff]   ;;  %v8809_v30 = vld [vmem:[%s11562_s1] ss:$8 sps:$4 sm:$0xff]  }
  0x38   : > { %1563 = vmatpush1.bf16.msra.mxu0 %v8779_v9  ;;  %v8810_v29 = vld [vmem:[%s11562_s1 + $0x104] ss:$8 sps:$4 sm:$0xff]   ;;  %v8813_v31 = vld [vmem:[%s11562_s1 + $0xf4] ss:$8 sps:$4 sm:$0xff]   ;;  %v8812_v32 = vld [vmem:[%s11562_s1 + $0x100] ss:$8 sps:$4 sm:$0xff]  }
  0x39   : > { %1564 = vmatprep.subr.bf16.mxu0 %v8783_v11  ;;  %1604 = vmatpush1.bf16.msra.mxu1 %v8782_v12  ;;  %v8816_v33 = vld [vmem:[%s11562_s1 + $0x1f4] ss:$8 sps:$4 sm:$0xff]   ;;  %v8815_v34 = vld [vmem:[%s11562_s1 + $0xf0] ss:$8 sps:$4 sm:$0xff]   ;;  %v8819_v35 = vld [vmem:[%s11562_s1 + $0xe4] ss:$8 sps:$4 sm:$0xff]  }
  0x3a   : > { %1605 = vmatprep.subr.bf16.mxu1 %v8786_v13  ;;  %v8818_v36 = vld [vmem:[%s11562_s1 + $0x1f0] ss:$8 sps:$4 sm:$0xff]   ;;  %v8822_v37 = vld [vmem:[%s11562_s1 + $0x1e4] ss:$8 sps:$4 sm:$0xff]   ;;  %v8821_v38 = vld [vmem:[%s11562_s1 + $0xe0] ss:$8 sps:$4 sm:$0xff]  }
  0x3b   : > { %v8825_v39 = vld [vmem:[%s11562_s1 + $0xd4] ss:$8 sps:$4 sm:$0xff]   ;;  %v8824_v40 = vld [vmem:[%s11562_s1 + $0x1e0] ss:$8 sps:$4 sm:$0xff]   ;;  %v8827_v42 = vld [vmem:[%s11562_s1 + $0xd0] ss:$8 sps:$4 sm:$0xff]  }
  0x3c   : > { %1565 = vmatpush1.bf16.msra.mxu0 %v8785_v14  ;;  %v8828_v41 = vld [vmem:[%s11562_s1 + $0x1d4] ss:$8 sps:$4 sm:$0xff]   ;;  %v8831_v43 = vld [vmem:[%s11562_s1 + $0xc4] ss:$8 sps:$4 sm:$0xff]   ;;  %v8830_v44 = vld [vmem:[%s11562_s1 + $0x1d0] ss:$8 sps:$4 sm:$0xff]  }
  0x3d   : > { %1566 = vmatprep.subr.bf16.mxu0 %v8789_v15  ;;  %1606 = vmatpush1.bf16.msra.mxu1 %v8788_v16  ;;  %v8834_v45 = vld [vmem:[%s11562_s1 + $0x1c4] ss:$8 sps:$4 sm:$0xff]   ;;  %v8833_v47 = vld [vmem:[%s11562_s1 + $0xc0] ss:$8 sps:$4 sm:$0xff]   ;;  %v8837_v49 = vld [vmem:[%s11562_s1 + $0xb4] ss:$8 sps:$4 sm:$0xff]  }
  0x3e   : > { %1607 = vmatprep.subr.bf16.mxu1 %v8792_v17  ;;  %v959_v46 = vld [vmem:[%s11563_s17 + $0x8] sm:$0xff]  ;;  %v961_v50 = vld [vmem:[%s11563_s17 + $0x18] sm:$0xff]  ;;  %v958_v4 = vld [vmem:[%s11563_s17] sm:$0xff]  ;;  %vm1709_vm0 = vcmask 1040384   ;;  %vm1712_vm1 = vcmask 1044480   ;;  %vm1720_vm2 = vcmask 523264  }
  0x3f   : > { %v965_v48 = vpack.c.bf16 %v959_v46, %v959_v46  ;;  %v8836_v51 = vld [vmem:[%s11562_s1 + $0x1c0] ss:$8 sps:$4 sm:$0xff]   ;;  %v967_v52 = vpack.c.bf16 %v961_v50, %v961_v50  ;;  %v8840_v53 = vld [vmem:[%s11562_s1 + $0x1b4] ss:$8 sps:$4 sm:$0xff]   ;;  %v8839_v54 = vld [vmem:[%s11562_s1 + $0xb0] ss:$8 sps:$4 sm:$0xff]   ;;  %v964_v7 = vpack.c.bf16 %v958_v4, %v958_v4 }
  0x40   : > { %1567 = vmatpush1.bf16.msra.mxu0 %v8791_v18  ;;  %v8843_v55 = vld [vmem:[%s11562_s1 + $0xa4] ss:$8 sps:$4 sm:$0xff]   ;;  %v8842_v56 = vld [vmem:[%s11562_s1 + $0x1b0] ss:$8 sps:$4 sm:$0xff]   ;;  %v8845_v58 = vld [vmem:[%s11562_s1 + $0xa0] ss:$8 sps:$4 sm:$0xff]  }
  0x41   : > { %1568 = vmatprep.subr.bf16.mxu0 %v8795_v19  ;;  %1608 = vmatpush1.bf16.msra.mxu1 %v8794_v20  ;;  %v8846_v57 = vld [vmem:[%s11562_s1 + $0x1a4] ss:$8 sps:$4 sm:$0xff]   ;;  %v8849_v59 = vld [vmem:[%s11562_s1 + $0x94] ss:$8 sps:$4 sm:$0xff]   ;;  %v8848_v60 = vld [vmem:[%s11562_s1 + $0x1a0] ss:$8 sps:$4 sm:$0xff]  }
  0x42   : > { %1609 = vmatprep.subr.bf16.mxu1 %v8798_v21  ;;  %1590 = vmatprep.mubr.bf16.mxu0 %v965_v48  ;;  %v8852_v61 = vld [vmem:[%s11562_s1 + $0x194] ss:$8 sps:$4 sm:$0xff]   ;;  %v8851_v62 = vld [vmem:[%s11562_s1 + $0x90] ss:$8 sps:$4 sm:$0xff]   ;;  %v8855_v63 = vld [vmem:[%s11562_s1 + $0x84] ss:$8 sps:$4 sm:$0xff]  }
  0x43   : > { %1631 = vmatprep.mubr.bf16.mxu1 %v967_v52  ;;  %v8854_v0 = vld [vmem:[%s11562_s1 + $0x190] ss:$8 sps:$4 sm:$0xff]   ;;  %v8857_v1 = vld [vmem:[%s11562_s1 + $0x80] ss:$8 sps:$4 sm:$0xff]   ;;  %v8858_v2 = vld [vmem:[%s11562_s1 + $0x184] ss:$8 sps:$4 sm:$0xff]   ;;  %v1068_v52 = vlaneseq }
  0x44   : > { %1569 = vmatpush1.bf16.msra.mxu0 %v8797_v22  ;;  %v8860_v3 = vld [vmem:[%s11562_s1 + $0x180] ss:$8 sps:$4 sm:$0xff]   ;;  %v8863_v5 = vld [vmem:[%s11562_s1 + $0x274] ss:$8 sps:$4 sm:$0xff]   ;;  %v8861_v8 = vld [vmem:[%s11562_s1 + $0x270] ss:$8 sps:$4 sm:$0xff]  }
  0x45   : > { %1570 = vmatprep.subr.bf16.mxu0 %v8801_v23  ;;  %1610 = vmatpush1.bf16.msra.mxu1 %v8800_v24  ;;  %v960_v6 = vld [vmem:[%s11563_s17 + $0x10] sm:$0xff]  ;;  %v8866_v10 = vld [vmem:[%s11562_s1 + $0x264] ss:$8 sps:$4 sm:$0xff]   ;;  %v8864_v13 = vld [vmem:[%s11562_s1 + $0x260] ss:$8 sps:$4 sm:$0xff]  }
  0x46   : > { %1611 = vmatprep.subr.bf16.mxu1 %v8804_v25  ;;  %v966_v9 = vpack.c.bf16 %v960_v6, %v960_v6  ;;  %v963_v11 = vld [vmem:[%s11563_s17 + $0x28] sm:$0xff]  ;;  %v8869_v14 = vld [vmem:[%s11562_s1 + $0x254] ss:$8 sps:$4 sm:$0xff]   ;;  %v8867_v15 = vld [vmem:[%s11562_s1 + $0x250] ss:$8 sps:$4 sm:$0xff]  }
  0x47   : > { %v969_v12 = vpack.c.bf16 %v963_v11, %v963_v11  ;;  %v8872_v16 = vld [vmem:[%s11562_s1 + $0x244] ss:$8 sps:$4 sm:$0xff]   ;;  %v8870_v17 = vld [vmem:[%s11562_s1 + $0x240] ss:$8 sps:$4 sm:$0xff]   ;;  %v8875_v18 = vld [vmem:[%s11562_s1 + $0x234] ss:$8 sps:$4 sm:$0xff]  }
  0x48   : > { %1571 = vmatpush1.bf16.msra.mxu0 %v8803_v26  ;;  %v8873_v19 = vld [vmem:[%s11562_s1 + $0x230] ss:$8 sps:$4 sm:$0xff]   ;;  %v8878_v20 = vld [vmem:[%s11562_s1 + $0x224] ss:$8 sps:$4 sm:$0xff]   ;;  %v8876_v21 = vld [vmem:[%s11562_s1 + $0x220] ss:$8 sps:$4 sm:$0xff]  }
  0x49   : > { %1572 = vmatprep.subr.bf16.mxu0 %v8807_v27  ;;  %1612 = vmatpush1.bf16.msra.mxu1 %v8806_v28  ;;  %v8881_v22 = vld [vmem:[%s11562_s1 + $0x214] ss:$8 sps:$4 sm:$0xff]   ;;  %v8879_v23 = vld [vmem:[%s11562_s1 + $0x210] ss:$8 sps:$4 sm:$0xff]   ;;  %v8884_v24 = vld [vmem:[%s11562_s1 + $0x204] ss:$8 sps:$4 sm:$0xff]  }
  0x4a   : > { %1613 = vmatprep.subr.bf16.mxu1 %v8810_v29  ;;  %v8882_v25 = vld [vmem:[%s11562_s1 + $0x200] ss:$8 sps:$4 sm:$0xff]   ;;  %v8887_v26 = vld [vmem:[%s11562_s1 + $0x2f4] ss:$8 sps:$4 sm:$0xff]   ;;  %v8885_v27 = vld [vmem:[%s11562_s1 + $0x2f0] ss:$8 sps:$4 sm:$0xff]  }
  0x4b   : > { %v8890_v28 = vld [vmem:[%s11562_s1 + $0x2e4] ss:$8 sps:$4 sm:$0xff]   ;;  %v8888_v29 = vld [vmem:[%s11562_s1 + $0x2e0] ss:$8 sps:$4 sm:$0xff]  }
  0x4c   : > { %1573 = vmatpush1.bf16.msra.mxu0 %v8809_v30  ;;  %v8893_v30 = vld [vmem:[%s11562_s1 + $0x2d4] ss:$8 sps:$4 sm:$0xff]  }
  0x4d   : > { %1574 = vmatprep.subr.bf16.mxu0 %v8813_v31  ;;  %1614 = vmatpush1.bf16.msra.mxu1 %v8812_v32  ;;  %v8891_v31 = vld [vmem:[%s11562_s1 + $0x2d0] ss:$8 sps:$4 sm:$0xff]   ;;  %v8896_v32 = vld [vmem:[%s11562_s1 + $0x2c4] ss:$8 sps:$4 sm:$0xff]  }
  0x4e   : > { %1615 = vmatprep.subr.bf16.mxu1 %v8816_v33  ;;  %v8894_v33 = vld [vmem:[%s11562_s1 + $0x2c0] ss:$8 sps:$4 sm:$0xff]  }
  0x50   : > { %1575 = vmatpush2.bf16.msra.mxu0 %v8815_v34  ;;  %v8899_v34 = vld [vmem:[%s11562_s1 + $0x2b4] ss:$8 sps:$4 sm:$0xff]  }
  0x51   : > { %1576 = vmatprep.subr.bf16.mxu0 %v8819_v35  ;;  %1616 = vmatpush2.bf16.msra.mxu1 %v8818_v36  ;;  %v8897_v35 = vld [vmem:[%s11562_s1 + $0x2b0] ss:$8 sps:$4 sm:$0xff]   ;;  %v8902_v36 = vld [vmem:[%s11562_s1 + $0x2a4] ss:$8 sps:$4 sm:$0xff]  }
  0x52   : > { %1617 = vmatprep.subr.bf16.mxu1 %v8822_v37  ;;  %v8900_v37 = vld [vmem:[%s11562_s1 + $0x2a0] ss:$8 sps:$4 sm:$0xff]  }
  0x54   : > { %1577 = vmatpush2.bf16.msra.mxu0 %v8821_v38  ;;  %v8905_v38 = vld [vmem:[%s11562_s1 + $0x294] ss:$8 sps:$4 sm:$0xff]  }
  0x55   : > { %1578 = vmatprep.subr.bf16.mxu0 %v8825_v39  ;;  %1618 = vmatpush2.bf16.msra.mxu1 %v8824_v40  ;;  %v8903_v39 = vld [vmem:[%s11562_s1 + $0x290] ss:$8 sps:$4 sm:$0xff]   ;;  %v8908_v40 = vld [vmem:[%s11562_s1 + $0x284] ss:$8 sps:$4 sm:$0xff]  }
  0x56   : > { %1619 = vmatprep.subr.bf16.mxu1 %v8828_v41  ;;  %v8906_v41 = vld [vmem:[%s11562_s1 + $0x280] ss:$8 sps:$4 sm:$0xff]  }
  0x58   : > { %1579 = vmatpush2.bf16.msra.mxu0 %v8827_v42  ;;  %v962_v42 = vld [vmem:[%s11563_s17 + $0x20] sm:$0xff] }
  0x59   : > { %1580 = vmatprep.subr.bf16.mxu0 %v8831_v43  ;;  %1620 = vmatpush2.bf16.msra.mxu1 %v8830_v44  ;;  %v968_v43 = vpack.c.bf16 %v962_v42, %v962_v42 }
  0x5a   : > { %1621 = vmatprep.subr.bf16.mxu1 %v8834_v45 }
  0x5c   : > { %1581 = vmatpush2.bf16.msra.mxu0 %v8833_v47 }
  0x5d   : > { %1582 = vmatprep.subr.bf16.mxu0 %v8837_v49  ;;  %1622 = vmatpush2.bf16.msra.mxu1 %v8836_v51 }
  0x5e   : > { %1623 = vmatprep.subr.bf16.mxu1 %v8840_v53  ;;  %v1069_v53 = vshrl.u32 %v1068_v52, 7 }
  0x60   : > { %1583 = vmatpush2.bf16.msra.mxu0 %v8839_v54  ;;  %v1070_v54 = vsub.s32 0, %v1069_v53 }
  0x61   : > { %1584 = vmatprep.subr.bf16.mxu0 %v8843_v55  ;;  %1624 = vmatpush2.bf16.msra.mxu1 %v8842_v56  ;;  %v1066_v55 = vld [vmem:[%s11564_s25] sm:$0x3]  ;;  %v1074_v56 = vsub.s32 1, %v1069_v53 }
  0x62   : > { %1625 = vmatprep.subr.bf16.mxu1 %v8846_v57  ;;  %v1071_v57 = vrot.slane %v1066_v55, %v1070_v54 }
  0x64   : > { %1585 = vmatpush2.bf16.msra.mxu0 %v8845_v58  ;;  %v1075_v58 = vrot.slane %v1066_v55, %v1074_v56 }
  0x65   : > { %1586 = vmatprep.subr.bf16.mxu0 %v8849_v59  ;;  %1626 = vmatpush2.bf16.msra.mxu1 %v8848_v60  ;;  %v1681_v60 = vld [vmem:[%s11565_s24] sm:$0xff] }
  0x66   : > { %1627 = vmatprep.subr.bf16.mxu1 %v8852_v61 }
  0x68   : > { %1587 = vmatpush2.bf16.msra.mxu0 %v8851_v62  ;;  %v1682_v62 = vld [vmem:[%s11565_s24 + $0x8] sm:$0xff] }
  0x69   : > { %1588 = vmatprep.subr.bf16.mxu0 %v8855_v63  ;;  %1628 = vmatpush2.bf16.msra.mxu1 %v8854_v0  ;;  %v1685_v0 = vrot.slane %v1681_v60, 1  ;;  %v1692_v6 = vrot.slane %v1682_v62, 5 }
  0x6a   : > { %1629 = vmatprep.subr.bf16.mxu1 %v8858_v2 }
  0x6c   : > { %1589 = vmatpush2.bf16.msra.mxu0 %v8857_v1  ;;  %v1691_v1 = vrot.slane %v1681_v60, 5 }
  0x6d   : > { %1640 = vmatprep.subr.bf16.mxu0 %v8863_v5  ;;  %1630 = vmatpush2.bf16.msra.mxu1 %v8860_v3  ;;  %v1686_v5 = vrot.slane %v1682_v62, 1 }
  0x6f   : > { %1591 = vmatmul.mubr.bf16.vlgmr.msra.gmra.mxu0 %v964_v7 }
  0x70   : > { %1641 = vmatpush1.bf16.msra.mxu0 %v8861_v8  ;;  %1632 = vmatmul.mubr.bf16.vlgmr.msra.gmra.mxu1 %v966_v9 }
  0x71   : > { %1642 = vmatprep.subr.bf16.mxu0 %v8866_v10  ;;  %1672 = vmatprep.mubr.bf16.mxu0 %v969_v12 }
  0x74   : > { %1643 = vmatpush1.bf16.msra.mxu0 %v8864_v13 }
  0x75   : > { %1644 = vmatprep.subr.bf16.mxu0 %v8869_v14 }
  0x78   : > { %1645 = vmatpush1.bf16.msra.mxu0 %v8867_v15 }
  0x79   : > { %1646 = vmatprep.subr.bf16.mxu0 %v8872_v16 }
  0x7c   : > { %1647 = vmatpush1.bf16.msra.mxu0 %v8870_v17 }
  0x7d   : > { %1648 = vmatprep.subr.bf16.mxu0 %v8875_v18 }
  0x80   : > { %1649 = vmatpush1.bf16.msra.mxu0 %v8873_v19 }
  0x81   : > { %1650 = vmatprep.subr.bf16.mxu0 %v8878_v20 }
  0x84   : > { %1651 = vmatpush1.bf16.msra.mxu0 %v8876_v21 }
  0x85   : > { %1652 = vmatprep.subr.bf16.mxu0 %v8881_v22 }
  0x88   : > { %1653 = vmatpush1.bf16.msra.mxu0 %v8879_v23 }
  0x89   : > { %1654 = vmatprep.subr.bf16.mxu0 %v8884_v24 }
  0x8c   : > { %1655 = vmatpush1.bf16.msra.mxu0 %v8882_v25 }
  0x8d   : > { %1656 = vmatprep.subr.bf16.mxu0 %v8887_v26 }
  0x90   : > { %1657 = vmatpush2.bf16.msra.mxu0 %v8885_v27 }
  0x91   : > { %1658 = vmatprep.subr.bf16.mxu0 %v8890_v28 }
  0x94   : > { %1659 = vmatpush2.bf16.msra.mxu0 %v8888_v29 }
  0x95   : > { %1660 = vmatprep.subr.bf16.mxu0 %v8893_v30 }
  0x98   : > { %1661 = vmatpush2.bf16.msra.mxu0 %v8891_v31 }
  0x99   : > { %1662 = vmatprep.subr.bf16.mxu0 %v8896_v32 }
  0x9c   : > { %1663 = vmatpush2.bf16.msra.mxu0 %v8894_v33 }
  0x9d   : > { %1664 = vmatprep.subr.bf16.mxu0 %v8899_v34 }
  0xa0   : > { %1665 = vmatpush2.bf16.msra.mxu0 %v8897_v35 }
  0xa1   : > { %1666 = vmatprep.subr.bf16.mxu0 %v8902_v36 }
  0xa4   : > { %1667 = vmatpush2.bf16.msra.mxu0 %v8900_v37 }
  0xa5   : > { %1668 = vmatprep.subr.bf16.mxu0 %v8905_v38 }
  0xa8   : > { %1669 = vmatpush2.bf16.msra.mxu0 %v8903_v39 }
  0xa9   : > { %1670 = vmatprep.subr.bf16.mxu0 %v8908_v40 }
  0xac   : > { %1671 = vmatpush2.bf16.msra.mxu0 %v8906_v41 }
  0xaf   : > { %1673 = vmatmul.mubr.bf16.vlgmr.msra.gmra.mxu0 %v968_v43 }
 0x12f   : > { %v1592_v44 = vpop.f32.mrf.mxu0 }
 0x130   : > { %v1633_v46 = vpop.f32.mrf.mxu1  ;;  %v1593_v59 = vadd.f32 %v1592_v44, %v1071_v57 }
 0x131   : > { %v1594_v45 = vpop.f32.mrf.mxu0 }
 0x132   : > { %v1635_v48 = vpop.f32.mrf.mxu1  ;;  %v1595_v61 = vadd.f32 %v1594_v45, %v1075_v58  ;;  %v1634_v63 = vadd.f32 %v1633_v46, %v1593_v59 }
 0x133   : > { %v1596_v47 = vpop.f32.mrf.mxu0 }
 0x134   : > { %v1637_v50 = vpop.f32.mrf.mxu1  ;;  %v1636_v3 = vadd.f32 %v1635_v48, %v1595_v61 }
 0x135   : > { %v1597_v49 = vpop.f32.mrf.mxu0 }
 0x136   : > { %v1638_v51 = vpop.f32.mrf.mxu1 }
 0x16f   : > { %v1674_v2 = vpop.f32.mrf.mxu0 }
 0x170   : > { %v1675_v4 = vadd.f32 %v1674_v2, %v1634_v63 }
 0x171   : > { %v1676_v7 = vpop.f32.mrf.mxu0 }
 0x172   : > { %v1689_v8 = vadd.f32 %v1685_v0, %v1675_v4  ;;  %v1695_v9 = vadd.f32 %v1691_v1, %v1675_v4  ;;  %v1677_v10 = vadd.f32 %v1676_v7, %v1636_v3 }
 0x173   : > { %v1678_v11 = vpop.f32.mrf.mxu0 }
 0x174   : > { %v1699_v12 = vrot.slane %v1689_v8, 7  ;;  %v1705_v13 = vrot.slane %v1695_v9, 3  ;;  %v1690_v14 = vadd.f32 %v1686_v5, %v1677_v10  ;;  %v1696_v15 = vadd.f32 %v1692_v6, %v1677_v10 }
 0x175   : > { %v1679_v16 = vpop.f32.mrf.mxu0 }
 0x176   : > { %v1710_v17 = vsel %vm1709_vm0, %v1681_v60, %v1699_v12  ;;  %v1715_v18 = vsel %vm1709_vm0, %v1681_v60, %v1705_v13  ;;  %v1700_v19 = vrot.slane %v1690_v14, 7  ;;  %v1706_v20 = vrot.slane %v1696_v15, 3 }
 0x177   : > { %v1713_v21 = vsel %vm1712_vm1, %v1710_v17, 0.0  ;;  %v1717_v22 = vsel %vm1712_vm1, %v1715_v18, 0.0 }
 0x178   : > { %1719 = vst [vmem:[#allocation2] sm:$0xff] %v1713_v21  ;;  %1722 = vst [vmem:[#allocation2 + $0x10] sm:$0xff] %v1717_v22  ;;  %v1711_v23 = vsel %vm1709_vm0, %v1682_v62, %v1700_v19  ;;  %v1716_v24 = vsel %vm1709_vm0, %v1682_v62, %v1706_v20 }
 0x179   : > { %v1714_v25 = vsel %vm1712_vm1, %v1711_v23, 0.0  ;;  %v1718_v26 = vsel %vm1712_vm1, %v1716_v24, 0.0 }
 0x17a   : > { %1721 = vst.msk [vmem:[#allocation2 + $0x8] sm:$0xff] %vm1720_vm2, %v1714_v25  ;;  %1723 = vst.msk [vmem:[#allocation2 + $0x18] sm:$0xff] %vm1720_vm2, %v1718_v26 }
 0x17b PF: > { %vm1732_vm3 = vcmask 523264   ;;  %v8919_v35 = vld [vmem:[%s9989_s23 + $0x11c] ss:$20 sps:$4 sm:$0xff]   ;;  %v8921_v36 = vld [vmem:[%s9989_s23 + $0x118] ss:$20 sps:$4 sm:$0xff]   ;;  %v9837_v37 = vmov 0  }
 0x17c   : > { %2302 = vmatprep.subr.bf16.mxu0 %v9837_v37  ;;  %v8922_v38 = vld [vmem:[%s9989_s23 + $0x128] ss:$20 sps:$4 sm:$0xff]   ;;  %2216 = vmatprep.subr.bf16.mxu1 %v8919_v35  ;;  %v8925_v40 = vld [vmem:[%s9989_s23 + $0xf0] ss:$20 sps:$4 sm:$0xff]   ;;  %v8926_v41 = vld [vmem:[%s9989_s23 + $0x100] ss:$20 sps:$4 sm:$0xff]  }
 0x17d   : > { %v8923_v39 = vld [vmem:[%s9989_s23 + $0xf4] ss:$20 sps:$4 sm:$0xff]   ;;  %2217 = vmatpush1.bf16.msra.mxu1 %v8921_v36  ;;  %2303 = vmatpush1.bf16.msra.mxu0 %v8922_v38  ;;  %v8927_v42 = vld [vmem:[%s9989_s23 + $0xcc] ss:$20 sps:$4 sm:$0xff]   ;;  %v8931_v45 = vld [vmem:[%s9989_s23 + $0xa4] ss:$20 sps:$4 sm:$0xff]  }
 0x17e   : > { %2218 = vmatprep.subr.bf16.mxu1 %v8923_v39  ;;  %2304 = vmatprep.subr.bf16.mxu0 %v9837_v37  ;;  %v8929_v43 = vld [vmem:[%s9989_s23 + $0xc8] ss:$20 sps:$4 sm:$0xff]   ;;  %v8930_v44 = vld [vmem:[%s9989_s23 + $0xd8] ss:$20 sps:$4 sm:$0xff]   ;;  %v8933_v46 = vld [vmem:[%s9989_s23 + $0xa0] ss:$20 sps:$4 sm:$0xff]  }
 0x17f   : > { %v1726_v27 = vld [vmem:[#allocation2] sm:$0xff]  ;;  %v1728_v29 = vld [vmem:[#allocation2 + $0x10] sm:$0xff]  ;;  %v8937_v49 = vld [vmem:[%s9989_s23 + $0x78] ss:$20 sps:$4 sm:$0xff]   ;;  %vm9839_vm4 = vmmov 0   ;;  %s9840_s20 = smov 64  }
 0x180   : > { %v8934_v47 = vld [vmem:[%s9989_s23 + $0xb0] ss:$20 sps:$4 sm:$0xff]   ;;  %v8938_v2 = vld [vmem:[%s9989_s23 + $0x88] ss:$20 sps:$4 sm:$0xff]   ;;  %v8942_v5 = vld [vmem:[%s9989_s23 + $0x60] ss:$20 sps:$4 sm:$0xff]  }
 0x181   : > { %v1727_v28 = vld [vmem:[#allocation2 + $0x8] sm:$0xff]  ;;  %v1729_v31 = vld [vmem:[#allocation2 + $0x18] sm:$0xff]  ;;  %2219 = vmatpush1.bf16.msra.mxu1 %v8925_v40  ;;  %2305 = vmatpush1.bf16.msra.mxu0 %v8926_v41  ;;  %v8941_v4 = vld [vmem:[%s9989_s23 + $0x50] ss:$20 sps:$4 sm:$0xff]   ;;  %s11566_s0 = sld [smem:[#allocation11_spill]]  ;;  %vm2425_vm5 = vcmask 130048  }
 0x182   : > { %v1733_v30 = vsel %vm1732_vm3, %v1727_v28, 0.0  ;;  %v1737_v33 = vsel %vm1732_vm3, %v1729_v31, 0.0  ;;  %2220 = vmatprep.subr.bf16.mxu1 %v8927_v42  ;;  %2306 = vmatprep.subr.bf16.mxu0 %v9837_v37  ;;  %v8935_v48 = vld [vmem:[%s9989_s23 + $0x7c] ss:$20 sps:$4 sm:$0xff]   ;;  %v8939_v3 = vld [vmem:[%s9989_s23 + $0x54] ss:$20 sps:$4 sm:$0xff]  }
 0x183   : > { %v1734_v32 = vadd.f32 %v1733_v30, %v1726_v27  ;;  %v1738_v34 = vadd.f32 %v1737_v33, %v1728_v29  ;;  %v8943_v6 = vld [vmem:[%s9989_s23 + $0x2c] ss:$20 sps:$4 sm:$0xff]   ;;  %v8945_v7 = vld [vmem:[%s9989_s23 + $0x28] ss:$20 sps:$4 sm:$0xff]   ;;  %v8947_v9 = vld [vmem:[%s9989_s23 + $0x4] ss:$20 sps:$4 sm:$0xff]  }
 0x184   : > { %v8946_v8 = vld [vmem:[%s9989_s23 + $0x38] ss:$20 sps:$4 sm:$0xff]   ;;  %v8949_v10 = vld [vmem:[%s9989_s23] ss:$20 sps:$4 sm:$0xff]   ;;  %v8950_v11 = vld [vmem:[%s9989_s23 + $0x10] ss:$20 sps:$4 sm:$0xff]  }
 0x185   : > { %1735 = vadd.xlane.f32.xlu0 %v1734_v32  ;;  %2221 = vmatpush1.bf16.msra.mxu1 %v8929_v43  ;;  %v8951_v12 = vld [vmem:[%s9989_s23 + $0x1bc] ss:$20 sps:$4 sm:$0xff]   ;;  %v8953_v13 = vld [vmem:[%s9989_s23 + $0x1b8] ss:$20 sps:$4 sm:$0xff]   ;;  %v8955_v15 = vld [vmem:[%s9989_s23 + $0x194] ss:$20 sps:$4 sm:$0xff]  }
 0x186   : > { %2307 = vmatpush1.bf16.msra.mxu0 %v8930_v44  ;;  %2222 = vmatprep.subr.bf16.mxu1 %v8931_v45  ;;  %v8954_v14 = vld [vmem:[%s9989_s23 + $0x1c8] ss:$20 sps:$4 sm:$0xff]   ;;  %v8957_v16 = vld [vmem:[%s9989_s23 + $0x190] ss:$20 sps:$4 sm:$0xff]   ;;  %v8958_v17 = vld [vmem:[%s9989_s23 + $0x1a0] ss:$20 sps:$4 sm:$0xff]  }
 0x187   : > { %2308 = vmatprep.subr.bf16.mxu0 %v9837_v37  ;;  %v8959_v18 = vld [vmem:[%s9989_s23 + $0x16c] ss:$20 sps:$4 sm:$0xff]   ;;  %v8961_v19 = vld [vmem:[%s9989_s23 + $0x168] ss:$20 sps:$4 sm:$0xff]   ;;  %v8963_v21 = vld [vmem:[%s9989_s23 + $0x144] ss:$20 sps:$4 sm:$0xff]  }
 0x188   : > { %v8962_v20 = vld [vmem:[%s9989_s23 + $0x178] ss:$20 sps:$4 sm:$0xff]   ;;  %v8965_v22 = vld [vmem:[%s9989_s23 + $0x140] ss:$20 sps:$4 sm:$0xff]   ;;  %v8966_v23 = vld [vmem:[%s9989_s23 + $0x150] ss:$20 sps:$4 sm:$0xff]  }
 0x189   : > { %1739 = vadd.xlane.f32.xlu0 %v1738_v34  ;;  %2223 = vmatpush1.bf16.msra.mxu1 %v8933_v46  ;;  %v8969_v24 = vld [vmem:[%s9989_s23 + $0x124] ss:$20 sps:$4 sm:$0xff]   ;;  %v1730_v35 = vld [vmem:[%s9979_s6] sm:$0x3]  ;;  %p8582_p5 = scmp.ne.s32.totalorder %s9971_s30, 5 }
 0x18a   : > { %2309 = vmatpush1.bf16.msra.mxu0 %v8934_v47  ;;  %2224 = vmatprep.subr.bf16.mxu1 %v8935_v48  ;;  %v1731_v38 = vld [vmem:[%s9984_s29] sm:$0x3]  ;;  %s11568_s3 = sld [smem:[#allocation23_spill]] (!%p8582_p5) }
 0x18b   : > { %2310 = vmatprep.subr.bf16.mxu0 %v9837_v37  ;;  %s11570_s19 = sld [smem:[#allocation21_spill]] (!%p8582_p5) }
 0x18c   : > { %s11571_s7 = sld [smem:[#allocation22_spill]] (!%p8582_p5) }
 0x18d   : > { %2225 = vmatpush1.bf16.msra.mxu1 %v8937_v49  ;;  %s11572_s10 = sld [smem:[#allocation24_spill]] (!%p8582_p5) }
 0x18e   : > { %2311 = vmatpush1.bf16.msra.mxu0 %v8938_v2  ;;  %2226 = vmatprep.subr.bf16.mxu1 %v8939_v3  ;;  %v8979_v2 = vld [vmem:[%s9989_s23 + $0x80] ss:$20 sps:$4 sm:$0xff]   ;;  %v8984_v3 = vld [vmem:[%s9989_s23 + $0x5c] ss:$20 sps:$4 sm:$0xff]  }
 0x18f   : > { %2312 = vmatprep.subr.bf16.mxu0 %v9837_v37 }
 0x191   : > { %2227 = vmatpush1.bf16.msra.mxu1 %v8941_v4  ;;  %v8982_v4 = vld [vmem:[%s9989_s23 + $0x58] ss:$20 sps:$4 sm:$0xff]  }
 0x192   : > { %2313 = vmatpush1.bf16.msra.mxu0 %v8942_v5  ;;  %2228 = vmatprep.subr.bf16.mxu1 %v8943_v6  ;;  %v8987_v5 = vld [vmem:[%s9989_s23 + $0x34] ss:$20 sps:$4 sm:$0xff]   ;;  %v8985_v6 = vld [vmem:[%s9989_s23 + $0x30] ss:$20 sps:$4 sm:$0xff]  }
 0x193   : > { %2314 = vmatprep.subr.bf16.mxu0 %v9837_v37 }
 0x195   : > { %2229 = vmatpush1.bf16.msra.mxu1 %v8945_v7  ;;  %v8990_v7 = vld [vmem:[%s9989_s23 + $0xc] ss:$20 sps:$4 sm:$0xff]  }
 0x196   : > { %2315 = vmatpush1.bf16.msra.mxu0 %v8946_v8  ;;  %2230 = vmatprep.subr.bf16.mxu1 %v8947_v9  ;;  %v8988_v8 = vld [vmem:[%s9989_s23 + $0x8] ss:$20 sps:$4 sm:$0xff]   ;;  %v8993_v9 = vld [vmem:[%s9989_s23 + $0x1c4] ss:$20 sps:$4 sm:$0xff]  }
 0x197   : > { %2316 = vmatprep.subr.bf16.mxu0 %v9837_v37 }
 0x199   : > { %2231 = vmatpush1.bf16.msra.mxu1 %v8949_v10  ;;  %v8991_v10 = vld [vmem:[%s9989_s23 + $0x1c0] ss:$20 sps:$4 sm:$0xff]  }
 0x19a   : > { %2317 = vmatpush1.bf16.msra.mxu0 %v8950_v11  ;;  %2240 = vmatprep.subr.bf16.mxu1 %v8951_v12  ;;  %v8996_v11 = vld [vmem:[%s9989_s23 + $0x19c] ss:$20 sps:$4 sm:$0xff]   ;;  %v8994_v12 = vld [vmem:[%s9989_s23 + $0x198] ss:$20 sps:$4 sm:$0xff]  }
 0x19b   : > { %2326 = vmatprep.subr.bf16.mxu0 %v9837_v37 }
 0x19d   : > { %2241 = vmatpush2.bf16.msra.mxu1 %v8953_v13  ;;  %v8999_v13 = vld [vmem:[%s9989_s23 + $0x174] ss:$20 sps:$4 sm:$0xff]  }
 0x19e   : > { %2327 = vmatpush2.bf16.msra.mxu0 %v8954_v14  ;;  %2242 = vmatprep.subr.bf16.mxu1 %v8955_v15  ;;  %v8997_v14 = vld [vmem:[%s9989_s23 + $0x170] ss:$20 sps:$4 sm:$0xff]   ;;  %v9002_v15 = vld [vmem:[%s9989_s23 + $0x14c] ss:$20 sps:$4 sm:$0xff]  }
 0x19f   : > { %2328 = vmatprep.subr.bf16.mxu0 %v9837_v37 }
 0x1a1   : > { %2243 = vmatpush2.bf16.msra.mxu1 %v8957_v16  ;;  %v9000_v16 = vld [vmem:[%s9989_s23 + $0x148] ss:$20 sps:$4 sm:$0xff]  }
 0x1a2   : > { %2329 = vmatpush2.bf16.msra.mxu0 %v8958_v17  ;;  %2244 = vmatprep.subr.bf16.mxu1 %v8959_v18  ;;  %v9838_v17 = vmov 0.0  }
 0x1a3   : > { %2330 = vmatprep.subr.bf16.mxu0 %v9837_v37 }
 0x1a5   : > { %2245 = vmatpush2.bf16.msra.mxu1 %v8961_v19  ;;  %v1874_v19 = vld [vmem:[%s9999_s2] sm:$0x1f] }
 0x1a6   : > { %2331 = vmatpush2.bf16.msra.mxu0 %v8962_v20  ;;  %2246 = vmatprep.subr.bf16.mxu1 %v8963_v21 }
 0x1a7   : > { %2332 = vmatprep.subr.bf16.mxu0 %v9837_v37 }
 0x1a9   : > { %2247 = vmatpush2.bf16.msra.mxu1 %v8965_v22 }
 0x1aa   : > { %2333 = vmatpush2.bf16.msra.mxu0 %v8966_v23  ;;  %2259 = vmatprep.subr.bf16.mxu1 %v8969_v24 }
 0x1ab   : > { %8645 = vmatprep.subr.bf16.mxu0 %v9838_v17 }
 0x20e   : > { %v1736_v50 = vpop.xlane.xlu0 %1735 }
 0x20f   : > { %v1742_v51 = vmul.f32 0.0052083335, %v1736_v50 }
 0x211   : > { %v10381_v52 = vsub.f32 %v1726_v27, %v1742_v51  ;;  %v10383_v53 = vsub.f32 %v1727_v28, %v1742_v51 }
 0x212   : > { %v1740_v54 = vpop.xlane.xlu0 %1739 }
 0x213   : > { %v1743_v55 = vmul.f32 0.0052083335, %v1740_v54  ;;  %v1748_v56 = vmul.f32 %v10381_v52, %v10381_v52  ;;  %v1749_v57 = vmul.f32 %v10383_v53, %v10383_v53 }
 0x215   : > { %v10389_v58 = vsub.f32 %v1728_v29, %v1743_v55  ;;  %v10391_v59 = vsub.f32 %v1729_v31, %v1743_v55  ;;  %v1752_v60 = vsel %vm1732_vm3, %v1749_v57, 0.0  ;;  %v1771_v31 = vlaneseq  ;;  %v8967_v57 = vld [vmem:[%s9989_s23 + $0x120] ss:$20 sps:$4 sm:$0xff]  }
 0x216   : > { %v1753_v61 = vadd.f32 %v1752_v60, %v1748_v56 }
 0x217   : > { %v1750_v62 = vmul.f32 %v10389_v58, %v10389_v58  ;;  %v1751_v63 = vmul.f32 %v10391_v59, %v10391_v59  ;;  %v10429_v32 = vshrl.u32 %v1771_v31, 7 }
 0x218   : > { %1754 = vadd.xlane.f32.xlu1 %v1753_v61  ;;  %v8972_v61 = vld [vmem:[%s9989_s23 + $0xfc] ss:$20 sps:$4 sm:$0xff]  }
 0x219   : > { %v1756_v0 = vsel %vm1732_vm3, %v1751_v63, 0.0  ;;  %v10432_v33 = vsub.s32 1, %v10429_v32  ;;  %v10435_v34 = vsub.s32 0, %v10429_v32  ;;  %v8978_v63 = vld [vmem:[%s9989_s23 + $0xac] ss:$20 sps:$4 sm:$0xff]   ;;  %v10480_v18 = vsub.s32 4, %v10429_v32 }
 0x21a   : > { %v1757_v1 = vadd.f32 %v1756_v0, %v1750_v62  ;;  %v8973_v62 = vld [vmem:[%s9989_s23 + $0xd0] ss:$20 sps:$4 sm:$0xff]   ;;  %v8976_v0 = vld [vmem:[%s9989_s23 + $0xa8] ss:$20 sps:$4 sm:$0xff]  }
 0x21b   : > { %v1778_v40 = vrot.slane %v1730_v35, %v10432_v33  ;;  %v1774_v42 = vrot.slane %v1730_v35, %v10435_v34  ;;  %v1793_v44 = vrot.slane %v1731_v38, %v10432_v33  ;;  %v1789_v45 = vrot.slane %v1731_v38, %v10435_v34 }
 0x21c   : > { %1758 = vadd.xlane.f32.xlu1 %v1757_v1  ;;  %v8981_v1 = vld [vmem:[%s9989_s23 + $0x84] ss:$20 sps:$4 sm:$0xff]   ;;  %v1879_v22 = vrot.slane %v1874_v19, %v10435_v34  ;;  %v1895_v23 = vrot.slane %v1874_v19, %v10480_v18 }
 0x2a1   : > { %v1755_v25 = vpop.xlane.xlu1 %1754 }
 0x2a2   : > { %v1760_v26 = vmul.f32 0.0052083335, %v1755_v25 }
 0x2a4   : > { %v1762_v27 = vadd.f32 1e-12, %v1760_v26  ;;  %v1883_v26 = vrot.slane %v1874_v19, %v10432_v33 }
 0x2a5   : > { %v1759_v28 = vpop.xlane.xlu1 %1758 }
 0x2a6   : > { %9663 = vrsqrt.f32 %v1762_v27  ;;  %v1761_v29 = vmul.f32 0.0052083335, %v1759_v28 }
 0x2a8   : > { %v1763_v30 = vadd.f32 1e-12, %v1761_v29 }
 0x2aa   : > { %9665 = vrsqrt.f32 %v1763_v30 }
 0x2b3   : > { %v9664_v36 = vpop.eup %9663 }
 0x2b4   : > { %v1767_v39 = vmul.f32 %v9664_v36, %v10383_v53  ;;  %v1766_v41 = vmul.f32 %v9664_v36, %v10381_v52 }
 0x2b6   : > { %v1782_v47 = vmul.f32 %v1778_v40, %v1767_v39  ;;  %v1781_v49 = vmul.f32 %v1774_v42, %v1766_v41 }
 0x2b7   : > { %v9666_v43 = vpop.eup %9665 }
 0x2b8   : > { %v1769_v46 = vmul.f32 %v9666_v43, %v10391_v59  ;;  %v1768_v48 = vmul.f32 %v9666_v43, %v10389_v58  ;;  %v1797_v53 = vadd.f32 %v1793_v44, %v1782_v47  ;;  %v1796_v54 = vadd.f32 %v1789_v45, %v1781_v49  ;;  %v8970_v58 = vld [vmem:[%s9989_s23 + $0xf8] ss:$20 sps:$4 sm:$0xff]   ;;  %v8975_v59 = vld [vmem:[%s9989_s23 + $0xd4] ss:$20 sps:$4 sm:$0xff]  }
 0x2ba   : > { %v1784_v50 = vmul.f32 %v1778_v40, %v1769_v46  ;;  %v1783_v51 = vmul.f32 %v1774_v42, %v1768_v48 }
 0x2bc   : > { %v1799_v52 = vadd.f32 %v1793_v44, %v1784_v50  ;;  %v1798_v55 = vadd.f32 %v1789_v45, %v1783_v51  ;;  %v10498_v44 = vsub.s32 2, %v10429_v32 }
 0x2be   : > { %v1801_v56 = vpack.c.bf16 %v1799_v52, %v1797_v53  ;;  %v1800_v60 = vpack.c.bf16 %v1798_v55, %v1796_v54  ;;  %v1887_v46 = vrot.slane %v1874_v19, %v10498_v44  ;;  %v10506_v54 = vsub.s32 3, %v10429_v32 }
 0x2c0   : > { %7840 = vmatprep.mubr.msk.bf16.mxu1 %vm1732_vm3, %v1801_v56  ;;  %7842 = vmatprep.mubr.msk.bf16.mxu0 %vm1732_vm3, %v1801_v56 }
 0x2c1   : > { %2249 = vmatmul.mubr.bf16.vlgmr.msra.gmra.mxu1 %v1800_v60  ;;  %2335 = vmatmul.mubr.bf16.vlgmr.msra.gmra.mxu0 %v1800_v60 }
 0x2c2   : > { %2260 = vmatpush1.bf16.msra.mxu1 %v8967_v57  ;;  %7841 = vmatprep.mubr.msk.bf16.mxu1 %vm1732_vm3, %v1801_v56 }
 0x2c3   : > { %2261 = vmatprep.subr.bf16.mxu1 %v8972_v61  ;;  %8647 = vmatprep.mubr.msk.bf16.mxu0 %vm9839_vm4, %v9838_v17 }
 0x2c6   : > { %2262 = vmatpush1.bf16.msra.mxu1 %v8970_v58 }
 0x2c7   : > { %2263 = vmatprep.subr.bf16.mxu1 %v8975_v59 }
 0x2ca   : > { %2264 = vmatpush1.bf16.msra.mxu1 %v8973_v62 }
 0x2cb   : > { %2265 = vmatprep.subr.bf16.mxu1 %v8978_v63  ;;  %v10519_v63 = vld [vmem:[%s11566_s0] sm:$0xff] }
 0x2ce   : > { %2266 = vmatpush1.bf16.msra.mxu1 %v8976_v0 }
 0x2cf   : > { %2267 = vmatprep.subr.bf16.mxu1 %v8981_v1 }
 0x2d2   : > { %2268 = vmatpush1.bf16.msra.mxu1 %v8979_v2 }
 0x2d3   : > { %2269 = vmatprep.subr.bf16.mxu1 %v8984_v3 }
 0x2d6   : > { %2270 = vmatpush1.bf16.msra.mxu1 %v8982_v4  ;;  %v10525_v4 = vld [vmem:[%s11566_s0 + $0x8] sm:$0xff] }
 0x2d7   : > { %2271 = vmatprep.subr.bf16.mxu1 %v8987_v5 }
 0x2da   : > { %2272 = vmatpush1.bf16.msra.mxu1 %v8985_v6 }
 0x2db   : > { %2273 = vmatprep.subr.bf16.mxu1 %v8990_v7 }
 0x2de   : > { %2274 = vmatpush1.bf16.msra.mxu1 %v8988_v8 }
 0x2df   : > { %2283 = vmatprep.subr.bf16.mxu1 %v8993_v9 }
 0x2e2   : > { %2284 = vmatpush2.bf16.msra.mxu1 %v8991_v10 }
 0x2e3   : > { %2285 = vmatprep.subr.bf16.mxu1 %v8996_v11 }
 0x2e6   : > { %2286 = vmatpush2.bf16.msra.mxu1 %v8994_v12 }
 0x2e7   : > { %2287 = vmatprep.subr.bf16.mxu1 %v8999_v13 }
 0x2ea   : > { %2288 = vmatpush2.bf16.msra.mxu1 %v8997_v14 }
 0x2eb   : > { %2289 = vmatprep.subr.bf16.mxu1 %v9002_v15 }
 0x2ee   : > { %2290 = vmatpush2.bf16.msra.mxu1 %v9000_v16 }
 0x2ef   : > { %8657 = vmatprep.subr.bf16.mxu1 %v9838_v17 }
 0x2f1   : > { %2292 = vmatmul.mubr.bf16.vlgmr.msra.gmra.mxu1 %v1800_v60  ;;  %v1891_v60 = vrot.slane %v1874_v19, %v10506_v54 }
 0x2f2   : > { %8659 = vmatprep.mubr.msk.bf16.mxu1 %vm9839_vm4, %v9838_v17 }
 0x381   : > { %v2250_v20 = vpop.f32.mrf.mxu1  ;;  %v2336_v21 = vpop.f32.mrf.mxu0 }
 0x382   : > { %v2251_v29 = vadd.f32 %v2250_v20, %v1879_v22  ;;  %v10486_v30 = vadd.f32 %v2336_v21, %v1895_v23 }
 0x383   : > { %v2252_v24 = vpop.f32.mrf.mxu1  ;;  %v2338_v25 = vpop.f32.mrf.mxu0 }
 0x384   : > { %v2253_v42 = vadd.f32 %v2252_v24, %v1883_v26 }
 0x385   : > { %v2254_v27 = vpop.f32.mrf.mxu1  ;;  %v2339_v28 = vpop.f32.mrf.mxu0 }
 0x386   : > { %v2255_v31 = vadd.f32 %v2254_v27, %v1879_v22  ;;  %v10488_v35 = vadd.f32 %v2339_v28, %v1895_v23 }
 0x387   : > { %v2256_v36 = vpop.f32.mrf.mxu1  ;;  %v2341_v38 = vpop.f32.mrf.mxu0 }
 0x388   : > { %v2368_v39 = vpack.c.bf16 %v2255_v31, %v2251_v29  ;;  %v2619_v40 = vpack.c.bf16 %v10488_v35, %v10486_v30  ;;  %v2257_v41 = vadd.f32 %v2256_v36, %v1883_v26 }
 0x38a   : > { %2495 = vrot.lane.b32.xlu0 %v2368_v39, %s9840_s20  ;;  %v10493_v43 = vpack.c.bf16 %v2257_v41, %v2253_v42 }
 0x38e   : > { %2372 = vrot.lane.b32.xlu0 %v10493_v43, %s9840_s20 }
 0x3b1   : > { %v2293_v45 = vpop.f32.mrf.mxu1 }
 0x3b2   : > { %v2294_v49 = vadd.f32 %v2293_v45, %v1887_v46 }
 0x3b3   : > { %v2295_v47 = vpop.f32.mrf.mxu1 }
 0x3b4   : > { %v2296_v58 = vadd.f32 %v2295_v47, %v1891_v60 }
 0x3b5   : > { %v2297_v48 = vpop.f32.mrf.mxu1 }
 0x3b6   : > { %v2298_v50 = vadd.f32 %v2297_v48, %v1887_v46 }
 0x3b7   : > { %v2299_v56 = vpop.f32.mrf.mxu1 }
 0x3b8   : > { %v2493_v51 = vpack.c.bf16 %v2298_v50, %v2294_v49  ;;  %v2300_v61 = vadd.f32 %v2299_v56, %v1891_v60 }
 0x3ba   : > { %2621 = vrot.lane.b32.xlu0 %v2493_v51, %s9840_s20  ;;  %v2501_v53 = vsel %vm1732_vm3, %v2493_v51, 0  ;;  %v2370_v59 = vpack.c.bf16 %v2300_v61, %v2296_v58 }
 0x3bb   : > { %8658 = vmatpush3.bf16.xpose.msra.mxu1 %v2501_v53 }
 0x3bc   : > { %8663 = vmatprep.subr.bf16.mxu1 %v9838_v17 }
 0x3fc   : > { %v2496_v52 = vpop.permute.xlu0 %2495 }
 0x3fd   : > { %8660 = vmatmul.mubr.msk.bf16.vlgmr.msra.gmra.mxu1 %vm1732_vm3, %v2496_v52 }
 0x3fe   : > { %8665 = vmatprep.mubr.msk.bf16.mxu1 %vm9839_vm4, %v9838_v17 }
 0x400   : > { %v2373_v55 = vpop.permute.xlu0 %2372 }
 0x401   : > { %v2378_v57 = vsel %vm1732_vm3, %v2373_v55, 0 }
 0x402   : > { %8646 = vmatpush3.bf16.xpose.msra.mxu0 %v2378_v57 }
 0x403   : > { %8651 = vmatprep.subr.bf16.mxu0 %v9838_v17 }
 0x409   : > { %8648 = vmatmul.mubr.msk.bf16.vlgmr.msra.gmra.mxu0 %vm1732_vm3, %v2368_v39 }
 0x40a   : > { %8652 = vmatpush3.bf16.msra.mxu0 %v2370_v59  ;;  %8653 = vmatprep.mubr.msk.bf16.mxu0 %vm9839_vm4, %v9838_v17 }
 0x42c   : > { %v2622_v48 = vpop.permute.xlu0 %2621 }
 0x42d   : > { %v2627_v50 = vsel %vm1732_vm3, %v2622_v48, 0  ;;  %v9018_v48 = vld [vmem:[%s10009_s5 + $0x20] ss:$8 sps:$4 sm:$0xff]  }
 0x4bd   : > { %v2537_v62 = vpop.f32.mrf.mxu1 }
 0x4be   : > { %v2544_v0 = vmul.f32 0.125, %v2537_v62 }
 0x4bf   : > { %v8661_v1 = vpop.f32.mrf.mxu1 }
 0x4c0   : > { %v2546_v2 = vadd.f32 %v2544_v0, %v10519_v63 }
 0x4c1   : > { %v2540_v3 = vpop.f32.mrf.mxu1 }
 0x4c2   : > { %v2545_v5 = vmul.f32 0.125, %v2540_v3  ;;  %v2548_v6 = vsel %vm2425_vm5, %v2546_v2, -inf }
 0x4c3   : > { %v8662_v7 = vpop.f32.mrf.mxu1  ;;  %2549 = vmax.xlane.f32.xlu1 %v2548_v6 }
 0x4c4   : > { %v2547_v8 = vadd.f32 %v2545_v5, %v10525_v4 }
 0x4c6   : > { %v2551_v9 = vsel %vm2425_vm5, %v2547_v8, -inf }
 0x4c7   : > { %2552 = vmax.xlane.f32.xlu1 %v2551_v9 }
 0x4c9   : > { %v2414_v10 = vpop.f32.mrf.mxu0 }
 0x4ca   : > { %v2421_v11 = vmul.f32 0.125, %v2414_v10 }
 0x4cb   : > { %v8649_v12 = vpop.f32.mrf.mxu0 }
 0x4cc   : > { %v2423_v13 = vadd.f32 %v2421_v11, %v10519_v63 }
 0x4cd   : > { %v2417_v14 = vpop.f32.mrf.mxu0 }
 0x4ce   : > { %v2426_v15 = vsel %vm2425_vm5, %v2423_v13, -inf  ;;  %v2422_v29 = vmul.f32 0.125, %v2417_v14 }
 0x4cf   : > { %v8650_v16 = vpop.f32.mrf.mxu0  ;;  %2427 = vmax.xlane.f32.xlu0 %v2426_v15 }
 0x4d0   : > { %v2424_v31 = vadd.f32 %v2422_v29, %v10525_v4  ;;  %v9005_v29 = vld [vmem:[%s10009_s5 + $0x74] ss:$8 sps:$4 sm:$0xff]  }
 0x4d1   : > { %2887 = vmatprep.subr.bf16.mxu0 %v9005_v29 }
 0x4d2   : > { %v2429_v36 = vsel %vm2425_vm5, %v2424_v31, -inf }
 0x54c   : > { %v2550_v19 = vpop.xlane.xlu1 %2549 }
 0x54d   : > { %v2554_v20 = vsub.f32 %v2546_v2, %v2550_v19 }
 0x54f   : > { %v2556_v21 = vmul.f32 1.442695, %v2554_v20 }
 0x550   : > { %v2553_v22 = vpop.xlane.xlu1 %2552 }
 0x551   : > { %9667 = vpow2.f32 %v2556_v21  ;;  %v2555_v23 = vsub.f32 %v2547_v8, %v2553_v22 }
 0x553   : > { %v2558_v24 = vmul.f32 1.442695, %v2555_v23 }
 0x555   : > { %9669 = vpow2.f32 %v2558_v24 }
 0x558   : > { %v2428_v57 = vpop.xlane.xlu0 %2427 }
 0x559   : > { %v2432_v60 = vsub.f32 %v2423_v13, %v2428_v57  ;;  %v9030_v57 = vld [vmem:[%s10009_s5 + $0xa0] ss:$8 sps:$4 sm:$0xff]  }
 0x55b   : > { %v2434_v58 = vmul.f32 1.442695, %v2432_v60 }
 0x55e   : > { %v9668_v25 = vpop.eup %9667 }
 0x55f   : > { %v2560_v26 = vsel %vm2425_vm5, %v9668_v25, 0.0 }
 0x560   : > { %2561 = vadd.xlane.f32.xlu1 %v2560_v26 }
 0x562   : > { %v9670_v27 = vpop.eup %9669 }
 0x563   : > { %v2563_v28 = vsel %vm2425_vm5, %v9670_v27, 0.0 }
 0x564   : > { %2564 = vadd.xlane.f32.xlu1 %v2563_v28  ;;  %v9003_v28 = vld [vmem:[%s10009_s5 + $0x70] ss:$8 sps:$4 sm:$0xff]  }
 0x575   : > { %2572 = vrot.lane.b32.xlu1 %v2370_v59, %s9840_s20 }
 0x599   : > { %2430 = vmax.xlane.f32.xlu1 %v2429_v36  ;;  %v9006_v36 = vld [vmem:[%s10009_s5 + $0x60] ss:$8 sps:$4 sm:$0xff]  }
 0x5e9   : > { %v2562_v38 = vpop.xlane.xlu1 %2561 }
 0x5ea   : > { %9671 = vrcp.f32 %v2562_v38  ;;  %v9011_v38 = vld [vmem:[%s10009_s5 + $0x54] ss:$8 sps:$4 sm:$0xff]  }
 0x5ed   : > { %v2565_v39 = vpop.xlane.xlu1 %2564 }
 0x5ee   : > { %9673 = vrcp.f32 %v2565_v39  ;;  %v9009_v39 = vld [vmem:[%s10009_s5 + $0x50] ss:$8 sps:$4 sm:$0xff]  }
 0x5f1   : > { %v2573_v41 = vpop.permute.xlu1 %2572 }
 0x5f2   : > { %8664 = vmatpush3.bf16.msra.mxu1 %v2573_v41  ;;  %v9014_v41 = vld [vmem:[%s10009_s5 + $0x44] ss:$8 sps:$4 sm:$0xff]  }
 0x5f3   : > { %8669 = vmatprep.subr.bf16.mxu1 %v9838_v17 }
 0x5f7   : > { %v9672_v42 = vpop.eup %9671 }
 0x5f8   : > { %v2568_v46 = vmul.f32 %v9672_v42, %v9668_v25  ;;  %v9012_v42 = vld [vmem:[%s10009_s5 + $0x40] ss:$8 sps:$4 sm:$0xff]  }
 0x5fb   : > { %v9674_v45 = vpop.eup %9673 }
 0x5fc   : > { %v2569_v47 = vmul.f32 %v9674_v45, %v9670_v27  ;;  %v9017_v45 = vld [vmem:[%s10009_s5 + $0x34] ss:$8 sps:$4 sm:$0xff]  }
 0x5fe   : > { %v2570_v49 = vpack.c.bf16 %v2569_v47, %v2568_v46  ;;  %v9015_v46 = vld [vmem:[%s10009_s5 + $0x30] ss:$8 sps:$4 sm:$0xff]   ;;  %v9020_v47 = vld [vmem:[%s10009_s5 + $0x24] ss:$8 sps:$4 sm:$0xff]  }
 0x600   : > { %8666 = vmatmul.mubr.msk.bf16.vlgmr.msra.gmra.mxu1 %vm2425_vm5, %v2570_v49  ;;  %v9023_v49 = vld [vmem:[%s10009_s5 + $0x14] ss:$8 sps:$4 sm:$0xff]  }
 0x601   : > { %8670 = vmatpush3.bf16.xpose.msra.mxu1 %v2627_v50  ;;  %8671 = vmatprep.mubr.msk.bf16.mxu1 %vm9839_vm4, %v9838_v17  ;;  %v9021_v50 = vld [vmem:[%s10009_s5 + $0x10] ss:$8 sps:$4 sm:$0xff]  }
 0x602   : > { %8675 = vmatprep.subr.bf16.mxu1 %v9838_v17 }
 0x608   : > { %8672 = vmatmul.mubr.msk.bf16.vlgmr.msra.gmra.mxu1 %vm1732_vm3, %v10493_v43 }
 0x609   : > { %8676 = vmatpush3.bf16.msra.mxu1 %v2619_v40  ;;  %8677 = vmatprep.mubr.msk.bf16.mxu1 %vm9839_vm4, %v9838_v17 }
 0x622   : > { %v2431_v51 = vpop.xlane.xlu1 %2430 }
 0x623   : > { %v2433_v53 = vsub.f32 %v2424_v31, %v2431_v51  ;;  %v9008_v31 = vld [vmem:[%s10009_s5 + $0x64] ss:$8 sps:$4 sm:$0xff]  }
 0x624   : > { %v9026_v51 = vld [vmem:[%s10009_s5 + $0x4] ss:$8 sps:$4 sm:$0xff]  }
 0x625   : > { %v2436_v52 = vmul.f32 1.442695, %v2433_v53  ;;  %v9024_v53 = vld [vmem:[%s10009_s5] ss:$8 sps:$4 sm:$0xff]  }
 0x627   : > { %9675 = vpow2.f32 %v2436_v52  ;;  %v9029_v52 = vld [vmem:[%s10009_s5 + $0xb4] ss:$8 sps:$4 sm:$0xff]  }
 0x628   : > { %9677 = vpow2.f32 %v2434_v58 }
 0x634   : > { %v9676_v55 = vpop.eup %9675 }
 0x635   : > { %v2441_v56 = vsel %vm2425_vm5, %v9676_v55, 0.0  ;;  %v9678_v9 = vpop.eup %9677 }
 0x636   : > { %2442 = vadd.xlane.f32.xlu1 %v2441_v56  ;;  %v2438_v10 = vsel %vm2425_vm5, %v9678_v9, 0.0  ;;  %v9032_v56 = vld [vmem:[%s10009_s5 + $0xa4] ss:$8 sps:$4 sm:$0xff]  }
 0x6c0   : > { %v2612_v61 = vpop.f32.mrf.mxu1 }
 0x6c2   : > { %v8667_v43 = vpop.f32.mrf.mxu1 }
 0x6c4   : > { %v2615_v59 = vpop.f32.mrf.mxu1 }
 0x6c5   : > { %v8909_v30 = vpack.i.bf16 %v2615_v59, %v2612_v61 }
 0x6c6   : > { %v8668_v35 = vpop.f32.mrf.mxu1 }
 0x6c8   : > { %v2663_v40 = vpop.f32.mrf.mxu1 }
 0x6c9   : > { %v2670_v62 = vmul.f32 0.125, %v2663_v40 }
 0x6ca   : > { %v8673_v0 = vpop.f32.mrf.mxu1 }
 0x6cb   : > { %v2672_v1 = vadd.f32 %v2670_v62, %v10519_v63  ;;  %v2443_v63 = vpop.xlane.xlu1 %2442 }
 0x6cc   : > { %v2666_v2 = vpop.f32.mrf.mxu1 }
 0x6cd   : > { %v2671_v3 = vmul.f32 0.125, %v2666_v2  ;;  %v2674_v5 = vsel %vm2425_vm5, %v2672_v1, -inf }
 0x6ce   : > { %v8674_v6 = vpop.f32.mrf.mxu1  ;;  %2675 = vmax.xlane.f32.xlu0 %v2674_v5 }
 0x6cf   : > { %v2673_v7 = vadd.f32 %v2671_v3, %v10525_v4 }
 0x6d1   : > { %v2677_v8 = vsel %vm2425_vm5, %v2673_v7, -inf }
 0x6d2   : > { %2678 = vmax.xlane.f32.xlu0 %v2677_v8 }
 0x6d6   : > { %2439 = vadd.xlane.f32.xlu0 %v2438_v10  ;;  %v9033_v10 = vld [vmem:[%s10009_s5 + $0x90] ss:$8 sps:$4 sm:$0xff]  }
 0x757   : > { %v2676_v11 = vpop.xlane.xlu0 %2675 }
 0x758   : > { %v2680_v12 = vsub.f32 %v2672_v1, %v2676_v11  ;;  %v9038_v11 = vld [vmem:[%s10009_s5 + $0x84] ss:$8 sps:$4 sm:$0xff]  }
 0x75a   : > { %v2682_v13 = vmul.f32 1.442695, %v2680_v12  ;;  %v9036_v12 = vld [vmem:[%s10009_s5 + $0x80] ss:$8 sps:$4 sm:$0xff]  }
 0x75b   : > { %v2679_v14 = vpop.xlane.xlu0 %2678 }
 0x75c   : > { %9679 = vpow2.f32 %v2682_v13  ;;  %v2681_v15 = vsub.f32 %v2673_v7, %v2679_v14 }
 0x75d   : > { %9681 = vrcp.f32 %v2443_v63 }
 0x75e   : > { %v2684_v16 = vmul.f32 1.442695, %v2681_v15 }
 0x75f   : > { %v2440_v19 = vpop.xlane.xlu0 %2439 }
 0x760   : > { %9683 = vpow2.f32 %v2684_v16 }
 0x761   : > { %9685 = vrcp.f32 %v2440_v19  ;;  %v2367_v19 = vld [vmem:[%s9994_s21] sm:$0x3] }
 0x769   : > { %v9680_v4 = vpop.eup %9679 }
 0x76a   : > { %v2686_v20 = vsel %vm2425_vm5, %v9680_v4, 0.0  ;;  %v9682_v21 = vpop.eup %9681 }
 0x76b   : > { %2687 = vadd.xlane.f32.xlu0 %v2686_v20  ;;  %v2447_v26 = vmul.f32 %v9682_v21, %v9676_v55  ;;  %v9027_v55 = vld [vmem:[%s10009_s5 + $0xb0] ss:$8 sps:$4 sm:$0xff]   ;;  %v2761_v20 = vrot.slane %v2367_v19, %v10432_v33 }
 0x76d   : > { %v9684_v22 = vpop.eup %9683 }
 0x76e   : > { %v9686_v23 = vpop.eup %9685  ;;  %v2689_v24 = vsel %vm2425_vm5, %v9684_v22, 0.0 }
 0x76f   : > { %2690 = vadd.xlane.f32.xlu1 %v2689_v24  ;;  %v2446_v25 = vmul.f32 %v9686_v23, %v9678_v9  ;;  %v9035_v9 = vld [vmem:[%s10009_s5 + $0x94] ss:$8 sps:$4 sm:$0xff]  }
 0x771   : > { %v2448_v27 = vpack.c.bf16 %v2447_v26, %v2446_v25  ;;  %v9775_v26 = vld [vmem:[#allocation2 + $0x8] sm:$0xff] }
 0x773   : > { %8654 = vmatmul.mubr.msk.bf16.vlgmr.msra.gmra.mxu0 %vm2425_vm5, %v2448_v27 }
 0x774   : > { %2888 = vmatpush1.bf16.msra.mxu0 %v9003_v28  ;;  %v9776_v28 = vld [vmem:[#allocation2] sm:$0xff] }
 0x775   : > { %2889 = vmatprep.subr.bf16.mxu0 %v9008_v31 }
 0x778   : > { %2890 = vmatpush1.bf16.msra.mxu0 %v9006_v36 }
 0x779   : > { %2891 = vmatprep.subr.bf16.mxu0 %v9011_v38 }
 0x77c   : > { %2892 = vmatpush1.bf16.msra.mxu0 %v9009_v39 }
 0x77d   : > { %2893 = vmatprep.subr.bf16.mxu0 %v9014_v41 }
 0x780   : > { %2894 = vmatpush1.bf16.msra.mxu0 %v9012_v42  ;;  %v9777_v42 = vld [vmem:[#allocation2 + $0x18] sm:$0xff] }
 0x781   : > { %8910 = vrot.lane.b32.xlu0 %v8909_v30, %s9840_s20  ;;  %2895 = vmatprep.subr.bf16.mxu0 %v9017_v45 }
 0x784   : > { %2896 = vmatpush1.bf16.msra.mxu0 %v9015_v46  ;;  %v9778_v46 = vld [vmem:[#allocation2 + $0x10] sm:$0xff] }
 0x785   : > { %2897 = vmatprep.subr.bf16.mxu0 %v9020_v47 }
 0x788   : > { %2898 = vmatpush1.bf16.msra.mxu0 %v9018_v48 }
 0x789   : > { %2899 = vmatprep.subr.bf16.mxu0 %v9023_v49 }
 0x78c   : > { %2900 = vmatpush1.bf16.msra.mxu0 %v9021_v50  ;;  %v9039_v50 = vld [vmem:[%s10024_s8 + $0x150] ss:$24 sps:$4 sm:$0xff]  }
 0x78d   : > { %2901 = vmatprep.subr.bf16.mxu0 %v9026_v51  ;;  %v9041_v51 = vld [vmem:[%s10024_s8 + $0x154] ss:$24 sps:$4 sm:$0xff]  }
 0x78e   : > { %3471 = vmatprep.subr.bf16.mxu1 %v9041_v51  ;;  %v9098_v51 = vld [vmem:[%s10024_s8 + $0x1ec] ss:$24 sps:$4 sm:$0xff]  }
 0x790   : > { %2902 = vmatpush1.bf16.msra.mxu0 %v9024_v53  ;;  %v9042_v53 = vld [vmem:[%s10024_s8 + $0x158] ss:$24 sps:$4 sm:$0xff]  }
 0x791   : > { %2911 = vmatprep.subr.bf16.mxu0 %v9029_v52  ;;  %v9044_v52 = vld [vmem:[%s10024_s8 + $0x15c] ss:$24 sps:$4 sm:$0xff]  }
 0x794   : > { %2912 = vmatpush2.bf16.msra.mxu0 %v9027_v55  ;;  %v9047_v55 = vld [vmem:[%s10024_s8 + $0x124] ss:$24 sps:$4 sm:$0xff]  }
 0x795   : > { %2913 = vmatprep.subr.bf16.mxu0 %v9032_v56  ;;  %v9050_v56 = vld [vmem:[%s10024_s8 + $0x12c] ss:$24 sps:$4 sm:$0xff]  }
 0x798   : > { %2914 = vmatpush2.bf16.msra.mxu0 %v9030_v57  ;;  %v9045_v57 = vld [vmem:[%s10024_s8 + $0x120] ss:$24 sps:$4 sm:$0xff]  }
 0x799   : > { %2915 = vmatprep.subr.bf16.mxu0 %v9035_v9 }
 0x79c   : > { %2916 = vmatpush2.bf16.msra.mxu0 %v9033_v10 }
 0x79d   : > { %2917 = vmatprep.subr.bf16.mxu0 %v9038_v11 }
 0x7a0   : > { %2918 = vmatpush2.bf16.msra.mxu0 %v9036_v12 }
 0x7a1   : > { %3514 = vmatprep.subr.bf16.mxu0 %v9044_v52  ;;  %v9096_v52 = vld [vmem:[%s10024_s8 + $0x1e8] ss:$24 sps:$4 sm:$0xff]  }
 0x7f4   : > { %v2688_v60 = vpop.xlane.xlu0 %2687 }
 0x7f5   : > { %9687 = vrcp.f32 %v2688_v60  ;;  %v9048_v60 = vld [vmem:[%s10024_s8 + $0x128] ss:$24 sps:$4 sm:$0xff]  }
 0x7f8   : > { %v2691_v61 = vpop.xlane.xlu1 %2690  ;;  %v8911_v40 = vpop.permute.xlu0 %8910 }
 0x7f9   : > { %9689 = vrcp.f32 %v2691_v61  ;;  %v8913_v1 = vunpack.i.h.bf16 %v8911_v40  ;;  %v8912_v2 = vunpack.i.l.bf16 %v8911_v40  ;;  %v9053_v61 = vld [vmem:[%s10024_s8 + $0xf4] ss:$24 sps:$4 sm:$0xff]   ;;  %v9057_v40 = vld [vmem:[%s10024_s8 + $0xc0] ss:$24 sps:$4 sm:$0xff]  }
 0x802   : > { %v9688_v58 = vpop.eup %9687 }
 0x803   : > { %v2694_v59 = vmul.f32 %v9688_v58, %v9680_v4  ;;  %v2757_v4 = vrot.slane %v2367_v19, %v10435_v34  ;;  %v9056_v58 = vld [vmem:[%s10024_s8 + $0xfc] ss:$24 sps:$4 sm:$0xff]  }
 0x806   : > { %v9690_v43 = vpop.eup %9689 }
 0x807   : > { %v2695_v30 = vmul.f32 %v9690_v43, %v9684_v22  ;;  %v9051_v43 = vld [vmem:[%s10024_s8 + $0xf0] ss:$24 sps:$4 sm:$0xff]  }
 0x809   : > { %v2696_v35 = vpack.c.bf16 %v2695_v30, %v2694_v59  ;;  %v9054_v59 = vld [vmem:[%s10024_s8 + $0xf8] ss:$24 sps:$4 sm:$0xff]   ;;  %v9059_v30 = vld [vmem:[%s10024_s8 + $0xc4] ss:$24 sps:$4 sm:$0xff]  }
 0x80b   : > { %8678 = vmatmul.mubr.msk.bf16.vlgmr.msra.gmra.mxu1 %vm2425_vm5, %v2696_v35  ;;  %v9062_v35 = vld [vmem:[%s10024_s8 + $0xcc] ss:$24 sps:$4 sm:$0xff]  }
 0x80c   : > { %3472 = vmatpush1.bf16.msra.mxu1 %v9039_v50  ;;  %v9095_v50 = vld [vmem:[%s10024_s8 + $0x1e4] ss:$24 sps:$4 sm:$0xff]  }
 0x80d   : > { %3473 = vmatprep.subr.bf16.mxu1 %v9047_v55  ;;  %v9101_v55 = vld [vmem:[%s10024_s8 + $0x1b4] ss:$24 sps:$4 sm:$0xff]  }
 0x810   : > { %3474 = vmatpush1.bf16.msra.mxu1 %v9045_v57  ;;  %v9099_v57 = vld [vmem:[%s10024_s8 + $0x1b0] ss:$24 sps:$4 sm:$0xff]  }
 0x811   : > { %3475 = vmatprep.subr.bf16.mxu1 %v9053_v61  ;;  %v9107_v61 = vld [vmem:[%s10024_s8 + $0x184] ss:$24 sps:$4 sm:$0xff]  }
 0x814   : > { %3476 = vmatpush1.bf16.msra.mxu1 %v9051_v43  ;;  %v9105_v43 = vld [vmem:[%s10024_s8 + $0x180] ss:$24 sps:$4 sm:$0xff]  }
 0x815   : > { %3477 = vmatprep.subr.bf16.mxu1 %v9059_v30  ;;  %v9113_v30 = vld [vmem:[%s10024_s8 + $0x164] ss:$24 sps:$4 sm:$0xff]  }
 0x818   : > { %3478 = vmatpush1.bf16.msra.mxu1 %v9057_v40 }
 0x833   : > { %v2486_v62 = vpop.f32.mrf.mxu0 }
 0x834   : > { %v2749_v5 = vsel %vm1732_vm3, %v2486_v62, %v8912_v2  ;;  %v9060_v62 = vld [vmem:[%s10024_s8 + $0xc8] ss:$24 sps:$4 sm:$0xff]  }
 0x835   : > { %v8655_v0 = vpop.f32.mrf.mxu0  ;;  %v9063_v2 = vld [vmem:[%s10024_s8 + $0x90] ss:$24 sps:$4 sm:$0xff]  }
 0x836   : > { %v9065_v0 = vld [vmem:[%s10024_s8 + $0x94] ss:$24 sps:$4 sm:$0xff]  }
 0x837   : > { %v2489_v3 = vpop.f32.mrf.mxu0  ;;  %3479 = vmatprep.subr.bf16.mxu1 %v9065_v0 }
 0x838   : > { %v2750_v6 = vsel %vm1732_vm3, %v2489_v3, %v8913_v1  ;;  %v9068_v1 = vld [vmem:[%s10024_s8 + $0x9c] ss:$24 sps:$4 sm:$0xff]   ;;  %v9066_v3 = vld [vmem:[%s10024_s8 + $0x98] ss:$24 sps:$4 sm:$0xff]   ;;  %3480 = vmatpush1.bf16.msra.mxu1 %v9063_v2 }
 0x839   : > { %v2751_v7 = vpack.c.bf16 %v2750_v6, %v2749_v5  ;;  %v8656_v8 = vpop.f32.mrf.mxu0 }
 0x8cb   : > { %v2734_v13 = vpop.f32.mrf.mxu1 }
 0x8cd   : > { %v8679_v14 = vpop.f32.mrf.mxu1 }
 0x8cf   : > { %v2737_v63 = vpop.f32.mrf.mxu1 }
 0x8d0   : > { %v2752_v15 = vpack.c.bf16 %v2737_v63, %v2734_v13 }
 0x8d1   : > { %v8680_v16 = vpop.f32.mrf.mxu1 }
 0x8d2   : > { %7873 = vmatprep.mubr.msk.bf16.mxu0 %vm1732_vm3, %v2752_v15 }
 0x8d3   : > { %2920 = vmatmul.mubr.bf16.vlgmr.msra.gmra.mxu0 %v2751_v7 }
 0x8d4   : > { %3515 = vmatpush1.bf16.msra.mxu0 %v9042_v53  ;;  %v9093_v53 = vld [vmem:[%s10024_s8 + $0x1e0] ss:$24 sps:$4 sm:$0xff]  }
 0x8d5   : > { %3516 = vmatprep.subr.bf16.mxu0 %v9050_v56  ;;  %v9104_v56 = vld [vmem:[%s10024_s8 + $0x1bc] ss:$24 sps:$4 sm:$0xff]  }
 0x8d8   : > { %3517 = vmatpush1.bf16.msra.mxu0 %v9048_v60  ;;  %v9102_v60 = vld [vmem:[%s10024_s8 + $0x1b8] ss:$24 sps:$4 sm:$0xff]  }
 0x8d9   : > { %3518 = vmatprep.subr.bf16.mxu0 %v9056_v58  ;;  %v9110_v58 = vld [vmem:[%s10024_s8 + $0x18c] ss:$24 sps:$4 sm:$0xff]  }
 0x8dc   : > { %3519 = vmatpush1.bf16.msra.mxu0 %v9054_v59  ;;  %v9108_v59 = vld [vmem:[%s10024_s8 + $0x188] ss:$24 sps:$4 sm:$0xff]  }
 0x8dd   : > { %3520 = vmatprep.subr.bf16.mxu0 %v9062_v35  ;;  %v9149_v35 = vld [vmem:[%s10034_s11 + $0x74] ss:$8 sps:$4 sm:$0xff]  }
 0x8e0   : > { %3521 = vmatpush1.bf16.msra.mxu0 %v9060_v62 }
 0x8e1   : > { %3522 = vmatprep.subr.bf16.mxu0 %v9068_v1 }
 0x8e4   : > { %3523 = vmatpush1.bf16.msra.mxu0 %v9066_v3 }
 0x993   : > { %v2921_v21 = vpop.f32.mrf.mxu0 }
 0x994   : > { %v2922_v22 = vadd.f32 %v2921_v21, %v2757_v4  ;;  %v9071_v21 = vld [vmem:[%s10024_s8 + $0x64] ss:$24 sps:$4 sm:$0xff]  }
 0x995   : > { %v2923_v23 = vpop.f32.mrf.mxu0  ;;  %3481 = vmatprep.subr.bf16.mxu1 %v9071_v21 }
 0x996   : > { %v2924_v24 = vadd.f32 %v2923_v23, %v2761_v20  ;;  %v10593_v29 = vadd.f32 %v9776_v28, %v2922_v22  ;;  %v9069_v22 = vld [vmem:[%s10024_s8 + $0x60] ss:$24 sps:$4 sm:$0xff]   ;;  %v9074_v23 = vld [vmem:[%s10024_s8 + $0x6c] ss:$24 sps:$4 sm:$0xff]   ;;  %v9080_v28 = vld [vmem:[%s10024_s8 + $0x3c] ss:$24 sps:$4 sm:$0xff]  }
 0x997   : > { %v2925_v25 = vpop.f32.mrf.mxu0  ;;  %3482 = vmatpush1.bf16.msra.mxu1 %v9069_v22  ;;  %3524 = vmatprep.subr.bf16.mxu0 %v9074_v23 }
 0x998   : > { %v10591_v27 = vadd.f32 %v9775_v26, %v2924_v24  ;;  %v2926_v31 = vadd.f32 %v2925_v25, %v2757_v4  ;;  %v9072_v24 = vld [vmem:[%s10024_s8 + $0x68] ss:$24 sps:$4 sm:$0xff]   ;;  %v9077_v25 = vld [vmem:[%s10024_s8 + $0x34] ss:$24 sps:$4 sm:$0xff]  }
 0x999   : > { %v2927_v36 = vpop.f32.mrf.mxu0  ;;  %3525 = vmatpush1.bf16.msra.mxu0 %v9072_v24  ;;  %v9075_v26 = vld [vmem:[%s10024_s8 + $0x30] ss:$24 sps:$4 sm:$0xff]   ;;  %3483 = vmatprep.subr.bf16.mxu1 %v9077_v25 }
 0x99a   : > { %v2928_v38 = vadd.f32 %v2927_v36, %v2761_v20  ;;  %v2936_v39 = vsel %vm1732_vm3, %v10591_v27, 0.0  ;;  %v10600_v47 = vadd.f32 %v9778_v46, %v2926_v31  ;;  %v9078_v31 = vld [vmem:[%s10024_s8 + $0x38] ss:$24 sps:$4 sm:$0xff]   ;;  %3526 = vmatprep.subr.bf16.mxu0 %v9080_v28  ;;  %v9092_v46 = vld [vmem:[%s10024_s8 + $0x21c] ss:$24 sps:$4 sm:$0xff]  }
 0x99b   : > { %v2937_v41 = vadd.f32 %v2936_v39, %v10593_v29  ;;  %3484 = vmatpush1.bf16.msra.mxu1 %v9075_v26  ;;  %v9081_v36 = vld [vmem:[%s10024_s8] ss:$24 sps:$4 sm:$0xff]  }
 0x99c   : > { %v10598_v45 = vadd.f32 %v9777_v42, %v2928_v38  ;;  %v9083_v38 = vld [vmem:[%s10024_s8 + $0x4] ss:$24 sps:$4 sm:$0xff]   ;;  %v9084_v39 = vld [vmem:[%s10024_s8 + $0x8] ss:$24 sps:$4 sm:$0xff]   ;;  %v9089_v42 = vld [vmem:[%s10024_s8 + $0x214] ss:$24 sps:$4 sm:$0xff]  }
 0x99d   : > { %2938 = vadd.xlane.f32.xlu1 %v2937_v41  ;;  %3527 = vmatpush1.bf16.msra.mxu0 %v9078_v31  ;;  %v9086_v41 = vld [vmem:[%s10024_s8 + $0xc] ss:$24 sps:$4 sm:$0xff]   ;;  %v9111_v31 = vld [vmem:[%s10024_s8 + $0x160] ss:$24 sps:$4 sm:$0xff]  }
 0x99e   : > { %v2940_v48 = vsel %vm1732_vm3, %v10598_v45, 0.0  ;;  %3485 = vmatprep.subr.bf16.mxu1 %v9083_v38  ;;  %3528 = vmatprep.subr.bf16.mxu0 %v9086_v41  ;;  %v9147_v38 = vld [vmem:[%s10034_s11 + $0x70] ss:$8 sps:$4 sm:$0xff]   ;;  %v9119_v41 = vld [vmem:[%s10024_s8 + $0x104] ss:$24 sps:$4 sm:$0xff]  }
 0x99f   : > { %v2941_v49 = vadd.f32 %v2940_v48, %v10600_v47  ;;  %3486 = vmatpush1.bf16.msra.mxu1 %v9081_v36  ;;  %v9087_v48 = vld [vmem:[%s10024_s8 + $0x210] ss:$24 sps:$4 sm:$0xff]  }
 0x9a0   : > { %3495 = vmatprep.subr.bf16.mxu1 %v9089_v42  ;;  %v9153_v42 = vld [vmem:[%s10034_s11 + $0x60] ss:$8 sps:$4 sm:$0xff]  }
 0x9a1   : > { %2942 = vadd.xlane.f32.xlu1 %v2941_v49  ;;  %3529 = vmatpush1.bf16.msra.mxu0 %v9084_v39  ;;  %v9090_v49 = vld [vmem:[%s10024_s8 + $0x218] ss:$24 sps:$4 sm:$0xff]  }
 0x9a2   : > { %3538 = vmatprep.subr.bf16.mxu0 %v9092_v46  ;;  %v9114_v39 = vld [vmem:[%s10024_s8 + $0x130] ss:$24 sps:$4 sm:$0xff]   ;;  %v9161_v46 = vld [vmem:[%s10034_s11 + $0x54] ss:$8 sps:$4 sm:$0xff]  }
 0x9a3   : > { %3496 = vmatpush2.bf16.msra.mxu1 %v9087_v48  ;;  %v9117_v48 = vld [vmem:[%s10024_s8 + $0x100] ss:$24 sps:$4 sm:$0xff]  }
 0x9a4   : > { %3497 = vmatprep.subr.bf16.mxu1 %v9095_v50  ;;  %v9159_v50 = vld [vmem:[%s10034_s11 + $0x50] ss:$8 sps:$4 sm:$0xff]  }
 0x9a5   : > { %3539 = vmatpush2.bf16.msra.mxu0 %v9090_v49  ;;  %v9122_v49 = vld [vmem:[%s10024_s8 + $0xd4] ss:$24 sps:$4 sm:$0xff]  }
 0x9a6   : > { %3540 = vmatprep.subr.bf16.mxu0 %v9098_v51  ;;  %v9167_v51 = vld [vmem:[%s10034_s11 + $0x44] ss:$8 sps:$4 sm:$0xff]  }
 0x9a7   : > { %3498 = vmatpush2.bf16.msra.mxu1 %v9093_v53  ;;  %v9120_v53 = vld [vmem:[%s10024_s8 + $0xd0] ss:$24 sps:$4 sm:$0xff]  }
 0x9a8   : > { %3499 = vmatprep.subr.bf16.mxu1 %v9101_v55  ;;  %v9165_v55 = vld [vmem:[%s10034_s11 + $0x40] ss:$8 sps:$4 sm:$0xff]  }
 0x9a9   : > { %3541 = vmatpush2.bf16.msra.mxu0 %v9096_v52  ;;  %v9125_v52 = vld [vmem:[%s10024_s8 + $0xa4] ss:$24 sps:$4 sm:$0xff]  }
 0x9aa   : > { %3542 = vmatprep.subr.bf16.mxu0 %v9104_v56  ;;  %v9173_v56 = vld [vmem:[%s10034_s11 + $0x34] ss:$8 sps:$4 sm:$0xff]  }
 0x9ab   : > { %3500 = vmatpush2.bf16.msra.mxu1 %v9099_v57  ;;  %v9123_v57 = vld [vmem:[%s10024_s8 + $0xa0] ss:$24 sps:$4 sm:$0xff]  }
 0x9ac   : > { %3501 = vmatprep.subr.bf16.mxu1 %v9107_v61  ;;  %v9171_v61 = vld [vmem:[%s10034_s11 + $0x30] ss:$8 sps:$4 sm:$0xff]  }
 0x9ad   : > { %3543 = vmatpush2.bf16.msra.mxu0 %v9102_v60  ;;  %v9128_v60 = vld [vmem:[%s10024_s8 + $0x74] ss:$24 sps:$4 sm:$0xff]  }
 0x9ae   : > { %3544 = vmatprep.subr.bf16.mxu0 %v9110_v58  ;;  %v9179_v58 = vld [vmem:[%s10034_s11 + $0x24] ss:$8 sps:$4 sm:$0xff]  }
 0x9af   : > { %3502 = vmatpush2.bf16.msra.mxu1 %v9105_v43  ;;  %v9126_v43 = vld [vmem:[%s10024_s8 + $0x70] ss:$24 sps:$4 sm:$0xff]  }
 0x9b0   : > { %3557 = vmatprep.subr.bf16.mxu1 %v9113_v30  ;;  %v9177_v30 = vld [vmem:[%s10034_s11 + $0x20] ss:$8 sps:$4 sm:$0xff]  }
 0x9b1   : > { %3545 = vmatpush2.bf16.msra.mxu0 %v9108_v59  ;;  %v9131_v59 = vld [vmem:[%s10024_s8 + $0x44] ss:$24 sps:$4 sm:$0xff]  }
 0x9b2   : > { %4290 = vmatprep.subr.bf16.mxu0 %v9149_v35  ;;  %v9185_v35 = vld [vmem:[%s10034_s11 + $0x14] ss:$8 sps:$4 sm:$0xff]  }
 0xa26   : > { %v2939_v5 = vpop.xlane.xlu1 %2938 }
 0xa27   : > { %v2944_v6 = vmul.f32 0.0052083335, %v2939_v5  ;;  %v2934_v5 = vld [vmem:[%s10004_s28] sm:$0x3] }
 0xa29   : > { %v10626_v7 = vsub.f32 %v10593_v29, %v2944_v6  ;;  %v10629_v8 = vsub.f32 %v10591_v27, %v2944_v6 }
 0xa2a   : > { %v2943_v9 = vpop.xlane.xlu1 %2942 }
 0xa2b   : > { %v2945_v10 = vmul.f32 0.0052083335, %v2943_v9  ;;  %v2950_v11 = vmul.f32 %v10626_v7, %v10626_v7  ;;  %v2951_v12 = vmul.f32 %v10629_v8, %v10629_v8  ;;  %v2935_v9 = vld [vmem:[%s10014_s18] sm:$0x3] }
 0xa2d   : > { %v10636_v13 = vsub.f32 %v10600_v47, %v2945_v10  ;;  %v10639_v14 = vsub.f32 %v10598_v45, %v2945_v10  ;;  %v2954_v63 = vsel %vm1732_vm3, %v2951_v12, 0.0 }
 0xa2e   : > { %v2955_v15 = vadd.f32 %v2954_v63, %v2950_v11  ;;  %v2980_v11 = vrot.slane %v2934_v5, %v10432_v33  ;;  %v2976_v63 = vrot.slane %v2934_v5, %v10435_v34  ;;  %v9140_v5 = vld [vmem:[%s10024_s8 + $0x1f4] ss:$24 sps:$4 sm:$0xff]  }
 0xa2f   : > { %v2952_v16 = vmul.f32 %v10636_v13, %v10636_v13  ;;  %v2953_v19 = vmul.f32 %v10639_v14, %v10639_v14 }
 0xa30   : > { %2956 = vadd.xlane.f32.xlu1 %v2955_v15 }
 0xa31   : > { %v2958_v4 = vsel %vm1732_vm3, %v2953_v19, 0.0  ;;  %v2991_v19 = vrot.slane %v2935_v9, %v10435_v34 }
 0xa32   : > { %v2959_v20 = vadd.f32 %v2958_v4, %v2952_v16  ;;  %v2995_v16 = vrot.slane %v2935_v9, %v10432_v33  ;;  %v9143_v9 = vld [vmem:[%s10024_s8 + $0x1c4] ss:$24 sps:$4 sm:$0xff]  }
 0xa34   : > { %2960 = vadd.xlane.f32.xlu1 %v2959_v20 }
 0xab9   : > { %v2957_v40 = vpop.xlane.xlu1 %2956 }
 0xaba   : > { %v2962_v62 = vmul.f32 0.0052083335, %v2957_v40  ;;  %v9129_v40 = vld [vmem:[%s10024_s8 + $0x40] ss:$24 sps:$4 sm:$0xff]  }
 0xabc   : > { %v2964_v0 = vadd.f32 1e-12, %v2962_v62  ;;  %v9134_v62 = vld [vmem:[%s10024_s8 + $0x14] ss:$24 sps:$4 sm:$0xff]  }
 0xabd   : > { %v2961_v1 = vpop.xlane.xlu1 %2960 }
 0xabe   : > { %9691 = vrsqrt.f32 %v2964_v0  ;;  %v2963_v2 = vmul.f32 0.0052083335, %v2961_v1  ;;  %v9183_v0 = vld [vmem:[%s10034_s11 + $0x10] ss:$8 sps:$4 sm:$0xff]  }
 0xabf   : > { %v9132_v1 = vld [vmem:[%s10024_s8 + $0x10] ss:$24 sps:$4 sm:$0xff]  }
 0xac0   : > { %v2965_v3 = vadd.f32 1e-12, %v2963_v2  ;;  %v9137_v2 = vld [vmem:[%s10024_s8 + $0x224] ss:$24 sps:$4 sm:$0xff]  }
 0xac2   : > { %9693 = vrsqrt.f32 %v2965_v3  ;;  %v9135_v3 = vld [vmem:[%s10024_s8 + $0x220] ss:$24 sps:$4 sm:$0xff]  }
 0xacb   : > { %v9692_v6 = vpop.eup %9691 }
 0xacc   : > { %v2969_v10 = vmul.f32 %v9692_v6, %v10629_v8  ;;  %v2968_v12 = vmul.f32 %v9692_v6, %v10626_v7  ;;  %v9138_v6 = vld [vmem:[%s10024_s8 + $0x1f0] ss:$24 sps:$4 sm:$0xff]  }
 0xace   : > { %v2984_v20 = vmul.f32 %v2980_v11, %v2969_v10  ;;  %v2983_v21 = vmul.f32 %v2976_v63, %v2968_v12  ;;  %v9141_v10 = vld [vmem:[%s10024_s8 + $0x1c0] ss:$24 sps:$4 sm:$0xff]   ;;  %v9144_v12 = vld [vmem:[%s10024_s8 + $0x190] ss:$24 sps:$4 sm:$0xff]  }
 0xacf   : > { %v9694_v15 = vpop.eup %9693 }
 0xad0   : > { %v2971_v4 = vmul.f32 %v9694_v15, %v10639_v14  ;;  %v2970_v8 = vmul.f32 %v9694_v15, %v10636_v13  ;;  %v2999_v7 = vadd.f32 %v2995_v16, %v2984_v20  ;;  %v2998_v25 = vadd.f32 %v2991_v19, %v2983_v21  ;;  %v9116_v14 = vld [vmem:[%s10024_s8 + $0x134] ss:$24 sps:$4 sm:$0xff]   ;;  %v9150_v15 = vld [vmem:[%s10034_s11 + $0x170] ss:$8 sps:$4 sm:$0xff]   ;;  %v9168_v21 = vld [vmem:[%s10034_s11 + $0x140] ss:$8 sps:$4 sm:$0xff]  }
 0xad1   : > { %v9155_v13 = vld [vmem:[%s10034_s11 + $0x64] ss:$8 sps:$4 sm:$0xff]   ;;  %v9162_v20 = vld [vmem:[%s10034_s11 + $0x150] ss:$8 sps:$4 sm:$0xff]  }
 0xad2   : > { %v2986_v22 = vmul.f32 %v2980_v11, %v2971_v4  ;;  %v2985_v23 = vmul.f32 %v2976_v63, %v2970_v8  ;;  %v9146_v11 = vld [vmem:[%s10024_s8 + $0x194] ss:$24 sps:$4 sm:$0xff]  }
 0xad3   : > { %v9152_v63 = vld [vmem:[%s10034_s11 + $0x174] ss:$8 sps:$4 sm:$0xff]   ;;  %v9170_v8 = vld [vmem:[%s10034_s11 + $0x144] ss:$8 sps:$4 sm:$0xff]  }
 0xad4   : > { %v3001_v24 = vadd.f32 %v2995_v16, %v2986_v22  ;;  %v3000_v26 = vadd.f32 %v2991_v19, %v2985_v23  ;;  %v9158_v16 = vld [vmem:[%s10034_s11 + $0x164] ss:$8 sps:$4 sm:$0xff]   ;;  %v9156_v19 = vld [vmem:[%s10034_s11 + $0x160] ss:$8 sps:$4 sm:$0xff]   ;;  %v9164_v4 = vld [vmem:[%s10034_s11 + $0x154] ss:$8 sps:$4 sm:$0xff]  }
 0xad5   : > { %v9176_v22 = vld [vmem:[%s10034_s11 + $0x134] ss:$8 sps:$4 sm:$0xff]   ;;  %v9174_v23 = vld [vmem:[%s10034_s11 + $0x130] ss:$8 sps:$4 sm:$0xff]  }
 0xad6   : > { %v3003_v28 = vpack.c.bf16 %v3001_v24, %v2999_v7  ;;  %v10688_v36 = vpack.c.bf16 %v3000_v26, %v2998_v25  ;;  %v9182_v7 = vld [vmem:[%s10034_s11 + $0x124] ss:$8 sps:$4 sm:$0xff]   ;;  %v9180_v25 = vld [vmem:[%s10034_s11 + $0x120] ss:$8 sps:$4 sm:$0xff]  }
 0xad7   : > { %v9191_v24 = vld [vmem:[%s10034_s11 + $0x4] ss:$8 sps:$4 sm:$0xff]   ;;  %v9189_v26 = vld [vmem:[%s10034_s11] ss:$8 sps:$4 sm:$0xff]  }
 0xad8   : > { %7946 = vmatprep.mubr.msk.bf16.mxu1 %vm1732_vm3, %v3003_v28  ;;  %7947 = vmatprep.mubr.msk.bf16.mxu0 %vm1732_vm3, %v3003_v28 }
 0xad9   : > { %3504 = vmatmul.mubr.bf16.vlgmr.msra.gmra.mxu1 %v10688_v36  ;;  %3547 = vmatmul.mubr.bf16.vlgmr.msra.gmra.mxu0 %v10688_v36 }
 0xada   : > { %3558 = vmatpush1.bf16.msra.mxu1 %v9111_v31  ;;  %7948 = vmatprep.mubr.msk.bf16.mxu1 %vm1732_vm3, %v3003_v28  ;;  %v9188_v28 = vld [vmem:[%s10034_s11 + $0x114] ss:$8 sps:$4 sm:$0xff]   ;;  %v9186_v31 = vld [vmem:[%s10034_s11 + $0x110] ss:$8 sps:$4 sm:$0xff]  }
 0xadb   : > { %3559 = vmatprep.subr.bf16.mxu1 %v9116_v14  ;;  %4291 = vmatpush1.bf16.msra.mxu0 %v9147_v38  ;;  %v9197_v14 = vld [vmem:[%s10034_s11 + $0xf4] ss:$8 sps:$4 sm:$0xff]   ;;  %v9195_v38 = vld [vmem:[%s10034_s11 + $0xf0] ss:$8 sps:$4 sm:$0xff]  }
 0xadc   : > { %4292 = vmatprep.subr.bf16.mxu0 %v9155_v13  ;;  %v9192_v13 = vld [vmem:[%s10034_s11 + $0x100] ss:$8 sps:$4 sm:$0xff]  }
 0xade   : > { %3560 = vmatpush1.bf16.msra.mxu1 %v9114_v39  ;;  %v9200_v39 = vld [vmem:[%s10034_s11 + $0x1f4] ss:$8 sps:$4 sm:$0xff]  }
 0xadf   : > { %3561 = vmatprep.subr.bf16.mxu1 %v9119_v41  ;;  %4293 = vmatpush1.bf16.msra.mxu0 %v9153_v42  ;;  %v9198_v41 = vld [vmem:[%s10034_s11 + $0x1f0] ss:$8 sps:$4 sm:$0xff]   ;;  %v9203_v42 = vld [vmem:[%s10034_s11 + $0xe4] ss:$8 sps:$4 sm:$0xff]  }
 0xae0   : > { %4294 = vmatprep.subr.bf16.mxu0 %v9161_v46  ;;  %v9201_v46 = vld [vmem:[%s10034_s11 + $0xe0] ss:$8 sps:$4 sm:$0xff]  }
 0xae2   : > { %3562 = vmatpush1.bf16.msra.mxu1 %v9117_v48  ;;  %v9206_v48 = vld [vmem:[%s10034_s11 + $0x1e4] ss:$8 sps:$4 sm:$0xff]  }
 0xae3   : > { %3563 = vmatprep.subr.bf16.mxu1 %v9122_v49  ;;  %4295 = vmatpush1.bf16.msra.mxu0 %v9159_v50  ;;  %v9204_v49 = vld [vmem:[%s10034_s11 + $0x1e0] ss:$8 sps:$4 sm:$0xff]   ;;  %v9209_v50 = vld [vmem:[%s10034_s11 + $0xd4] ss:$8 sps:$4 sm:$0xff]  }
 0xae4   : > { %4296 = vmatprep.subr.bf16.mxu0 %v9167_v51  ;;  %v9207_v51 = vld [vmem:[%s10034_s11 + $0xd0] ss:$8 sps:$4 sm:$0xff]  }
 0xae6   : > { %3564 = vmatpush1.bf16.msra.mxu1 %v9120_v53  ;;  %v9212_v53 = vld [vmem:[%s10034_s11 + $0x1d4] ss:$8 sps:$4 sm:$0xff]  }
 0xae7   : > { %3565 = vmatprep.subr.bf16.mxu1 %v9125_v52  ;;  %4297 = vmatpush1.bf16.msra.mxu0 %v9165_v55  ;;  %v9210_v52 = vld [vmem:[%s10034_s11 + $0x1d0] ss:$8 sps:$4 sm:$0xff]   ;;  %v9215_v55 = vld [vmem:[%s10034_s11 + $0xc4] ss:$8 sps:$4 sm:$0xff]  }
 0xae8   : > { %4298 = vmatprep.subr.bf16.mxu0 %v9173_v56  ;;  %v9213_v56 = vld [vmem:[%s10034_s11 + $0xc0] ss:$8 sps:$4 sm:$0xff]  }
 0xaea   : > { %3566 = vmatpush1.bf16.msra.mxu1 %v9123_v57  ;;  %v9218_v57 = vld [vmem:[%s10034_s11 + $0x1c4] ss:$8 sps:$4 sm:$0xff]  }
 0xaeb   : > { %3567 = vmatprep.subr.bf16.mxu1 %v9128_v60  ;;  %4299 = vmatpush1.bf16.msra.mxu0 %v9171_v61  ;;  %v9216_v60 = vld [vmem:[%s10034_s11 + $0x1c0] ss:$8 sps:$4 sm:$0xff]   ;;  %v9221_v61 = vld [vmem:[%s10034_s11 + $0xb4] ss:$8 sps:$4 sm:$0xff]  }
 0xaec   : > { %4300 = vmatprep.subr.bf16.mxu0 %v9179_v58  ;;  %v9219_v58 = vld [vmem:[%s10034_s11 + $0xb0] ss:$8 sps:$4 sm:$0xff]  }
 0xaee   : > { %3568 = vmatpush1.bf16.msra.mxu1 %v9126_v43  ;;  %v9224_v43 = vld [vmem:[%s10034_s11 + $0x1b4] ss:$8 sps:$4 sm:$0xff]  }
 0xaef   : > { %3569 = vmatprep.subr.bf16.mxu1 %v9131_v59  ;;  %4301 = vmatpush1.bf16.msra.mxu0 %v9177_v30  ;;  %v9222_v59 = vld [vmem:[%s10034_s11 + $0x1b0] ss:$8 sps:$4 sm:$0xff]   ;;  %v9227_v30 = vld [vmem:[%s10034_s11 + $0xa4] ss:$8 sps:$4 sm:$0xff]  }
 0xaf0   : > { %4302 = vmatprep.subr.bf16.mxu0 %v9185_v35  ;;  %v9225_v35 = vld [vmem:[%s10034_s11 + $0xa0] ss:$8 sps:$4 sm:$0xff]  }
 0xaf2   : > { %3570 = vmatpush1.bf16.msra.mxu1 %v9129_v40  ;;  %v9230_v40 = vld [vmem:[%s10034_s11 + $0x1a4] ss:$8 sps:$4 sm:$0xff]  }
 0xaf3   : > { %3571 = vmatprep.subr.bf16.mxu1 %v9134_v62  ;;  %4303 = vmatpush1.bf16.msra.mxu0 %v9183_v0  ;;  %v9228_v62 = vld [vmem:[%s10034_s11 + $0x1a0] ss:$8 sps:$4 sm:$0xff]   ;;  %v9231_v0 = vld [vmem:[%s10034_s11 + $0x90] ss:$8 sps:$4 sm:$0xff]  }
 0xaf4   : > { %4304 = vmatprep.subr.bf16.mxu0 %v9191_v24 }
 0xaf6   : > { %3572 = vmatpush1.bf16.msra.mxu1 %v9132_v1  ;;  %v9233_v1 = vld [vmem:[%s10034_s11 + $0x94] ss:$8 sps:$4 sm:$0xff]  }
 0xaf7   : > { %3581 = vmatprep.subr.bf16.mxu1 %v9137_v2  ;;  %4305 = vmatpush1.bf16.msra.mxu0 %v9189_v26  ;;  %v9236_v2 = vld [vmem:[%s10034_s11 + $0x194] ss:$8 sps:$4 sm:$0xff]  }
 0xaf8   : > { %4306 = vmatprep.subr.bf16.mxu0 %v9197_v14 }
 0xafa   : > { %3582 = vmatpush2.bf16.msra.mxu1 %v9135_v3  ;;  %v9239_v3 = vld [vmem:[%s10034_s11 + $0x84] ss:$8 sps:$4 sm:$0xff]  }
 0xafb   : > { %3583 = vmatprep.subr.bf16.mxu1 %v9140_v5  ;;  %4307 = vmatpush2.bf16.msra.mxu0 %v9195_v38  ;;  %v9234_v5 = vld [vmem:[%s10034_s11 + $0x190] ss:$8 sps:$4 sm:$0xff]  }
 0xafc   : > { %4308 = vmatprep.subr.bf16.mxu0 %v9203_v42 }
 0xafe   : > { %3584 = vmatpush2.bf16.msra.mxu1 %v9138_v6  ;;  %v9237_v6 = vld [vmem:[%s10034_s11 + $0x80] ss:$8 sps:$4 sm:$0xff]  }
 0xaff   : > { %3585 = vmatprep.subr.bf16.mxu1 %v9143_v9  ;;  %4309 = vmatpush2.bf16.msra.mxu0 %v9201_v46  ;;  %v9242_v9 = vld [vmem:[%s10034_s11 + $0x184] ss:$8 sps:$4 sm:$0xff]  }
 0xb00   : > { %4310 = vmatprep.subr.bf16.mxu0 %v9209_v50 }
 0xb02   : > { %3586 = vmatpush2.bf16.msra.mxu1 %v9141_v10  ;;  %v9240_v10 = vld [vmem:[%s10034_s11 + $0x180] ss:$8 sps:$4 sm:$0xff]  }
 0xb03   : > { %3587 = vmatprep.subr.bf16.mxu1 %v9146_v11  ;;  %4311 = vmatpush2.bf16.msra.mxu0 %v9207_v51  ;;  %v9245_v11 = vld [vmem:[%s10034_s11 + $0x274] ss:$8 sps:$4 sm:$0xff]  }
 0xb04   : > { %4312 = vmatprep.subr.bf16.mxu0 %v9215_v55 }
 0xb06   : > { %3588 = vmatpush2.bf16.msra.mxu1 %v9144_v12  ;;  %v10783_v12 = vld [vmem:[%s10029_s9] sm:$0x3f] }
 0xb07   : > { %4333 = vmatprep.subr.bf16.mxu1 %v9152_v63  ;;  %4313 = vmatpush2.bf16.msra.mxu0 %v9213_v56  ;;  %v3081_v63 = vrot.slane %v10783_v12, %v10435_v34 }
 0xb08   : > { %4314 = vmatprep.subr.bf16.mxu0 %v9221_v61 }
 0xb09   : > { %3590 = vmatmul.mubr.bf16.vlgmr.msra.gmra.mxu1 %v10688_v36  ;;  %v9194_v36 = vld [vmem:[%s10034_s11 + $0x104] ss:$8 sps:$4 sm:$0xff]  }
 0xb0a   : > { %4334 = vmatpush1.bf16.msra.mxu1 %v9150_v15  ;;  %v3089_v15 = vrot.slane %v10783_v12, %v10498_v44 }
 0xb0b   : > { %4335 = vmatprep.subr.bf16.mxu1 %v9158_v16  ;;  %4315 = vmatpush2.bf16.msra.mxu0 %v9219_v58 }
 0xb0c   : > { %4316 = vmatprep.subr.bf16.mxu0 %v9227_v30 }
 0xb0e   : > { %4336 = vmatpush1.bf16.msra.mxu1 %v9156_v19 }
 0xb0f   : > { %4337 = vmatprep.subr.bf16.mxu1 %v9164_v4  ;;  %4317 = vmatpush2.bf16.msra.mxu0 %v9225_v35  ;;  %v3085_v4 = vrot.slane %v10783_v12, %v10432_v33 }
 0xb10   : > { %4318 = vmatprep.subr.bf16.mxu0 %v9233_v1 }
 0xb12   : > { %4338 = vmatpush1.bf16.msra.mxu1 %v9162_v20  ;;  %v3093_v20 = vrot.slane %v10783_v12, %v10506_v54 }
 0xb13   : > { %4339 = vmatprep.subr.bf16.mxu1 %v9170_v8  ;;  %4319 = vmatpush2.bf16.msra.mxu0 %v9231_v0 }
 0xb14   : > { %4320 = vmatprep.subr.bf16.mxu0 %v9239_v3 }
 0xb16   : > { %4340 = vmatpush1.bf16.msra.mxu1 %v9168_v21 }
 0xb17   : > { %4341 = vmatprep.subr.bf16.mxu1 %v9176_v22  ;;  %4321 = vmatpush2.bf16.msra.mxu0 %v9237_v6 }
 0xb18   : > { %4376 = vmatprep.subr.bf16.mxu0 %v9245_v11 }
 0xb1a   : > { %4342 = vmatpush1.bf16.msra.mxu1 %v9174_v23 }
 0xb1b   : > { %4343 = vmatprep.subr.bf16.mxu1 %v9182_v7 }
 0xb1e   : > { %4344 = vmatpush1.bf16.msra.mxu1 %v9180_v25 }
 0xb1f   : > { %4345 = vmatprep.subr.bf16.mxu1 %v9188_v28 }
 0xb22   : > { %4346 = vmatpush1.bf16.msra.mxu1 %v9186_v31 }
 0xb23   : > { %4347 = vmatprep.subr.bf16.mxu1 %v9194_v36 }
 0xb26   : > { %4348 = vmatpush1.bf16.msra.mxu1 %v9192_v13 }
 0xb27   : > { %4349 = vmatprep.subr.bf16.mxu1 %v9200_v39 }
 0xb2a   : > { %4350 = vmatpush2.bf16.msra.mxu1 %v9198_v41 }
 0xb2b   : > { %4351 = vmatprep.subr.bf16.mxu1 %v9206_v48 }
 0xb2e   : > { %4352 = vmatpush2.bf16.msra.mxu1 %v9204_v49 }
 0xb2f   : > { %4353 = vmatprep.subr.bf16.mxu1 %v9212_v53 }
 0xb32   : > { %4354 = vmatpush2.bf16.msra.mxu1 %v9210_v52 }
 0xb33   : > { %4355 = vmatprep.subr.bf16.mxu1 %v9218_v57 }
 0xb36   : > { %4356 = vmatpush2.bf16.msra.mxu1 %v9216_v60 }
 0xb37   : > { %4357 = vmatprep.subr.bf16.mxu1 %v9224_v43 }
 0xb3a   : > { %4358 = vmatpush2.bf16.msra.mxu1 %v9222_v59 }
 0xb3b   : > { %4359 = vmatprep.subr.bf16.mxu1 %v9230_v40 }
 0xb3e   : > { %4360 = vmatpush2.bf16.msra.mxu1 %v9228_v62 }
 0xb3f   : > { %4361 = vmatprep.subr.bf16.mxu1 %v9236_v2 }
 0xb42   : > { %4362 = vmatpush2.bf16.msra.mxu1 %v9234_v5 }
 0xb43   : > { %4363 = vmatprep.subr.bf16.mxu1 %v9242_v9 }
 0xb46   : > { %4364 = vmatpush2.bf16.msra.mxu1 %v9240_v10 }
 0xb99   : > { %v3505_v16 = vpop.f32.mrf.mxu1  ;;  %v3548_v19 = vpop.f32.mrf.mxu0 }
 0xb9a   : > { %v10793_v8 = vadd.f32 %v3505_v16, %v3081_v63  ;;  %v10795_v21 = vadd.f32 %v3548_v19, %v3089_v15 }
 0xb9b   : > { %v3507_v22 = vpop.f32.mrf.mxu1  ;;  %v3550_v23 = vpop.f32.mrf.mxu0 }
 0xb9c   : > { %v3600_v7 = vmul.f32 %v10793_v8, %v10793_v8  ;;  %v3602_v24 = vmul.f32 %v10795_v21, %v10795_v21  ;;  %v10801_v25 = vadd.f32 %v3507_v22, %v3085_v4  ;;  %v10803_v26 = vadd.f32 %v3550_v23, %v3093_v20 }
 0xb9d   : > { %v3509_v28 = vpop.f32.mrf.mxu1  ;;  %v3552_v31 = vpop.f32.mrf.mxu0  ;;  %v3624_v51 = vmul.f32 0.7978846, %v10793_v8  ;;  %v3626_v59 = vmul.f32 0.7978846, %v10795_v21 }
 0xb9e   : > { %v3636_v36 = vmul.f32 0.044715, %v3600_v7  ;;  %v3510_v14 = vadd.f32 %v3509_v28, %v3081_v63  ;;  %v10805_v38 = vadd.f32 %v3552_v31, %v3089_v15  ;;  %v3638_v13 = vmul.f32 0.044715, %v3602_v24 }
 0xb9f   : > { %v3601_v39 = vmul.f32 %v10801_v25, %v10801_v25  ;;  %v3603_v41 = vmul.f32 %v10803_v26, %v10803_v26  ;;  %v3511_v50 = vpop.f32.mrf.mxu1  ;;  %v3625_v60 = vmul.f32 0.7978846, %v10801_v25  ;;  %v3554_v43 = vpop.f32.mrf.mxu0  ;;  %v3627_v5 = vmul.f32 0.7978846, %v10803_v26 }
 0xba0   : > { %v3648_v42 = vadd.f32 1.0, %v3636_v36  ;;  %v3606_v49 = vmul.f32 %v3510_v14, %v3510_v14  ;;  %v3608_v53 = vmul.f32 %v10805_v38, %v10805_v38  ;;  %v3650_v52 = vadd.f32 1.0, %v3638_v13 }
 0xba1   : > { %v3637_v46 = vmul.f32 0.044715, %v3601_v39  ;;  %v3639_v48 = vmul.f32 0.044715, %v3603_v41  ;;  %v3512_v58 = vadd.f32 %v3511_v50, %v3085_v4  ;;  %v3630_v35 = vmul.f32 0.7978846, %v3510_v14 }
 0xba2   : > { %v3642_v56 = vmul.f32 0.044715, %v3606_v49  ;;  %v3660_v57 = vmul.f32 %v3648_v42, %v3624_v51  ;;  %v3644_v61 = vmul.f32 0.044715, %v3608_v53  ;;  %v3632_v0 = vmul.f32 0.7978846, %v10805_v38 }
 0xba3   : > { %v3649_v55 = vadd.f32 1.0, %v3637_v46  ;;  %v3651_v30 = vadd.f32 1.0, %v3639_v48  ;;  %v3607_v2 = vmul.f32 %v3512_v58, %v3512_v58  ;;  %v3662_v3 = vmul.f32 %v3650_v52, %v3626_v59 }
 0xba4   : > { %v3654_v40 = vadd.f32 1.0, %v3642_v56  ;;  %v3656_v1 = vadd.f32 1.0, %v3644_v61  ;;  %v3555_v9 = vadd.f32 %v3554_v43, %v3093_v20  ;;  %9695 = vtanh.f32 %v3660_v57 }
 0xba5   : > { %v3661_v62 = vmul.f32 %v3649_v55, %v3625_v60  ;;  %v3643_v11 = vmul.f32 0.044715, %v3607_v2  ;;  %v3663_v63 = vmul.f32 %v3651_v30, %v3627_v5  ;;  %v3631_v16 = vmul.f32 0.7978846, %v3512_v58  ;;  %v9248_v5 = vld [vmem:[%s10034_s11 + $0x264] ss:$8 sps:$4 sm:$0xff]  }
 0xba6   : > { %v3666_v6 = vmul.f32 %v3654_v40, %v3630_v35  ;;  %v3668_v10 = vmul.f32 %v3656_v1, %v3632_v0  ;;  %v3609_v15 = vmul.f32 %v3555_v9, %v3555_v9  ;;  %v3633_v23 = vmul.f32 0.7978846, %v3555_v9 }
 0xba7   : > { %v3655_v19 = vadd.f32 1.0, %v3643_v11  ;;  %v3618_v49 = vmul.f32 0.5, %v3510_v14  ;;  %v3613_v50 = vmul.f32 0.5, %v10801_v25  ;;  %v3619_v53 = vmul.f32 0.5, %v3512_v58  ;;  %v9249_v11 = vld [vmem:[%s10034_s11 + $0x250] ss:$8 sps:$4 sm:$0xff]  }
 0xba8   : > { %9697 = vtanh.f32 %v3666_v6  ;;  %v3645_v4 = vmul.f32 0.044715, %v3609_v15  ;;  %v3612_v55 = vmul.f32 0.5, %v10793_v8  ;;  %v3620_v43 = vmul.f32 0.5, %v10805_v38  ;;  %v9243_v8 = vld [vmem:[%s10034_s11 + $0x270] ss:$8 sps:$4 sm:$0xff]  }
 0xba9   : > { %9699 = vtanh.f32 %v3661_v62  ;;  %v3667_v22 = vmul.f32 %v3655_v19, %v3631_v16  ;;  %v3615_v14 = vmul.f32 0.5, %v10803_v26  ;;  %v3621_v40 = vmul.f32 0.5, %v3555_v9  ;;  %v9246_v9 = vld [vmem:[%s10034_s11 + $0x260] ss:$8 sps:$4 sm:$0xff]   ;;  %v9254_v16 = vld [vmem:[%s10034_s11 + $0x244] ss:$8 sps:$4 sm:$0xff]  }
 0xbaa   : > { %9701 = vtanh.f32 %v3662_v3  ;;  %v3657_v7 = vadd.f32 1.0, %v3645_v4  ;;  %v3614_v58 = vmul.f32 0.5, %v10795_v21  ;;  %v3100_v21 = vsub.s32 5, %v10429_v32 }
 0xbab   : > { %9703 = vtanh.f32 %v3668_v10  ;;  %v9251_v10 = vld [vmem:[%s10034_s11 + $0x254] ss:$8 sps:$4 sm:$0xff]  }
 0xbac   : > { %9705 = vtanh.f32 %v3663_v63  ;;  %v3669_v24 = vmul.f32 %v3657_v7, %v3633_v23  ;;  %v3101_v63 = vrot.slane %v10783_v12, %v3100_v21  ;;  %v9257_v7 = vld [vmem:[%s10034_s11 + $0x234] ss:$8 sps:$4 sm:$0xff]  }
 0xbad   : > { %9707 = vtanh.f32 %v3667_v22  ;;  %v9252_v22 = vld [vmem:[%s10034_s11 + $0x240] ss:$8 sps:$4 sm:$0xff]  }
 0xbae   : > { %9709 = vtanh.f32 %v3669_v24 }
 0xbb1   : > { %v9696_v20 = vpop.eup %9695 }
 0xbb2   : > { %v3684_v48 = vadd.f32 1.0, %v9696_v20 }
 0xbb4   : > { %v3696_v35 = vmul.f32 %v3684_v48, %v3612_v55 }
 0xbb5   : > { %v9698_v28 = vpop.eup %9697 }
 0xbb6   : > { %v9700_v31 = vpop.eup %9699  ;;  %v3690_v39 = vadd.f32 1.0, %v9698_v28 }
 0xbb7   : > { %v9702_v36 = vpop.eup %9701  ;;  %v3685_v42 = vadd.f32 1.0, %v9700_v31 }
 0xbb8   : > { %v9704_v13 = vpop.eup %9703  ;;  %v3702_v56 = vmul.f32 %v3690_v39, %v3618_v49  ;;  %v3686_v61 = vadd.f32 1.0, %v9702_v36  ;;  %v9255_v36 = vld [vmem:[%s10034_s11 + $0x230] ss:$8 sps:$4 sm:$0xff]  }
 0xbb9   : > { %v9706_v41 = vpop.eup %9705  ;;  %v3692_v51 = vadd.f32 1.0, %v9704_v13  ;;  %v3697_v59 = vmul.f32 %v3685_v42, %v3613_v50  ;;  %v9260_v13 = vld [vmem:[%s10034_s11 + $0x224] ss:$8 sps:$4 sm:$0xff]   ;;  %v9258_v50 = vld [vmem:[%s10034_s11 + $0x220] ss:$8 sps:$4 sm:$0xff]  }
 0xbba   : > { %v9708_v46 = vpop.eup %9707  ;;  %v3687_v57 = vadd.f32 1.0, %v9706_v41  ;;  %v3708_v3 = vpack.c.bf16 %v3702_v56, %v3696_v35  ;;  %v3698_v38 = vmul.f32 %v3686_v61, %v3614_v58  ;;  %v9266_v61 = vld [vmem:[%s10034_s11 + $0x204] ss:$8 sps:$4 sm:$0xff]   ;;  %v9269_v35 = vld [vmem:[%s10034_s11 + $0x2f4] ss:$8 sps:$4 sm:$0xff]  }
 0xbbb   : > { %v3691_v52 = vadd.f32 1.0, %v9708_v46  ;;  %v9710_v60 = vpop.eup %9709  ;;  %v3704_v62 = vmul.f32 %v3692_v51, %v3620_v43  ;;  %v3097_v46 = vrot.slane %v10783_v12, %v10480_v18  ;;  %v9261_v12 = vld [vmem:[%s10034_s11 + $0x210] ss:$8 sps:$4 sm:$0xff]   ;;  %v9272_v58 = vld [vmem:[%s10034_s11 + $0x2e4] ss:$8 sps:$4 sm:$0xff]  }
 0xbbc   : > { %v3693_v25 = vadd.f32 1.0, %v9710_v60  ;;  %v3699_v1 = vmul.f32 %v3687_v57, %v3615_v14 }
 0xbbd   : > { %v3703_v30 = vmul.f32 %v3691_v52, %v3619_v53  ;;  %v3710_v26 = vpack.c.bf16 %v3704_v62, %v3698_v38  ;;  %v9263_v53 = vld [vmem:[%s10034_s11 + $0x214] ss:$8 sps:$4 sm:$0xff]  }
 0xbbe   : > { %v3705_v2 = vmul.f32 %v3693_v25, %v3621_v40  ;;  %v9267_v40 = vld [vmem:[%s10034_s11 + $0x2f0] ss:$8 sps:$4 sm:$0xff]  }
 0xbbf   : > { %v3709_v0 = vpack.c.bf16 %v3703_v30, %v3697_v59  ;;  %v9264_v59 = vld [vmem:[%s10034_s11 + $0x200] ss:$8 sps:$4 sm:$0xff]  }
 0xbc0   : > { %v3711_v6 = vpack.c.bf16 %v3705_v2, %v3699_v1  ;;  %v9270_v1 = vld [vmem:[%s10034_s11 + $0x2e0] ss:$8 sps:$4 sm:$0xff]  }
 0xbc1   : > { %4322 = vmatprep.mubr.bf16.mxu0 %v3709_v0 }
 0xbc2   : > { %4323 = vmatmul.mubr.bf16.vlgmr.msra.gmra.mxu0 %v3708_v3  ;;  %4365 = vmatprep.mubr.bf16.mxu1 %v3711_v6 }
 0xbc3   : > { %4377 = vmatpush1.bf16.msra.mxu0 %v9243_v8  ;;  %4366 = vmatmul.mubr.bf16.vlgmr.msra.gmra.mxu1 %v3710_v26 }
 0xbc4   : > { %4378 = vmatprep.subr.bf16.mxu0 %v9248_v5  ;;  %v9275_v5 = vld [vmem:[%s10034_s11 + $0x2d4] ss:$8 sps:$4 sm:$0xff]  }
 0xbc7   : > { %4379 = vmatpush1.bf16.msra.mxu0 %v9246_v9 }
 0xbc8   : > { %4380 = vmatprep.subr.bf16.mxu0 %v9251_v10 }
 0xbc9   : > { %v3591_v15 = vpop.f32.mrf.mxu1 }
 0xbca   : > { %v10843_v56 = vadd.f32 %v3591_v15, %v3097_v46  ;;  %v9278_v15 = vld [vmem:[%s10034_s11 + $0x2c4] ss:$8 sps:$4 sm:$0xff]  }
 0xbcb   : > { %v3593_v19 = vpop.f32.mrf.mxu1  ;;  %4381 = vmatpush1.bf16.msra.mxu0 %v9249_v11  ;;  %v9273_v11 = vld [vmem:[%s10034_s11 + $0x2d0] ss:$8 sps:$4 sm:$0xff]  }
 0xbcc   : > { %v3594_v4 = vadd.f32 %v3593_v19, %v3101_v63  ;;  %4382 = vmatprep.subr.bf16.mxu0 %v9254_v16  ;;  %v3604_v43 = vmul.f32 %v10843_v56, %v10843_v56  ;;  %v3628_v2 = vmul.f32 0.7978846, %v10843_v56 }
 0xbcd   : > { %v3595_v23 = vpop.f32.mrf.mxu1 }
 0xbce   : > { %v3605_v24 = vmul.f32 %v3594_v4, %v3594_v4  ;;  %v3629_v39 = vmul.f32 0.7978846, %v3594_v4  ;;  %v10840_v51 = vadd.f32 %v3595_v23, %v3097_v46  ;;  %v3640_v14 = vmul.f32 0.044715, %v3604_v43 }
 0xbcf   : > { %v3597_v20 = vpop.f32.mrf.mxu1  ;;  %4383 = vmatpush1.bf16.msra.mxu0 %v9252_v22  ;;  %v3617_v9 = vmul.f32 0.5, %v3594_v4  ;;  %v9276_v22 = vld [vmem:[%s10034_s11 + $0x2c0] ss:$8 sps:$4 sm:$0xff]   ;;  %v9281_v4 = vld [vmem:[%s10034_s11 + $0x2b4] ss:$8 sps:$4 sm:$0xff]  }
 0xbd0   : > { %v3641_v28 = vmul.f32 0.044715, %v3605_v24  ;;  %v3598_v31 = vadd.f32 %v3597_v20, %v3101_v63  ;;  %4384 = vmatprep.subr.bf16.mxu0 %v9257_v7  ;;  %v3610_v60 = vmul.f32 %v10840_v51, %v10840_v51  ;;  %v3652_v0 = vadd.f32 1.0, %v3640_v14  ;;  %v9279_v7 = vld [vmem:[%s10034_s11 + $0x2b0] ss:$8 sps:$4 sm:$0xff]  }
 0xbd1   : > { %v3634_v8 = vmul.f32 0.7978846, %v10840_v51  ;;  %v9284_v24 = vld [vmem:[%s10034_s11 + $0x2a4] ss:$8 sps:$4 sm:$0xff]   ;;  %v9282_v20 = vld [vmem:[%s10034_s11 + $0x2a0] ss:$8 sps:$4 sm:$0xff]  }
 0xbd2   : > { %v3653_v41 = vadd.f32 1.0, %v3641_v28  ;;  %v3611_v42 = vmul.f32 %v3598_v31, %v3598_v31  ;;  %v3635_v52 = vmul.f32 0.7978846, %v3598_v31  ;;  %v3646_v30 = vmul.f32 0.044715, %v3610_v60 }
 0xbd3   : > { %4385 = vmatpush1.bf16.msra.mxu0 %v9255_v36  ;;  %v3664_v26 = vmul.f32 %v3652_v0, %v3628_v2  ;;  %v3623_v10 = vmul.f32 0.5, %v3598_v31  ;;  %v9287_v28 = vld [vmem:[%s10034_s11 + $0x294] ss:$8 sps:$4 sm:$0xff]   ;;  %v3622_v46 = vmul.f32 0.5, %v10840_v51  ;;  %v4423_v14 = vld [vmem:[%s10019_s22] sm:$0x3] }
 0xbd4   : > { %v3665_v48 = vmul.f32 %v3653_v41, %v3629_v39  ;;  %v3647_v49 = vmul.f32 0.044715, %v3611_v42  ;;  %4386 = vmatprep.subr.bf16.mxu0 %v9260_v13  ;;  %v3658_v25 = vadd.f32 1.0, %v3646_v30  ;;  %v9285_v13 = vld [vmem:[%s10034_s11 + $0x290] ss:$8 sps:$4 sm:$0xff]   ;;  %v4432_v0 = vrot.slane %v4423_v14, %v10432_v33 }
 0xbd5   : > { %v9290_v41 = vld [vmem:[%s10034_s11 + $0x284] ss:$8 sps:$4 sm:$0xff]  }
 0xbd6   : > { %9711 = vtanh.f32 %v3665_v48  ;;  %v3659_v55 = vadd.f32 1.0, %v3647_v49  ;;  %v3670_v3 = vmul.f32 %v3658_v25, %v3634_v8  ;;  %v9288_v48 = vld [vmem:[%s10034_s11 + $0x280] ss:$8 sps:$4 sm:$0xff]   ;;  %v3616_v49 = vmul.f32 0.5, %v10843_v56 }
 0xbd7   : > { %4387 = vmatpush1.bf16.msra.mxu0 %v9258_v50 }
 0xbd8   : > { %v3671_v57 = vmul.f32 %v3659_v55, %v3635_v52  ;;  %4388 = vmatprep.subr.bf16.mxu0 %v9263_v53 }
 0xbda   : > { %9713 = vtanh.f32 %v3671_v57 }
 0xbdb   : > { %4389 = vmatpush1.bf16.msra.mxu0 %v9261_v12  ;;  %9715 = vtanh.f32 %v3670_v3 }
 0xbdc   : > { %4390 = vmatprep.subr.bf16.mxu0 %v9266_v61  ;;  %9717 = vtanh.f32 %v3664_v26 }
 0xbdf   : > { %4391 = vmatpush1.bf16.msra.mxu0 %v9264_v59 }
 0xbe0   : > { %4392 = vmatprep.subr.bf16.mxu0 %v9269_v35 }
 0xbe3   : > { %v9712_v62 = vpop.eup %9711  ;;  %4393 = vmatpush2.bf16.msra.mxu0 %v9267_v40 }
 0xbe4   : > { %4394 = vmatprep.subr.bf16.mxu0 %v9272_v58  ;;  %v3689_v38 = vadd.f32 1.0, %v9712_v62 }
 0xbe6   : > { %v3701_v16 = vmul.f32 %v3689_v38, %v3617_v9 }
 0xbe7   : > { %v9714_v6 = vpop.eup %9713  ;;  %4395 = vmatpush2.bf16.msra.mxu0 %v9270_v1  ;;  %v4428_v1 = vrot.slane %v4423_v14, %v10435_v34  ;;  %v9313_v14 = vld [vmem:[%s9989_s23 + $0x234] ss:$20 sps:$4 sm:$0xff]  }
 0xbe8   : > { %v3695_v63 = vadd.f32 1.0, %v9714_v6  ;;  %4396 = vmatprep.subr.bf16.mxu0 %v9275_v5  ;;  %v9716_v31 = vpop.eup %9715 }
 0xbe9   : > { %v9718_v36 = vpop.eup %9717  ;;  %v3694_v39 = vadd.f32 1.0, %v9716_v31  ;;  %v9299_v31 = vld [vmem:[%s9989_s23 + $0x2a8] ss:$20 sps:$4 sm:$0xff]  }
 0xbea   : > { %v3707_v19 = vmul.f32 %v3695_v63, %v3623_v10  ;;  %v3688_v42 = vadd.f32 1.0, %v9718_v36  ;;  %v9305_v36 = vld [vmem:[%s9989_s23 + $0x284] ss:$20 sps:$4 sm:$0xff]  }
 0xbeb   : > { %4397 = vmatpush2.bf16.msra.mxu0 %v9273_v11  ;;  %v3706_v50 = vmul.f32 %v3694_v39, %v3622_v46  ;;  %v9303_v39 = vld [vmem:[%s9989_s23 + $0x280] ss:$20 sps:$4 sm:$0xff]  }
 0xbec   : > { %v3713_v23 = vpack.c.bf16 %v3707_v19, %v3701_v16  ;;  %4398 = vmatprep.subr.bf16.mxu0 %v9278_v15  ;;  %v3700_v53 = vmul.f32 %v3688_v42, %v3616_v49  ;;  %v9307_v42 = vld [vmem:[%s9989_s23 + $0x258] ss:$20 sps:$4 sm:$0xff]  }
 0xbee   : > { %4408 = vmatprep.mubr.bf16.mxu0 %v3713_v23  ;;  %v3712_v52 = vpack.c.bf16 %v3706_v50, %v3700_v53  ;;  %v9294_v23 = vld [vmem:[%s9989_s23 + $0x308] ss:$20 sps:$4 sm:$0xff]  }
 0xbef   : > { %4399 = vmatpush2.bf16.msra.mxu0 %v9276_v22  ;;  %v9293_v22 = vld [vmem:[%s9989_s23 + $0x2fc] ss:$20 sps:$4 sm:$0xff]  }
 0xbf0   : > { %4400 = vmatprep.subr.bf16.mxu0 %v9281_v4  ;;  %v9297_v4 = vld [vmem:[%s9989_s23 + $0x2d4] ss:$20 sps:$4 sm:$0xff]   ;;  %4927 = vmatprep.subr.bf16.mxu1 %v9293_v22  ;;  %v9341_v22 = vld [vmem:[%s9989_s23 + $0x304] ss:$20 sps:$4 sm:$0xff]  }
 0xbf3   : > { %4401 = vmatpush2.bf16.msra.mxu0 %v9279_v7  ;;  %v9298_v7 = vld [vmem:[%s9989_s23 + $0x2e0] ss:$20 sps:$4 sm:$0xff]  }
 0xbf4   : > { %4402 = vmatprep.subr.bf16.mxu0 %v9284_v24  ;;  %v9295_v24 = vld [vmem:[%s9989_s23 + $0x2d0] ss:$20 sps:$4 sm:$0xff]  }
 0xbf7   : > { %4403 = vmatpush2.bf16.msra.mxu0 %v9282_v20  ;;  %v9301_v20 = vld [vmem:[%s9989_s23 + $0x2ac] ss:$20 sps:$4 sm:$0xff]  }
 0xbf8   : > { %4404 = vmatprep.subr.bf16.mxu0 %v9287_v28  ;;  %v9302_v28 = vld [vmem:[%s9989_s23 + $0x2b8] ss:$20 sps:$4 sm:$0xff]  }
 0xbfb   : > { %4405 = vmatpush2.bf16.msra.mxu0 %v9285_v13  ;;  %v9306_v13 = vld [vmem:[%s9989_s23 + $0x290] ss:$20 sps:$4 sm:$0xff]  }
 0xbfc   : > { %4406 = vmatprep.subr.bf16.mxu0 %v9290_v41  ;;  %v9309_v41 = vld [vmem:[%s9989_s23 + $0x25c] ss:$20 sps:$4 sm:$0xff]  }
 0xbff   : > { %4407 = vmatpush2.bf16.msra.mxu0 %v9288_v48 }
 0xc00   : > { %5013 = vmatprep.subr.bf16.mxu0 %v9837_v37 }
 0xc02   : > { %4409 = vmatmul.mubr.bf16.vlgmr.msra.gmra.mxu0 %v3712_v52 }
 0xc03   : > { %5014 = vmatpush1.bf16.msra.mxu0 %v9294_v23 }
 0xc04   : > { %5015 = vmatprep.subr.bf16.mxu0 %v9837_v37 }
 0xc07   : > { %5016 = vmatpush1.bf16.msra.mxu0 %v9298_v7 }
 0xc08   : > { %5017 = vmatprep.subr.bf16.mxu0 %v9837_v37 }
 0xc0b   : > { %5018 = vmatpush1.bf16.msra.mxu0 %v9302_v28 }
 0xc0c   : > { %5019 = vmatprep.subr.bf16.mxu0 %v9837_v37 }
 0xc0f   : > { %5020 = vmatpush1.bf16.msra.mxu0 %v9306_v13  ;;  %v8046_v13 = vld [vmem:[%s9984_s29 + $0x2] sm:$0x3] }
 0xc10   : > { %5021 = vmatprep.subr.bf16.mxu0 %v9837_v37 }
 0xc82   : > { %v4324_v55 = vpop.f32.mrf.mxu0 }
 0xc83   : > { %v4367_v57 = vpop.f32.mrf.mxu1 }
 0xc84   : > { %v4326_v12 = vpop.f32.mrf.mxu0  ;;  %v4368_v59 = vadd.f32 %v4367_v57, %v4324_v55 }
 0xc85   : > { %v4369_v60 = vpop.f32.mrf.mxu1 }
 0xc86   : > { %v4328_v61 = vpop.f32.mrf.mxu0  ;;  %v4370_v35 = vadd.f32 %v4369_v60, %v4326_v12 }
 0xc87   : > { %v4371_v43 = vpop.f32.mrf.mxu1 }
 0xc88   : > { %v4330_v51 = vpop.f32.mrf.mxu0  ;;  %v4372_v58 = vadd.f32 %v4371_v43, %v4328_v61 }
 0xc89   : > { %v4373_v40 = vpop.f32.mrf.mxu1 }
 0xc8a   : > { %v4374_v3 = vadd.f32 %v4373_v40, %v4330_v51  ;;  %v9311_v40 = vld [vmem:[%s9989_s23 + $0x230] ss:$20 sps:$4 sm:$0xff]  }
 0xcc2   : > { %v4410_v30 = vpop.f32.mrf.mxu0 }
 0xcc3   : > { %v4411_v56 = vadd.f32 %v4410_v30, %v4368_v59 }
 0xcc4   : > { %v4412_v25 = vpop.f32.mrf.mxu0 }
 0xcc5   : > { %v4413_v62 = vadd.f32 %v4412_v25, %v4370_v35  ;;  %v4419_v8 = vadd.f32 %v4411_v56, %v10593_v29  ;;  %v9310_v56 = vld [vmem:[%s9989_s23 + $0x268] ss:$20 sps:$4 sm:$0xff]   ;;  %v9314_v25 = vld [vmem:[%s9989_s23 + $0x240] ss:$20 sps:$4 sm:$0xff]  }
 0xcc6   : > { %v4414_v2 = vpop.f32.mrf.mxu0  ;;  %5022 = vmatpush1.bf16.msra.mxu0 %v9310_v56  ;;  %v9339_v56 = vld [vmem:[%s9989_s23 + $0x300] ss:$20 sps:$4 sm:$0xff]  }
 0xcc7   : > { %v4420_v5 = vadd.f32 %v4413_v62, %v10591_v27  ;;  %v4415_v38 = vadd.f32 %v4414_v2, %v4372_v58  ;;  %v10880_v10 = vadd.f32 %v4428_v1, %v4419_v8  ;;  %5023 = vmatprep.subr.bf16.mxu0 %v9837_v37  ;;  %v9317_v58 = vld [vmem:[%s9989_s23 + $0x20c] ss:$20 sps:$4 sm:$0xff]   ;;  %v9315_v62 = vld [vmem:[%s9989_s23 + $0x208] ss:$20 sps:$4 sm:$0xff]   ;;  %v9321_v8 = vld [vmem:[%s9989_s23 + $0x1e4] ss:$20 sps:$4 sm:$0xff]  }
 0xcc8   : > { %v4416_v6 = vpop.f32.mrf.mxu0  ;;  %v9322_v2 = vld [vmem:[%s9989_s23 + $0x1f0] ss:$20 sps:$4 sm:$0xff]  }
 0xcc9   : > { %v10878_v26 = vadd.f32 %v4432_v0, %v4420_v5  ;;  %v4417_v9 = vadd.f32 %v4416_v6, %v4374_v3  ;;  %v4421_v11 = vadd.f32 %v4415_v38, %v10600_v47  ;;  %v9325_v3 = vld [vmem:[%s9989_s23 + $0x39c] ss:$20 sps:$4 sm:$0xff]   ;;  %v9323_v5 = vld [vmem:[%s9989_s23 + $0x398] ss:$20 sps:$4 sm:$0xff]   ;;  %v9329_v6 = vld [vmem:[%s9989_s23 + $0x374] ss:$20 sps:$4 sm:$0xff]  }
 0xcca   : > { %5024 = vmatpush1.bf16.msra.mxu0 %v9314_v25  ;;  %v9326_v38 = vld [vmem:[%s9989_s23 + $0x3a8] ss:$20 sps:$4 sm:$0xff]   ;;  %v9345_v25 = vld [vmem:[%s9989_s23 + $0x2b0] ss:$20 sps:$4 sm:$0xff]  }
 0xccb   : > { %v4422_v29 = vadd.f32 %v4417_v9, %v10598_v45  ;;  %v4443_v63 = vsel %vm1732_vm3, %v10878_v26, 0.0  ;;  %v10889_v16 = vadd.f32 %v4428_v1, %v4421_v11  ;;  %v9291_v45 = vld [vmem:[%s9989_s23 + $0x2f8] ss:$20 sps:$4 sm:$0xff]   ;;  %5025 = vmatprep.subr.bf16.mxu0 %v9837_v37  ;;  %v9319_v1 = vld [vmem:[%s9989_s23 + $0x1e0] ss:$20 sps:$4 sm:$0xff]  }
 0xccc   : > { %v4444_v27 = vadd.f32 %v4443_v63, %v10880_v10  ;;  %4928 = vmatpush1.bf16.msra.mxu1 %v9291_v45  ;;  %v9327_v9 = vld [vmem:[%s9989_s23 + $0x370] ss:$20 sps:$4 sm:$0xff]   ;;  %v9330_v11 = vld [vmem:[%s9989_s23 + $0x380] ss:$20 sps:$4 sm:$0xff]   ;;  %v9331_v63 = vld [vmem:[%s9989_s23 + $0x348] ss:$20 sps:$4 sm:$0xff]  }
 0xccd   : > { %v10887_v15 = vadd.f32 %v4432_v0, %v4422_v29  ;;  %4929 = vmatprep.subr.bf16.mxu1 %v9297_v4  ;;  %v9318_v0 = vld [vmem:[%s9989_s23 + $0x218] ss:$20 sps:$4 sm:$0xff]   ;;  %v9338_v45 = vld [vmem:[%s9989_s23 + $0x330] ss:$20 sps:$4 sm:$0xff]  }
 0xcce   : > { %4445 = vadd.xlane.f32.xlu1 %v4444_v27  ;;  %5026 = vmatpush1.bf16.msra.mxu0 %v9318_v0  ;;  %v9333_v29 = vld [vmem:[%s9989_s23 + $0x34c] ss:$20 sps:$4 sm:$0xff]   ;;  %v9353_v0 = vld [vmem:[%s9989_s23 + $0x264] ss:$20 sps:$4 sm:$0xff]  }
 0xccf   : > { %v4447_v19 = vsel %vm1732_vm3, %v10887_v15, 0.0  ;;  %5027 = vmatprep.subr.bf16.mxu0 %v9837_v37  ;;  %v9334_v27 = vld [vmem:[%s9989_s23 + $0x358] ss:$20 sps:$4 sm:$0xff]  }
 0xcd0   : > { %v4448_v47 = vadd.f32 %v4447_v19, %v10889_v16  ;;  %4930 = vmatpush1.bf16.msra.mxu1 %v9295_v24  ;;  %v9337_v19 = vld [vmem:[%s9989_s23 + $0x324] ss:$20 sps:$4 sm:$0xff]  }
 0xcd1   : > { %4931 = vmatprep.subr.bf16.mxu1 %v9301_v20 }
 0xcd2   : > { %4449 = vadd.xlane.f32.xlu1 %v4448_v47  ;;  %5028 = vmatpush1.bf16.msra.mxu0 %v9322_v2  ;;  %v9335_v47 = vld [vmem:[%s9989_s23 + $0x320] ss:$20 sps:$4 sm:$0xff]   ;;  %v9354_v2 = vld [vmem:[%s9989_s23 + $0x238] ss:$20 sps:$4 sm:$0xff]  }
 0xcd3   : > { %5037 = vmatprep.subr.bf16.mxu0 %v9837_v37 }
 0xcd4   : > { %4932 = vmatpush1.bf16.msra.mxu1 %v9299_v31  ;;  %v8045_v31 = vld [vmem:[%s9979_s6 + $0x2] sm:$0x3] }
 0xcd5   : > { %4933 = vmatprep.subr.bf16.mxu1 %v9305_v36 }
 0xcd6   : > { %5038 = vmatpush2.bf16.msra.mxu0 %v9326_v38  ;;  %v9362_v38 = vld [vmem:[%s9989_s23 + $0x1ec] ss:$20 sps:$4 sm:$0xff]  }
 0xcd7   : > { %5039 = vmatprep.subr.bf16.mxu0 %v9837_v37 }
 0xcd8   : > { %4934 = vmatpush1.bf16.msra.mxu1 %v9303_v39  ;;  %v4487_v39 = vrot.slane %v8045_v31, %v10432_v33 }
 0xcd9   : > { %4935 = vmatprep.subr.bf16.mxu1 %v9309_v41 }
 0xcda   : > { %5040 = vmatpush2.bf16.msra.mxu0 %v9330_v11  ;;  %v9363_v11 = vld [vmem:[%s9989_s23 + $0x3a0] ss:$20 sps:$4 sm:$0xff]  }
 0xcdb   : > { %5041 = vmatprep.subr.bf16.mxu0 %v9837_v37 }
 0xcdc   : > { %4936 = vmatpush1.bf16.msra.mxu1 %v9307_v42  ;;  %v4483_v42 = vrot.slane %v8045_v31, %v10435_v34 }
 0xcdd   : > { %4937 = vmatprep.subr.bf16.mxu1 %v9313_v14 }
 0xcde   : > { %5042 = vmatpush2.bf16.msra.mxu0 %v9334_v27  ;;  %v9371_v27 = vld [vmem:[%s9989_s23 + $0x354] ss:$20 sps:$4 sm:$0xff]  }
 0xcdf   : > { %5043 = vmatprep.subr.bf16.mxu0 %v9837_v37 }
 0xce0   : > { %4938 = vmatpush1.bf16.msra.mxu1 %v9311_v40  ;;  %v9344_v40 = vld [vmem:[%s9989_s23 + $0x2dc] ss:$20 sps:$4 sm:$0xff]  }
 0xce1   : > { %4939 = vmatprep.subr.bf16.mxu1 %v9317_v58  ;;  %v9350_v58 = vld [vmem:[%s9989_s23 + $0x28c] ss:$20 sps:$4 sm:$0xff]  }
 0xce2   : > { %5044 = vmatpush2.bf16.msra.mxu0 %v9338_v45  ;;  %v9372_v45 = vld [vmem:[%s9989_s23 + $0x328] ss:$20 sps:$4 sm:$0xff]  }
 0xce3   : > { %8693 = vmatprep.subr.bf16.mxu0 %v9838_v17 }
 0xce4   : > { %4940 = vmatpush1.bf16.msra.mxu1 %v9315_v62  ;;  %v9348_v62 = vld [vmem:[%s9989_s23 + $0x288] ss:$20 sps:$4 sm:$0xff]  }
 0xce5   : > { %4941 = vmatprep.subr.bf16.mxu1 %v9321_v8  ;;  %v9351_v8 = vld [vmem:[%s9989_s23 + $0x260] ss:$20 sps:$4 sm:$0xff]  }
 0xce8   : > { %4942 = vmatpush1.bf16.msra.mxu1 %v9319_v1  ;;  %v9356_v1 = vld [vmem:[%s9989_s23 + $0x23c] ss:$20 sps:$4 sm:$0xff]  }
 0xce9   : > { %4951 = vmatprep.subr.bf16.mxu1 %v9325_v3  ;;  %v9359_v3 = vld [vmem:[%s9989_s23 + $0x214] ss:$20 sps:$4 sm:$0xff]  }
 0xcec   : > { %4952 = vmatpush2.bf16.msra.mxu1 %v9323_v5  ;;  %v9357_v5 = vld [vmem:[%s9989_s23 + $0x210] ss:$20 sps:$4 sm:$0xff]  }
 0xced   : > { %4953 = vmatprep.subr.bf16.mxu1 %v9329_v6  ;;  %v9360_v6 = vld [vmem:[%s9989_s23 + $0x1e8] ss:$20 sps:$4 sm:$0xff]  }
 0xcf0   : > { %4954 = vmatpush2.bf16.msra.mxu1 %v9327_v9  ;;  %v9365_v9 = vld [vmem:[%s9989_s23 + $0x3a4] ss:$20 sps:$4 sm:$0xff]  }
 0xcf1   : > { %4955 = vmatprep.subr.bf16.mxu1 %v9333_v29  ;;  %v9368_v29 = vld [vmem:[%s9989_s23 + $0x37c] ss:$20 sps:$4 sm:$0xff]  }
 0xcf4   : > { %4956 = vmatpush2.bf16.msra.mxu1 %v9331_v63  ;;  %v9366_v63 = vld [vmem:[%s9989_s23 + $0x378] ss:$20 sps:$4 sm:$0xff]  }
 0xcf5   : > { %4957 = vmatprep.subr.bf16.mxu1 %v9337_v19  ;;  %v9369_v19 = vld [vmem:[%s9989_s23 + $0x350] ss:$20 sps:$4 sm:$0xff]  }
 0xcf8   : > { %4958 = vmatpush2.bf16.msra.mxu1 %v9335_v47  ;;  %v9374_v47 = vld [vmem:[%s9989_s23 + $0x32c] ss:$20 sps:$4 sm:$0xff]  }
 0xcf9   : > { %4970 = vmatprep.subr.bf16.mxu1 %v9341_v22  ;;  %v8119_v22 = vld [vmem:[%s9999_s2 + $0x5] sm:$0x1f] }
 0xd57   : > { %v4446_v46 = vpop.xlane.xlu1 %4445 }
 0xd58   : > { %v4451_v48 = vmul.f32 0.0052083335, %v4446_v46 }
 0xd5a   : > { %v10913_v49 = vsub.f32 %v10880_v10, %v4451_v48  ;;  %v10916_v50 = vsub.f32 %v10878_v26, %v4451_v48  ;;  %v4502_v48 = vrot.slane %v8046_v13, %v10432_v33 }
 0xd5b   : > { %v4450_v53 = vpop.xlane.xlu1 %4449 }
 0xd5c   : > { %v4452_v52 = vmul.f32 0.0052083335, %v4450_v53  ;;  %v4457_v55 = vmul.f32 %v10913_v49, %v10913_v49  ;;  %v4458_v57 = vmul.f32 %v10916_v50, %v10916_v50  ;;  %v4498_v53 = vrot.slane %v8046_v13, %v10435_v34 }
 0xd5e   : > { %v10923_v12 = vsub.f32 %v10889_v16, %v4452_v52  ;;  %v10926_v60 = vsub.f32 %v10887_v15, %v4452_v52  ;;  %v4461_v61 = vsel %vm1732_vm3, %v4458_v57, 0.0 }
 0xd5f   : > { %v4462_v43 = vadd.f32 %v4461_v61, %v4457_v55 }
 0xd60   : > { %v4459_v51 = vmul.f32 %v10923_v12, %v10923_v12  ;;  %v4460_v59 = vmul.f32 %v10926_v60, %v10926_v60 }
 0xd61   : > { %4463 = vadd.xlane.f32.xlu0 %v4462_v43 }
 0xd62   : > { %v4465_v30 = vsel %vm1732_vm3, %v4460_v59, 0.0 }
 0xd63   : > { %v4466_v35 = vadd.f32 %v4465_v30, %v4459_v51 }
 0xd65   : > { %4467 = vadd.xlane.f32.xlu1 %v4466_v35 }
 0xdea   : > { %v4464_v23 = vpop.xlane.xlu0 %4463 }
 0xdeb   : > { %v4469_v4 = vmul.f32 0.0052083335, %v4464_v23 }
 0xded   : > { %v4471_v7 = vadd.f32 1e-12, %v4469_v4 }
 0xdee   : > { %v4468_v24 = vpop.xlane.xlu1 %4467 }
 0xdef   : > { %9719 = vrsqrt.f32 %v4471_v7  ;;  %v4470_v20 = vmul.f32 0.0052083335, %v4468_v24  ;;  %v4606_v7 = vrot.slane %v8119_v22, %v10480_v18 }
 0xdf1   : > { %v4472_v28 = vadd.f32 1e-12, %v4470_v20 }
 0xdf3   : > { %9721 = vrsqrt.f32 %v4472_v28  ;;  %v4594_v28 = vrot.slane %v8119_v22, %v10432_v33 }
 0xdfc   : > { %v9720_v36 = vpop.eup %9719 }
 0xdfd   : > { %v4476_v37 = vmul.f32 %v9720_v36, %v10916_v50  ;;  %v4475_v41 = vmul.f32 %v9720_v36, %v10913_v49 }
 0xdff   : > { %v4491_v55 = vmul.f32 %v4487_v39, %v4476_v37  ;;  %v4490_v61 = vmul.f32 %v4483_v42, %v4475_v41 }
 0xe00   : > { %v9722_v46 = vpop.eup %9721 }
 0xe01   : > { %v4478_v52 = vmul.f32 %v9722_v46, %v10926_v60  ;;  %v4477_v57 = vmul.f32 %v9722_v46, %v10923_v12  ;;  %v4506_v51 = vadd.f32 %v4502_v48, %v4491_v55  ;;  %v4505_v59 = vadd.f32 %v4498_v53, %v4490_v61  ;;  %v9342_v12 = vld [vmem:[%s9989_s23 + $0x2d8] ss:$20 sps:$4 sm:$0xff]   ;;  %v9347_v60 = vld [vmem:[%s9989_s23 + $0x2b4] ss:$20 sps:$4 sm:$0xff]  }
 0xe03   : > { %v4493_v50 = vmul.f32 %v4487_v39, %v4478_v52  ;;  %v4492_v43 = vmul.f32 %v4483_v42, %v4477_v57  ;;  %v4590_v42 = vrot.slane %v8119_v22, %v10435_v34 }
 0xe05   : > { %v4508_v49 = vadd.f32 %v4502_v48, %v4493_v50  ;;  %v4507_v30 = vadd.f32 %v4498_v53, %v4492_v43  ;;  %v4598_v43 = vrot.slane %v8119_v22, %v10498_v44 }
 0xe07   : > { %v4510_v35 = vpack.c.bf16 %v4508_v49, %v4506_v51  ;;  %v4509_v14 = vpack.c.bf16 %v4507_v30, %v4505_v59 }
 0xe09   : > { %8180 = vmatprep.mubr.msk.bf16.mxu1 %vm1732_vm3, %v4510_v35  ;;  %8182 = vmatprep.mubr.msk.bf16.mxu0 %vm1732_vm3, %v4510_v35 }
 0xe0a   : > { %4960 = vmatmul.mubr.bf16.vlgmr.msra.gmra.mxu1 %v4509_v14  ;;  %5046 = vmatmul.mubr.bf16.vlgmr.msra.gmra.mxu0 %v4509_v14 }
 0xe0b   : > { %4971 = vmatpush1.bf16.msra.mxu1 %v9339_v56  ;;  %8181 = vmatprep.mubr.msk.bf16.mxu1 %vm1732_vm3, %v4510_v35 }
 0xe0c   : > { %4972 = vmatprep.subr.bf16.mxu1 %v9344_v40  ;;  %8695 = vmatprep.mubr.msk.bf16.mxu0 %vm9839_vm4, %v9838_v17 }
 0xe0f   : > { %4973 = vmatpush1.bf16.msra.mxu1 %v9342_v12 }
 0xe10   : > { %4974 = vmatprep.subr.bf16.mxu1 %v9347_v60  ;;  %v4602_v60 = vrot.slane %v8119_v22, %v10506_v54 }
 0xe13   : > { %4975 = vmatpush1.bf16.msra.mxu1 %v9345_v25 }
 0xe14   : > { %4976 = vmatprep.subr.bf16.mxu1 %v9350_v58 }
 0xe17   : > { %4977 = vmatpush1.bf16.msra.mxu1 %v9348_v62 }
 0xe18   : > { %4978 = vmatprep.subr.bf16.mxu1 %v9353_v0 }
 0xe1b   : > { %4979 = vmatpush1.bf16.msra.mxu1 %v9351_v8 }
 0xe1c   : > { %4980 = vmatprep.subr.bf16.mxu1 %v9356_v1 }
 0xe1f   : > { %4981 = vmatpush1.bf16.msra.mxu1 %v9354_v2 }
 0xe20   : > { %4982 = vmatprep.subr.bf16.mxu1 %v9359_v3 }
 0xe23   : > { %4983 = vmatpush1.bf16.msra.mxu1 %v9357_v5 }
 0xe24   : > { %4984 = vmatprep.subr.bf16.mxu1 %v9362_v38 }
 0xe27   : > { %4985 = vmatpush1.bf16.msra.mxu1 %v9360_v6 }
 0xe28   : > { %4994 = vmatprep.subr.bf16.mxu1 %v9365_v9 }
 0xe2b   : > { %4995 = vmatpush2.bf16.msra.mxu1 %v9363_v11 }
 0xe2c   : > { %4996 = vmatprep.subr.bf16.mxu1 %v9368_v29 }
 0xe2f   : > { %4997 = vmatpush2.bf16.msra.mxu1 %v9366_v63  ;;  %v9779_v63 = vld [vmem:[%s11566_s0] sm:$0xff] }
 0xe30   : > { %4998 = vmatprep.subr.bf16.mxu1 %v9371_v27 }
 0xe33   : > { %4999 = vmatpush2.bf16.msra.mxu1 %v9369_v19 }
 0xe34   : > { %5000 = vmatprep.subr.bf16.mxu1 %v9374_v47 }
 0xe37   : > { %5001 = vmatpush2.bf16.msra.mxu1 %v9372_v45 }
 0xe38   : > { %8681 = vmatprep.subr.bf16.mxu1 %v9838_v17 }
 0xe3a   : > { %5003 = vmatmul.mubr.bf16.vlgmr.msra.gmra.mxu1 %v4509_v14 }
 0xe3b   : > { %8683 = vmatprep.mubr.msk.bf16.mxu1 %vm9839_vm4, %v9838_v17 }
 0xeca   : > { %v4961_v23 = vpop.f32.mrf.mxu1  ;;  %v5047_v4 = vpop.f32.mrf.mxu0 }
 0xecb   : > { %v11009_v13 = vadd.f32 %v5047_v4, %v4606_v7  ;;  %v4962_v57 = vadd.f32 %v4961_v23, %v4590_v42 }
 0xecc   : > { %v4963_v24 = vpop.f32.mrf.mxu1  ;;  %v5049_v20 = vpop.f32.mrf.mxu0 }
 0xecd   : > { %v4964_v46 = vadd.f32 %v4963_v24, %v4594_v28 }
 0xece   : > { %v4965_v31 = vpop.f32.mrf.mxu1  ;;  %v5050_v36 = vpop.f32.mrf.mxu0 }
 0xecf   : > { %v11011_v37 = vadd.f32 %v5050_v36, %v4606_v7  ;;  %v4966_v52 = vadd.f32 %v4965_v31, %v4590_v42  ;;  %v9780_v7 = vld [vmem:[%s11566_s0 + $0x8] sm:$0xff] }
 0xed0   : > { %v4967_v39 = vpop.f32.mrf.mxu1  ;;  %v5052_v41 = vpop.f32.mrf.mxu0 }
 0xed1   : > { %v5331_v48 = vpack.c.bf16 %v11011_v37, %v11009_v13  ;;  %v4968_v53 = vadd.f32 %v4967_v39, %v4594_v28  ;;  %v5081_v61 = vpack.c.bf16 %v4966_v52, %v4962_v57  ;;  %v9375_v13 = vld [vmem:[%s10009_s5 + $0x130] ss:$8 sps:$4 sm:$0xff]   ;;  %v9377_v37 = vld [vmem:[%s10009_s5 + $0x134] ss:$8 sps:$4 sm:$0xff]  }
 0xed3   : > { %v5082_v55 = vpack.c.bf16 %v4968_v53, %v4964_v46 }
 0xed5   : > { %5085 = vrot.lane.b32.xlu1 %v5082_v55, %s9840_s20 }
 0xed9   : > { %5207 = vrot.lane.b32.xlu1 %v5081_v61, %s9840_s20 }
 0xefa   : > { %v5004_v50 = vpop.f32.mrf.mxu1 }
 0xefb   : > { %v5005_v59 = vadd.f32 %v5004_v50, %v4598_v43 }
 0xefc   : > { %v5006_v51 = vpop.f32.mrf.mxu1 }
 0xefd   : > { %v5007_v62 = vadd.f32 %v5006_v51, %v4602_v60 }
 0xefe   : > { %v5008_v49 = vpop.f32.mrf.mxu1 }
 0xeff   : > { %v5009_v30 = vadd.f32 %v5008_v49, %v4598_v43 }
 0xf00   : > { %v5010_v40 = vpop.f32.mrf.mxu1 }
 0xf01   : > { %v5205_v35 = vpack.c.bf16 %v5009_v30, %v5005_v59  ;;  %v5011_v25 = vadd.f32 %v5010_v40, %v4602_v60 }
 0xf03   : > { %5333 = vrot.lane.b32.xlu1 %v5205_v35, %s9840_s20  ;;  %v5213_v56 = vsel %vm1732_vm3, %v5205_v35, 0  ;;  %v11028_v0 = vpack.c.bf16 %v5011_v25, %v5007_v62 }
 0xf04   : > { %8694 = vmatpush3.bf16.xpose.msra.mxu0 %v5213_v56 }
 0xf05   : > { %8705 = vmatprep.subr.bf16.mxu0 %v9838_v17 }
 0xf47   : > { %v5086_v14 = vpop.permute.xlu1 %5085 }
 0xf48   : > { %v5091_v12 = vsel %vm1732_vm3, %v5086_v14, 0 }
 0xf49   : > { %8682 = vmatpush3.bf16.xpose.msra.mxu1 %v5091_v12 }
 0xf4a   : > { %8687 = vmatprep.subr.bf16.mxu1 %v9838_v17 }
 0xf4b   : > { %v5208_v58 = vpop.permute.xlu1 %5207 }
 0xf4c   : > { %8696 = vmatmul.mubr.msk.bf16.vlgmr.msra.gmra.mxu0 %vm1732_vm3, %v5208_v58 }
 0xf4d   : > { %8707 = vmatprep.mubr.msk.bf16.mxu0 %vm9839_vm4, %v9838_v17 }
 0xf50   : > { %8684 = vmatmul.mubr.msk.bf16.vlgmr.msra.gmra.mxu1 %vm1732_vm3, %v5081_v61 }
 0xf51   : > { %8688 = vmatpush3.bf16.msra.mxu1 %v11028_v0  ;;  %8689 = vmatprep.mubr.msk.bf16.mxu1 %vm9839_vm4, %v9838_v17 }
 0xf52   : > { %8699 = vmatprep.subr.bf16.mxu1 %v9838_v17 }
 0xf75   : > { %v5334_v8 = vpop.permute.xlu1 %5333 }
 0xf76   : > { %v5339_v1 = vsel %vm1732_vm3, %v5334_v8, 0 }
 0xf77   : > { %8706 = vmatpush3.bf16.xpose.msra.mxu0 %v5339_v1 }
 0xf78   : > { %5599 = vmatprep.subr.bf16.mxu0 %v9377_v37 }
 0xf7e   : > { %8708 = vmatmul.mubr.msk.bf16.vlgmr.msra.gmra.mxu0 %vm1732_vm3, %v5082_v55 }
 0xf7f   : > { %5600 = vmatpush1.bf16.msra.mxu0 %v9375_v13 }
0x100c   : > { %v5249_v2 = vpop.f32.mrf.mxu0 }
0x100d   : > { %v5256_v6 = vmul.f32 0.125, %v5249_v2 }
0x100e   : > { %v8697_v3 = vpop.f32.mrf.mxu0 }
0x100f   : > { %v5258_v23 = vadd.f32 %v9779_v63, %v5256_v6 }
0x1010   : > { %v5127_v5 = vpop.f32.mrf.mxu1  ;;  %v5252_v38 = vpop.f32.mrf.mxu0 }
0x1011   : > { %v5134_v9 = vmul.f32 0.125, %v5127_v5  ;;  %v5257_v47 = vmul.f32 0.125, %v5252_v38  ;;  %v5260_v20 = vsel %vm2425_vm5, %v5258_v23, -inf }
0x1012   : > { %v8685_v11 = vpop.f32.mrf.mxu1  ;;  %v8698_v29 = vpop.f32.mrf.mxu0 }
0x1013   : > { %v5136_v27 = vadd.f32 %v9779_v63, %v5134_v9  ;;  %v5259_v31 = vadd.f32 %v9780_v7, %v5257_v47 }
0x1014   : > { %v5130_v19 = vpop.f32.mrf.mxu1 }
0x1015   : > { %v5135_v45 = vmul.f32 0.125, %v5130_v19  ;;  %v5138_v22 = vsel %vm2425_vm5, %v5136_v27, -inf  ;;  %v5263_v36 = vsel %vm2425_vm5, %v5259_v31, -inf }
0x1016   : > { %5139 = vmax.xlane.f32.xlu0 %v5138_v22  ;;  %v8686_v4 = vpop.f32.mrf.mxu1 }
0x1017   : > { %v5137_v24 = vadd.f32 %v9780_v7, %v5135_v45 }
0x1019   : > { %v5141_v28 = vsel %vm2425_vm5, %v5137_v24, -inf }
0x101a   : > { %5261 = vmax.xlane.f32.xlu0 %v5260_v20  ;;  %5142 = vmax.xlane.f32.xlu1 %v5141_v28 }
0x101e   : > { %5264 = vmax.xlane.f32.xlu0 %v5263_v36 }
0x103e   : > { %v5375_v39 = vpop.f32.mrf.mxu0 }
0x103f   : > { %v5382_v41 = vmul.f32 0.125, %v5375_v39 }
0x1040   : > { %v8709_v42 = vpop.f32.mrf.mxu0 }
0x1041   : > { %v5384_v46 = vadd.f32 %v9779_v63, %v5382_v41 }
0x1042   : > { %v5378_v53 = vpop.f32.mrf.mxu0 }
0x1043   : > { %v5383_v52 = vmul.f32 0.125, %v5378_v53  ;;  %v5386_v55 = vsel %vm2425_vm5, %v5384_v46, -inf }
0x1044   : > { %v8710_v57 = vpop.f32.mrf.mxu0  ;;  %5387 = vmax.xlane.f32.xlu0 %v5386_v55 }
0x1045   : > { %v5385_v61 = vadd.f32 %v9780_v7, %v5383_v52 }
0x1047   : > { %v5389_v50 = vsel %vm2425_vm5, %v5385_v61, -inf }
0x1048   : > { %5390 = vmax.xlane.f32.xlu0 %v5389_v50 }
0x109f   : > { %v5140_v43 = vpop.xlane.xlu0 %5139 }
0x10a0   : > { %v5144_v51 = vsub.f32 %v5136_v27, %v5140_v43 }
0x10a2   : > { %v5146_v35 = vmul.f32 1.442695, %v5144_v51 }
0x10a3   : > { %v5262_v49 = vpop.xlane.xlu0 %5261  ;;  %v5143_v59 = vpop.xlane.xlu1 %5142 }
0x10a4   : > { %v5266_v30 = vsub.f32 %v5258_v23, %v5262_v49  ;;  %v5145_v14 = vsub.f32 %v5137_v24, %v5143_v59  ;;  %v9383_v59 = vld [vmem:[%s10009_s5 + $0x114] ss:$8 sps:$4 sm:$0xff]  }
0x10a6   : > { %v5268_v56 = vmul.f32 1.442695, %v5266_v30  ;;  %v5148_v12 = vmul.f32 1.442695, %v5145_v14  ;;  %v9381_v30 = vld [vmem:[%s10009_s5 + $0x110] ss:$8 sps:$4 sm:$0xff]  }
0x10a7   : > { %v5265_v40 = vpop.xlane.xlu0 %5264  ;;  %v9389_v14 = vld [vmem:[%s10009_s5 + $0xf4] ss:$8 sps:$4 sm:$0xff]  }
0x10a8   : > { %9723 = vpow2.f32 %v5268_v56  ;;  %v5267_v60 = vsub.f32 %v5259_v31, %v5265_v40  ;;  %v9384_v56 = vld [vmem:[%s10009_s5 + $0x100] ss:$8 sps:$4 sm:$0xff]   ;;  %v9387_v40 = vld [vmem:[%s10009_s5 + $0xf0] ss:$8 sps:$4 sm:$0xff]  }
0x10a9   : > { %9725 = vpow2.f32 %v5146_v35  ;;  %v9386_v35 = vld [vmem:[%s10009_s5 + $0x104] ss:$8 sps:$4 sm:$0xff]  }
0x10aa   : > { %9727 = vpow2.f32 %v5148_v12  ;;  %v5270_v25 = vmul.f32 1.442695, %v5267_v60  ;;  %v9392_v12 = vld [vmem:[%s10009_s5 + $0xe4] ss:$8 sps:$4 sm:$0xff]   ;;  %v9390_v60 = vld [vmem:[%s10009_s5 + $0xe0] ss:$8 sps:$4 sm:$0xff]  }
0x10ac   : > { %9729 = vpow2.f32 %v5270_v25  ;;  %v9395_v25 = vld [vmem:[%s10009_s5 + $0xd4] ss:$8 sps:$4 sm:$0xff]  }
0x10b5   : > { %v9724_v58 = vpop.eup %9723 }
0x10b6   : > { %v5272_v62 = vsel %vm2425_vm5, %v9724_v58, 0.0  ;;  %v9726_v8 = vpop.eup %9725 }
0x10b7   : > { %5273 = vadd.xlane.f32.xlu0 %v5272_v62  ;;  %v5150_v1 = vsel %vm2425_vm5, %v9726_v8, 0.0  ;;  %v9728_v2 = vpop.eup %9727  ;;  %v9398_v62 = vld [vmem:[%s10009_s5 + $0xc4] ss:$8 sps:$4 sm:$0xff]  }
0x10b8   : > { %v5153_v3 = vsel %vm2425_vm5, %v9728_v2, 0.0 }
0x10b9   : > { %v9730_v5 = vpop.eup %9729 }
0x10ba   : > { %v5275_v38 = vsel %vm2425_vm5, %v9730_v5, 0.0 }
0x10bb   : > { %5151 = vadd.xlane.f32.xlu0 %v5150_v1  ;;  %v9401_v1 = vld [vmem:[%s10009_s5 + $0x174] ss:$8 sps:$4 sm:$0xff]  }
0x10bf   : > { %5154 = vadd.xlane.f32.xlu0 %v5153_v3  ;;  %v9404_v3 = vld [vmem:[%s10009_s5 + $0x164] ss:$8 sps:$4 sm:$0xff]  }
0x10c3   : > { %5276 = vadd.xlane.f32.xlu0 %v5275_v38  ;;  %v9407_v38 = vld [vmem:[%s10009_s5 + $0x154] ss:$8 sps:$4 sm:$0xff]  }
0x10cd   : > { %v5388_v6 = vpop.xlane.xlu0 %5387 }
0x10ce   : > { %v5392_v9 = vsub.f32 %v5384_v46, %v5388_v6  ;;  %v9405_v6 = vld [vmem:[%s10009_s5 + $0x150] ss:$8 sps:$4 sm:$0xff]  }
0x10d0   : > { %v5394_v11 = vmul.f32 1.442695, %v5392_v9 }
0x10d1   : > { %v5391_v29 = vpop.xlane.xlu0 %5390 }
0x10d2   : > { %9731 = vpow2.f32 %v5394_v11  ;;  %v5393_v63 = vsub.f32 %v5385_v61, %v5391_v29  ;;  %v9410_v29 = vld [vmem:[%s10009_s5 + $0x144] ss:$8 sps:$4 sm:$0xff]  }
0x10d4   : > { %v5396_v27 = vmul.f32 1.442695, %v5393_v63 }
0x10d6   : > { %9733 = vpow2.f32 %v5396_v27  ;;  %v9408_v27 = vld [vmem:[%s10009_s5 + $0x140] ss:$8 sps:$4 sm:$0xff]  }
0x10d9   : > { %5284 = vrot.lane.b32.xlu0 %v11028_v0, %s9840_s20 }
0x10df   : > { %v9732_v19 = vpop.eup %9731 }
0x10e0   : > { %v5398_v47 = vsel %vm2425_vm5, %v9732_v19, 0.0 }
0x10e1   : > { %5399 = vadd.xlane.f32.xlu1 %v5398_v47 }
0x10e3   : > { %v9734_v45 = vpop.eup %9733 }
0x10e4   : > { %v5401_v22 = vsel %vm2425_vm5, %v9734_v45, 0.0 }
0x10e5   : > { %5402 = vadd.xlane.f32.xlu1 %v5401_v22 }
0x1140   : > { %v5274_v23 = vpop.xlane.xlu0 %5273 }
0x1144   : > { %v5152_v4 = vpop.xlane.xlu0 %5151 }
0x1145   : > { %9735 = vrcp.f32 %v5152_v4 }
0x1148   : > { %v5155_v7 = vpop.xlane.xlu0 %5154 }
0x1149   : > { %9737 = vrcp.f32 %v5155_v7 }
0x114c   : > { %v5277_v24 = vpop.xlane.xlu0 %5276 }
0x114d   : > { %9739 = vrcp.f32 %v5277_v24 }
0x114e   : > { %9741 = vrcp.f32 %v5274_v23 }
0x1150   : > { %v5285_v41 = vpop.permute.xlu0 %5284 }
0x1152   : > { %v9736_v20 = vpop.eup %9735 }
0x1153   : > { %v5158_v31 = vmul.f32 %v9736_v20, %v9726_v8  ;;  %v9396_v8 = vld [vmem:[%s10009_s5 + $0xc0] ss:$8 sps:$4 sm:$0xff]  }
0x1156   : > { %v9738_v28 = vpop.eup %9737 }
0x1157   : > { %v5159_v0 = vmul.f32 %v9738_v28, %v9728_v2  ;;  %v9399_v2 = vld [vmem:[%s10009_s5 + $0x170] ss:$8 sps:$4 sm:$0xff]  }
0x1159   : > { %v5160_v36 = vpack.c.bf16 %v5159_v0, %v5158_v31 }
0x115a   : > { %v9740_v39 = vpop.eup %9739 }
0x115b   : > { %8690 = vmatmul.mubr.msk.bf16.vlgmr.msra.gmra.mxu1 %vm2425_vm5, %v5160_v36  ;;  %v9742_v42 = vpop.eup %9741  ;;  %v5281_v46 = vmul.f32 %v9740_v39, %v9730_v5  ;;  %v9402_v5 = vld [vmem:[%s10009_s5 + $0x160] ss:$8 sps:$4 sm:$0xff]  }
0x115c   : > { %8700 = vmatpush3.bf16.msra.mxu1 %v5285_v41  ;;  %8701 = vmatprep.mubr.msk.bf16.mxu1 %vm9839_vm4, %v9838_v17  ;;  %v5280_v53 = vmul.f32 %v9742_v42, %v9724_v58  ;;  %v9393_v58 = vld [vmem:[%s10009_s5 + $0xd0] ss:$8 sps:$4 sm:$0xff]  }
0x115d   : > { %8711 = vmatprep.subr.bf16.mxu1 %v9838_v17 }
0x115e   : > { %v5282_v52 = vpack.c.bf16 %v5281_v46, %v5280_v53  ;;  %v8207_v53 = vld [vmem:[%s9994_s21 + $0x2] sm:$0x3] }
0x1163   : > { %8702 = vmatmul.mubr.msk.bf16.vlgmr.msra.gmra.mxu1 %vm2425_vm5, %v5282_v52  ;;  %v5469_v52 = vrot.slane %v8207_v53, %v10435_v34 }
0x1164   : > { %8712 = vmatpush3.bf16.msra.mxu1 %v5331_v48  ;;  %8713 = vmatprep.mubr.msk.bf16.mxu1 %vm9839_vm4, %v9838_v17  ;;  %v9380_v17 = vld [vmem:[%s10009_s5 + $0x124] ss:$8 sps:$4 sm:$0xff]   ;;  %v9378_v48 = vld [vmem:[%s10009_s5 + $0x120] ss:$8 sps:$4 sm:$0xff]   ;;  %s11569_s5 = sld [smem:[#allocation20_spill]] (!%p8582_p5) }
0x1165   : > { %5601 = vmatprep.subr.bf16.mxu0 %v9380_v17 }
0x1166   : > { %5602 = vmatpush1.bf16.msra.mxu0 %v9378_v48 }
0x1167   : > { %5603 = vmatprep.subr.bf16.mxu0 %v9383_v59 }
0x116a   : > { %v5400_v55 = vpop.xlane.xlu1 %5399  ;;  %5604 = vmatpush1.bf16.msra.mxu0 %v9381_v30 }
0x116b   : > { %9743 = vrcp.f32 %v5400_v55  ;;  %5605 = vmatprep.subr.bf16.mxu0 %v9386_v35  ;;  %v5473_v55 = vrot.slane %v8207_v53, %v10432_v33  ;;  %v9446_v53 = vld [vmem:[%s10024_s8 + $0x2ac] ss:$24 sps:$4 sm:$0xff]  }
0x116e   : > { %v5403_v57 = vpop.xlane.xlu1 %5402  ;;  %5606 = vmatpush1.bf16.msra.mxu0 %v9384_v56 }
0x116f   : > { %9745 = vrcp.f32 %v5403_v57  ;;  %5607 = vmatprep.subr.bf16.mxu0 %v9389_v14  ;;  %v9411_v14 = vld [vmem:[%s10024_s8 + $0x390] ss:$24 sps:$4 sm:$0xff]  }
0x1172   : > { %5608 = vmatpush1.bf16.msra.mxu0 %v9387_v40  ;;  %v9413_v40 = vld [vmem:[%s10024_s8 + $0x394] ss:$24 sps:$4 sm:$0xff]  }
0x1173   : > { %5609 = vmatprep.subr.bf16.mxu0 %v9392_v12  ;;  %v9414_v12 = vld [vmem:[%s10024_s8 + $0x398] ss:$24 sps:$4 sm:$0xff]   ;;  %6187 = vmatprep.subr.bf16.mxu1 %v9413_v40 }
0x1174   : > { %v9465_v40 = vld [vmem:[%s10024_s8 + $0x420] ss:$24 sps:$4 sm:$0xff]  }
0x1176   : > { %5610 = vmatpush1.bf16.msra.mxu0 %v9390_v60  ;;  %v9416_v60 = vld [vmem:[%s10024_s8 + $0x39c] ss:$24 sps:$4 sm:$0xff]  }
0x1177   : > { %5611 = vmatprep.subr.bf16.mxu0 %v9395_v25  ;;  %v9417_v25 = vld [vmem:[%s10024_s8 + $0x360] ss:$24 sps:$4 sm:$0xff]  }
0x1178   : > { %v9744_v61 = vpop.eup %9743 }
0x1179   : > { %v5406_v43 = vmul.f32 %v9744_v61, %v9732_v19 }
0x117a   : > { %5612 = vmatpush1.bf16.msra.mxu0 %v9393_v58  ;;  %v9420_v58 = vld [vmem:[%s10024_s8 + $0x368] ss:$24 sps:$4 sm:$0xff]  }
0x117b   : > { %5613 = vmatprep.subr.bf16.mxu0 %v9398_v62  ;;  %v9425_v62 = vld [vmem:[%s10024_s8 + $0x334] ss:$24 sps:$4 sm:$0xff]  }
0x117c   : > { %v9746_v50 = vpop.eup %9745 }
0x117d   : > { %v5407_v51 = vmul.f32 %v9746_v50, %v9734_v45 }
0x117e   : > { %5614 = vmatpush1.bf16.msra.mxu0 %v9396_v8  ;;  %v9428_v8 = vld [vmem:[%s10024_s8 + $0x33c] ss:$24 sps:$4 sm:$0xff]  }
0x117f   : > { %v5408_v49 = vpack.c.bf16 %v5407_v51, %v5406_v43  ;;  %5623 = vmatprep.subr.bf16.mxu0 %v9401_v1  ;;  %v9423_v1 = vld [vmem:[%s10024_s8 + $0x330] ss:$24 sps:$4 sm:$0xff]  }
0x1181   : > { %8714 = vmatmul.mubr.msk.bf16.vlgmr.msra.gmra.mxu1 %vm2425_vm5, %v5408_v49 }
0x1182   : > { %5624 = vmatpush2.bf16.msra.mxu0 %v9399_v2  ;;  %6188 = vmatpush1.bf16.msra.mxu1 %v9411_v14  ;;  %v9426_v2 = vld [vmem:[%s10024_s8 + $0x338] ss:$24 sps:$4 sm:$0xff]   ;;  %v9470_v14 = vld [vmem:[%s10024_s8 + $0x42c] ss:$24 sps:$4 sm:$0xff]  }
0x1183   : > { %5625 = vmatprep.subr.bf16.mxu0 %v9404_v3  ;;  %v9431_v3 = vld [vmem:[%s10024_s8 + $0x304] ss:$24 sps:$4 sm:$0xff]  }
0x1186   : > { %5626 = vmatpush2.bf16.msra.mxu0 %v9402_v5  ;;  %v9434_v5 = vld [vmem:[%s10024_s8 + $0x30c] ss:$24 sps:$4 sm:$0xff]  }
0x1187   : > { %5627 = vmatprep.subr.bf16.mxu0 %v9407_v38  ;;  %v9429_v38 = vld [vmem:[%s10024_s8 + $0x300] ss:$24 sps:$4 sm:$0xff]  }
0x118a   : > { %5628 = vmatpush2.bf16.msra.mxu0 %v9405_v6  ;;  %v9432_v6 = vld [vmem:[%s10024_s8 + $0x308] ss:$24 sps:$4 sm:$0xff]  }
0x118b   : > { %5629 = vmatprep.subr.bf16.mxu0 %v9410_v29  ;;  %v9435_v29 = vld [vmem:[%s10024_s8 + $0x2d0] ss:$24 sps:$4 sm:$0xff]  }
0x118e   : > { %5630 = vmatpush2.bf16.msra.mxu0 %v9408_v27 }
0x118f   : > { %6230 = vmatprep.subr.bf16.mxu0 %v9416_v60  ;;  %v9473_v60 = vld [vmem:[%s10024_s8 + $0x3f4] ss:$24 sps:$4 sm:$0xff]  }
0x121b   : > { %v5198_v9 = vpop.f32.mrf.mxu1 }
0x121d   : > { %v8691_v11 = vpop.f32.mrf.mxu1 }
0x121e   : > { %v9440_v11 = vld [vmem:[%s10024_s8 + $0x2dc] ss:$24 sps:$4 sm:$0xff]  }
0x121f   : > { %v5201_v63 = vpop.f32.mrf.mxu1 }
0x1221   : > { %v8692_v19 = vpop.f32.mrf.mxu1 }
0x1223   : > { %v5324_v47 = vpop.f32.mrf.mxu1 }
0x1225   : > { %v8703_v45 = vpop.f32.mrf.mxu1 }
0x1227   : > { %v5327_v22 = vpop.f32.mrf.mxu1 }
0x1228   : > { %v8914_v23 = vpack.i.bf16 %v5327_v22, %v5324_v47 }
0x1229   : > { %v8704_v4 = vpop.f32.mrf.mxu1 }
0x122a   : > { %8915 = vrot.lane.b32.xlu1 %v8914_v23, %s9840_s20 }
0x1241   : > { %v5446_v7 = vpop.f32.mrf.mxu1 }
0x1243   : > { %v8715_v24 = vpop.f32.mrf.mxu1 }
0x1245   : > { %v5449_v20 = vpop.f32.mrf.mxu1 }
0x1246   : > { %v5464_v28 = vpack.c.bf16 %v5449_v20, %v5446_v7 }
0x1247   : > { %v8716_v31 = vpop.f32.mrf.mxu1 }
0x1248   : > { %8238 = vmatprep.mubr.msk.bf16.mxu0 %vm1732_vm3, %v5464_v28 }
0x129c   : > { %v8916_v0 = vpop.permute.xlu1 %8915 }
0x129d   : > { %v8918_v36 = vunpack.i.h.bf16 %v8916_v0  ;;  %v8917_v39 = vunpack.i.l.bf16 %v8916_v0 }
0x129f   : > { %v5462_v41 = vsel %vm1732_vm3, %v5201_v63, %v8918_v36  ;;  %v5461_v42 = vsel %vm1732_vm3, %v5198_v9, %v8917_v39  ;;  %v9437_v9 = vld [vmem:[%s10024_s8 + $0x2d4] ss:$24 sps:$4 sm:$0xff]   ;;  %v9438_v63 = vld [vmem:[%s10024_s8 + $0x2d8] ss:$24 sps:$4 sm:$0xff]  }
0x12a0   : > { %v5463_v46 = vpack.c.bf16 %v5462_v41, %v5461_v42  ;;  %v9443_v42 = vld [vmem:[%s10024_s8 + $0x2a4] ss:$24 sps:$4 sm:$0xff]  }
0x12a2   : > { %5632 = vmatmul.mubr.bf16.vlgmr.msra.gmra.mxu0 %v5463_v46  ;;  %v9441_v46 = vld [vmem:[%s10024_s8 + $0x2a0] ss:$24 sps:$4 sm:$0xff]  }
0x12a3   : > { %6231 = vmatpush1.bf16.msra.mxu0 %v9414_v12  ;;  %v9468_v12 = vld [vmem:[%s10024_s8 + $0x428] ss:$24 sps:$4 sm:$0xff]  }
0x1362   : > { %v5633_v57 = vpop.f32.mrf.mxu0 }
0x1363   : > { %v5634_v61 = vadd.f32 %v5633_v57, %v5469_v52  ;;  %v9447_v57 = vld [vmem:[%s10024_s8 + $0x270] ss:$24 sps:$4 sm:$0xff]  }
0x1364   : > { %v5635_v50 = vpop.f32.mrf.mxu0 }
0x1365   : > { %v5636_v43 = vadd.f32 %v5635_v50, %v5473_v55  ;;  %v11103_v13 = vadd.f32 %v5634_v61, %v10880_v10  ;;  %v9452_v61 = vld [vmem:[%s10024_s8 + $0x27c] ss:$24 sps:$4 sm:$0xff]   ;;  %v9450_v50 = vld [vmem:[%s10024_s8 + $0x278] ss:$24 sps:$4 sm:$0xff]  }
0x1366   : > { %v5637_v51 = vpop.f32.mrf.mxu0 }
0x1367   : > { %v11100_v49 = vadd.f32 %v5636_v43, %v10878_v26  ;;  %v5638_v37 = vadd.f32 %v5637_v51, %v5469_v52  ;;  %v9444_v52 = vld [vmem:[%s10024_s8 + $0x2a8] ss:$24 sps:$4 sm:$0xff]   ;;  %v9455_v43 = vld [vmem:[%s10024_s8 + $0x244] ss:$24 sps:$4 sm:$0xff]  }
0x1368   : > { %v5639_v17 = vpop.f32.mrf.mxu0  ;;  %v9453_v51 = vld [vmem:[%s10024_s8 + $0x240] ss:$24 sps:$4 sm:$0xff]  }
0x1369   : > { %v5640_v48 = vadd.f32 %v5639_v17, %v5473_v55  ;;  %v5650_v59 = vsel %vm1732_vm3, %v11100_v49, 0.0  ;;  %v11112_v26 = vadd.f32 %v5638_v37, %v10889_v16  ;;  %v9422_v16 = vld [vmem:[%s10024_s8 + $0x36c] ss:$24 sps:$4 sm:$0xff]   ;;  %v9456_v17 = vld [vmem:[%s10024_s8 + $0x248] ss:$24 sps:$4 sm:$0xff]  }
0x136a   : > { %v5651_v30 = vadd.f32 %v5650_v59, %v11103_v13  ;;  %6232 = vmatprep.subr.bf16.mxu0 %v9422_v16  ;;  %v9449_v55 = vld [vmem:[%s10024_s8 + $0x274] ss:$24 sps:$4 sm:$0xff]   ;;  %v9471_v16 = vld [vmem:[%s10024_s8 + $0x3f0] ss:$24 sps:$4 sm:$0xff]  }
0x136b   : > { %v11109_v35 = vadd.f32 %v5640_v48, %v10887_v15  ;;  %v9419_v15 = vld [vmem:[%s10024_s8 + $0x364] ss:$24 sps:$4 sm:$0xff]   ;;  %6233 = vmatpush1.bf16.msra.mxu0 %v9420_v58  ;;  %v9461_v48 = vld [vmem:[%s10024_s8 + $0x454] ss:$24 sps:$4 sm:$0xff]  }
0x136c   : > { %5652 = vadd.xlane.f32.xlu0 %v5651_v30  ;;  %6189 = vmatprep.subr.bf16.mxu1 %v9419_v15  ;;  %v9458_v37 = vld [vmem:[%s10024_s8 + $0x24c] ss:$24 sps:$4 sm:$0xff]   ;;  %v9464_v59 = vld [vmem:[%s10024_s8 + $0x45c] ss:$24 sps:$4 sm:$0xff]   ;;  %v9459_v30 = vld [vmem:[%s10024_s8 + $0x450] ss:$24 sps:$4 sm:$0xff]  }
0x136d   : > { %v5654_v10 = vsel %vm1732_vm3, %v11109_v35, 0.0  ;;  %6190 = vmatpush1.bf16.msra.mxu1 %v9417_v25  ;;  %6234 = vmatprep.subr.bf16.mxu0 %v9428_v8  ;;  %v9476_v15 = vld [vmem:[%s10024_s8 + $0x3fc] ss:$24 sps:$4 sm:$0xff]   ;;  %v9474_v25 = vld [vmem:[%s10024_s8 + $0x3f8] ss:$24 sps:$4 sm:$0xff]  }
0x136e   : > { %v5655_v56 = vadd.f32 %v5654_v10, %v11112_v26  ;;  %6191 = vmatprep.subr.bf16.mxu1 %v9425_v62  ;;  %v9462_v10 = vld [vmem:[%s10024_s8 + $0x458] ss:$24 sps:$4 sm:$0xff]   ;;  %v9479_v58 = vld [vmem:[%s10024_s8 + $0x3c4] ss:$24 sps:$4 sm:$0xff]  }
0x136f   : > { %6235 = vmatpush1.bf16.msra.mxu0 %v9426_v2  ;;  %v9482_v62 = vld [vmem:[%s10024_s8 + $0x3cc] ss:$24 sps:$4 sm:$0xff]   ;;  %v9477_v8 = vld [vmem:[%s10024_s8 + $0x3c0] ss:$24 sps:$4 sm:$0xff]  }
0x1370   : > { %5656 = vadd.xlane.f32.xlu1 %v5655_v56  ;;  %6236 = vmatprep.subr.bf16.mxu0 %v9434_v5  ;;  %v9467_v56 = vld [vmem:[%s10024_s8 + $0x424] ss:$24 sps:$4 sm:$0xff]  }
0x1371   : > { %6192 = vmatpush1.bf16.msra.mxu1 %v9423_v1  ;;  %v9480_v1 = vld [vmem:[%s10024_s8 + $0x3c8] ss:$24 sps:$4 sm:$0xff]   ;;  %v9485_v2 = vld [vmem:[%s10024_s8 + $0x3a4] ss:$24 sps:$4 sm:$0xff]  }
0x1372   : > { %6193 = vmatprep.subr.bf16.mxu1 %v9431_v3  ;;  %v9521_v3 = vld [vmem:[%s10034_s11 + $0x374] ss:$8 sps:$4 sm:$0xff]  }
0x1373   : > { %6237 = vmatpush1.bf16.msra.mxu0 %v9432_v6 }
0x1374   : > { %6238 = vmatprep.subr.bf16.mxu0 %v9440_v11 }
0x1375   : > { %6194 = vmatpush1.bf16.msra.mxu1 %v9429_v38 }
0x1376   : > { %6195 = vmatprep.subr.bf16.mxu1 %v9437_v9 }
0x1377   : > { %6239 = vmatpush1.bf16.msra.mxu0 %v9438_v63  ;;  %v8239_v63 = vld [vmem:[%s10004_s28 + $0x2] sm:$0x3] }
0x1378   : > { %6240 = vmatprep.subr.bf16.mxu0 %v9446_v53 }
0x1379   : > { %6196 = vmatpush1.bf16.msra.mxu1 %v9435_v29 }
0x137a   : > { %6197 = vmatprep.subr.bf16.mxu1 %v9443_v42 }
0x137b   : > { %6241 = vmatpush1.bf16.msra.mxu0 %v9444_v52 }
0x137c   : > { %6242 = vmatprep.subr.bf16.mxu0 %v9452_v61  ;;  %v9483_v61 = vld [vmem:[%s10024_s8 + $0x3a0] ss:$24 sps:$4 sm:$0xff]  }
0x137d   : > { %6198 = vmatpush1.bf16.msra.mxu1 %v9441_v46 }
0x137e   : > { %6199 = vmatprep.subr.bf16.mxu1 %v9449_v55 }
0x137f   : > { %6243 = vmatpush1.bf16.msra.mxu0 %v9450_v50 }
0x1380   : > { %6244 = vmatprep.subr.bf16.mxu0 %v9458_v37  ;;  %v9491_v37 = vld [vmem:[%s10024_s8 + $0x344] ss:$24 sps:$4 sm:$0xff]  }
0x1381   : > { %6200 = vmatpush1.bf16.msra.mxu1 %v9447_v57 }
0x1382   : > { %6201 = vmatprep.subr.bf16.mxu1 %v9455_v43  ;;  %v9519_v43 = vld [vmem:[%s10034_s11 + $0x370] ss:$8 sps:$4 sm:$0xff]  }
0x1383   : > { %6245 = vmatpush1.bf16.msra.mxu0 %v9456_v17  ;;  %v9525_v17 = vld [vmem:[%s10034_s11 + $0x360] ss:$8 sps:$4 sm:$0xff]  }
0x1384   : > { %6254 = vmatprep.subr.bf16.mxu0 %v9464_v59  ;;  %v9489_v59 = vld [vmem:[%s10024_s8 + $0x340] ss:$24 sps:$4 sm:$0xff]  }
0x1385   : > { %6202 = vmatpush1.bf16.msra.mxu1 %v9453_v51  ;;  %v9486_v51 = vld [vmem:[%s10024_s8 + $0x370] ss:$24 sps:$4 sm:$0xff]  }
0x1386   : > { %6211 = vmatprep.subr.bf16.mxu1 %v9461_v48  ;;  %v9533_v48 = vld [vmem:[%s10034_s11 + $0x354] ss:$8 sps:$4 sm:$0xff]  }
0x1387   : > { %6255 = vmatpush2.bf16.msra.mxu0 %v9462_v10  ;;  %v9531_v10 = vld [vmem:[%s10034_s11 + $0x350] ss:$8 sps:$4 sm:$0xff]  }
0x1388   : > { %6256 = vmatprep.subr.bf16.mxu0 %v9470_v14  ;;  %v9492_v14 = vld [vmem:[%s10024_s8 + $0x310] ss:$24 sps:$4 sm:$0xff]  }
0x1389   : > { %6212 = vmatpush2.bf16.msra.mxu1 %v9459_v30  ;;  %v9494_v30 = vld [vmem:[%s10024_s8 + $0x314] ss:$24 sps:$4 sm:$0xff]  }
0x138a   : > { %6213 = vmatprep.subr.bf16.mxu1 %v9467_v56  ;;  %v9539_v56 = vld [vmem:[%s10034_s11 + $0x344] ss:$8 sps:$4 sm:$0xff]  }
0x138b   : > { %6257 = vmatpush2.bf16.msra.mxu0 %v9468_v12  ;;  %v9537_v12 = vld [vmem:[%s10034_s11 + $0x340] ss:$8 sps:$4 sm:$0xff]  }
0x138c   : > { %6258 = vmatprep.subr.bf16.mxu0 %v9476_v15  ;;  %v9495_v15 = vld [vmem:[%s10024_s8 + $0x2e0] ss:$24 sps:$4 sm:$0xff]  }
0x138d   : > { %6214 = vmatpush2.bf16.msra.mxu1 %v9465_v40  ;;  %v9497_v40 = vld [vmem:[%s10024_s8 + $0x2e4] ss:$24 sps:$4 sm:$0xff]  }
0x138e   : > { %6215 = vmatprep.subr.bf16.mxu1 %v9473_v60  ;;  %v9545_v60 = vld [vmem:[%s10034_s11 + $0x334] ss:$8 sps:$4 sm:$0xff]  }
0x138f   : > { %6259 = vmatpush2.bf16.msra.mxu0 %v9474_v25  ;;  %v9543_v25 = vld [vmem:[%s10034_s11 + $0x330] ss:$8 sps:$4 sm:$0xff]  }
0x1390   : > { %6260 = vmatprep.subr.bf16.mxu0 %v9482_v62  ;;  %v9498_v62 = vld [vmem:[%s10024_s8 + $0x2b0] ss:$24 sps:$4 sm:$0xff]  }
0x1391   : > { %6216 = vmatpush2.bf16.msra.mxu1 %v9471_v16  ;;  %v9500_v16 = vld [vmem:[%s10024_s8 + $0x2b4] ss:$24 sps:$4 sm:$0xff]  }
0x1392   : > { %6217 = vmatprep.subr.bf16.mxu1 %v9479_v58  ;;  %v9551_v58 = vld [vmem:[%s10034_s11 + $0x324] ss:$8 sps:$4 sm:$0xff]  }
0x1393   : > { %6261 = vmatpush2.bf16.msra.mxu0 %v9480_v1  ;;  %v9549_v1 = vld [vmem:[%s10034_s11 + $0x320] ss:$8 sps:$4 sm:$0xff]  }
0x1394   : > { %7007 = vmatprep.subr.bf16.mxu0 %v9521_v3  ;;  %v9501_v3 = vld [vmem:[%s10024_s8 + $0x280] ss:$24 sps:$4 sm:$0xff]  }
0x1395   : > { %6218 = vmatpush2.bf16.msra.mxu1 %v9477_v8  ;;  %v9503_v8 = vld [vmem:[%s10024_s8 + $0x284] ss:$24 sps:$4 sm:$0xff]  }
0x1396   : > { %6273 = vmatprep.subr.bf16.mxu1 %v9485_v2  ;;  %v9557_v2 = vld [vmem:[%s10034_s11 + $0x314] ss:$8 sps:$4 sm:$0xff]  }
0x13f5   : > { %v5653_v27 = vpop.xlane.xlu0 %5652 }
0x13f6   : > { %v5658_v19 = vmul.f32 0.0052083335, %v5653_v27 }
0x13f8   : > { %v11138_v47 = vsub.f32 %v11103_v13, %v5658_v19  ;;  %v11141_v45 = vsub.f32 %v11100_v49, %v5658_v19  ;;  %v8240_v19 = vld [vmem:[%s10014_s18 + $0x2] sm:$0x3] }
0x13f9   : > { %v5657_v22 = vpop.xlane.xlu1 %5656 }
0x13fa   : > { %v5659_v23 = vmul.f32 0.0052083335, %v5657_v22  ;;  %v5664_v4 = vmul.f32 %v11138_v47, %v11138_v47  ;;  %v5665_v7 = vmul.f32 %v11141_v45, %v11141_v45 }
0x13fc   : > { %v11148_v24 = vsub.f32 %v11112_v26, %v5659_v23  ;;  %v11151_v20 = vsub.f32 %v11109_v35, %v5659_v23  ;;  %v5668_v28 = vsel %vm1732_vm3, %v5665_v7, 0.0  ;;  %v5694_v23 = vrot.slane %v8239_v63, %v10432_v33 }
0x13fd   : > { %v5669_v31 = vadd.f32 %v5668_v28, %v5664_v4  ;;  %v5690_v7 = vrot.slane %v8239_v63, %v10435_v34  ;;  %v9510_v63 = vld [vmem:[%s10024_s8 + $0x430] ss:$24 sps:$4 sm:$0xff]  }
0x13fe   : > { %v5667_v0 = vmul.f32 %v11151_v20, %v11151_v20  ;;  %v5666_v36 = vmul.f32 %v11148_v24, %v11148_v24 }
0x13ff   : > { %5670 = vadd.xlane.f32.xlu0 %v5669_v31  ;;  %v5709_v31 = vrot.slane %v8240_v19, %v10432_v33 }
0x1400   : > { %v5672_v39 = vsel %vm1732_vm3, %v5667_v0, 0.0  ;;  %v5705_v0 = vrot.slane %v8240_v19, %v10435_v34  ;;  %v9513_v19 = vld [vmem:[%s10024_s8 + $0x400] ss:$24 sps:$4 sm:$0xff]  }
0x1401   : > { %v5673_v41 = vadd.f32 %v5672_v39, %v5666_v36 }
0x1403   : > { %5674 = vadd.xlane.f32.xlu0 %v5673_v41 }
0x1488   : > { %v5671_v5 = vpop.xlane.xlu0 %5670 }
0x1489   : > { %v5676_v38 = vmul.f32 0.0052083335, %v5671_v5  ;;  %v9506_v5 = vld [vmem:[%s10024_s8 + $0x254] ss:$24 sps:$4 sm:$0xff]  }
0x148b   : > { %v5678_v6 = vadd.f32 1e-12, %v5676_v38  ;;  %v9555_v38 = vld [vmem:[%s10034_s11 + $0x310] ss:$8 sps:$4 sm:$0xff]  }
0x148c   : > { %v5675_v9 = vpop.xlane.xlu0 %5674 }
0x148d   : > { %9747 = vrsqrt.f32 %v5678_v6  ;;  %v5677_v11 = vmul.f32 0.0052083335, %v5675_v9  ;;  %v9504_v6 = vld [vmem:[%s10024_s8 + $0x250] ss:$24 sps:$4 sm:$0xff]   ;;  %v9509_v9 = vld [vmem:[%s10024_s8 + $0x464] ss:$24 sps:$4 sm:$0xff]  }
0x148f   : > { %v5679_v29 = vadd.f32 1e-12, %v5677_v11  ;;  %v9507_v11 = vld [vmem:[%s10024_s8 + $0x460] ss:$24 sps:$4 sm:$0xff]  }
0x1491   : > { %9749 = vrsqrt.f32 %v5679_v29  ;;  %v9512_v29 = vld [vmem:[%s10024_s8 + $0x434] ss:$24 sps:$4 sm:$0xff]  }
0x149a   : > { %v9748_v27 = vpop.eup %9747 }
0x149b   : > { %v5683_v22 = vmul.f32 %v9748_v27, %v11141_v45  ;;  %v5682_v4 = vmul.f32 %v9748_v27, %v11138_v47  ;;  %v9515_v27 = vld [vmem:[%s10024_s8 + $0x404] ss:$24 sps:$4 sm:$0xff]  }
0x149d   : > { %v5698_v39 = vmul.f32 %v5694_v23, %v5683_v22  ;;  %v5697_v41 = vmul.f32 %v5690_v7, %v5682_v4  ;;  %v9518_v22 = vld [vmem:[%s10024_s8 + $0x3d4] ss:$24 sps:$4 sm:$0xff]  }
0x149e   : > { %v9750_v28 = vpop.eup %9749  ;;  %v9524_v4 = vld [vmem:[%s10034_s11 + $0x474] ss:$8 sps:$4 sm:$0xff]  }
0x149f   : > { %v5685_v36 = vmul.f32 %v9750_v28, %v11151_v20  ;;  %v5684_v45 = vmul.f32 %v9750_v28, %v11148_v24  ;;  %v5713_v47 = vadd.f32 %v5709_v31, %v5698_v39  ;;  %v5712_v52 = vadd.f32 %v5705_v0, %v5697_v41  ;;  %v9488_v20 = vld [vmem:[%s10024_s8 + $0x374] ss:$24 sps:$4 sm:$0xff]  }
0x14a0   : > { %v9527_v24 = vld [vmem:[%s10034_s11 + $0x364] ss:$8 sps:$4 sm:$0xff]   ;;  %v9548_v41 = vld [vmem:[%s10034_s11 + $0x434] ss:$8 sps:$4 sm:$0xff]  }
0x14a1   : > { %v5700_v42 = vmul.f32 %v5694_v23, %v5685_v36  ;;  %v5699_v46 = vmul.f32 %v5690_v7, %v5684_v45  ;;  %v9516_v23 = vld [vmem:[%s10024_s8 + $0x3d0] ss:$24 sps:$4 sm:$0xff]   ;;  %v9530_v28 = vld [vmem:[%s10034_s11 + $0x464] ss:$8 sps:$4 sm:$0xff]  }
0x14a2   : > { %v9522_v7 = vld [vmem:[%s10034_s11 + $0x470] ss:$8 sps:$4 sm:$0xff]   ;;  %v9542_v39 = vld [vmem:[%s10034_s11 + $0x444] ss:$8 sps:$4 sm:$0xff]   ;;  %v9540_v45 = vld [vmem:[%s10034_s11 + $0x440] ss:$8 sps:$4 sm:$0xff]  }
0x14a3   : > { %v5715_v53 = vadd.f32 %v5709_v31, %v5700_v42  ;;  %v5714_v55 = vadd.f32 %v5705_v0, %v5699_v46  ;;  %v9528_v31 = vld [vmem:[%s10034_s11 + $0x460] ss:$8 sps:$4 sm:$0xff]   ;;  %v9536_v0 = vld [vmem:[%s10034_s11 + $0x454] ss:$8 sps:$4 sm:$0xff]   ;;  %v9534_v36 = vld [vmem:[%s10034_s11 + $0x450] ss:$8 sps:$4 sm:$0xff]  }
0x14a4   : > { %v9546_v42 = vld [vmem:[%s10034_s11 + $0x430] ss:$8 sps:$4 sm:$0xff]   ;;  %v9554_v46 = vld [vmem:[%s10034_s11 + $0x424] ss:$8 sps:$4 sm:$0xff]  }
0x14a5   : > { %v5717_v57 = vpack.c.bf16 %v5715_v53, %v5713_v47  ;;  %v11200_v50 = vpack.c.bf16 %v5714_v55, %v5712_v52  ;;  %v9552_v47 = vld [vmem:[%s10034_s11 + $0x420] ss:$8 sps:$4 sm:$0xff]   ;;  %v9563_v53 = vld [vmem:[%s10034_s11 + $0x304] ss:$8 sps:$4 sm:$0xff]   ;;  %v9560_v52 = vld [vmem:[%s10034_s11 + $0x414] ss:$8 sps:$4 sm:$0xff]  }
0x14a6   : > { %v9561_v55 = vld [vmem:[%s10034_s11 + $0x300] ss:$8 sps:$4 sm:$0xff]  }
0x14a7   : > { %8386 = vmatprep.mubr.msk.bf16.mxu1 %vm1732_vm3, %v5717_v57  ;;  %8387 = vmatprep.mubr.msk.bf16.mxu0 %vm1732_vm3, %v5717_v57 }
0x14a8   : > { %6220 = vmatmul.mubr.bf16.vlgmr.msra.gmra.mxu1 %v11200_v50  ;;  %6263 = vmatmul.mubr.bf16.vlgmr.msra.gmra.mxu0 %v11200_v50 }
0x14a9   : > { %6274 = vmatpush1.bf16.msra.mxu1 %v9483_v61  ;;  %8388 = vmatprep.mubr.msk.bf16.mxu1 %vm1732_vm3, %v5717_v57  ;;  %v9558_v57 = vld [vmem:[%s10034_s11 + $0x410] ss:$8 sps:$4 sm:$0xff]   ;;  %v9566_v61 = vld [vmem:[%s10034_s11 + $0x404] ss:$8 sps:$4 sm:$0xff]  }
0x14aa   : > { %6275 = vmatprep.subr.bf16.mxu1 %v9488_v20  ;;  %7008 = vmatpush1.bf16.msra.mxu0 %v9519_v43  ;;  %v9567_v20 = vld [vmem:[%s10034_s11 + $0x3f0] ss:$8 sps:$4 sm:$0xff]   ;;  %v9564_v43 = vld [vmem:[%s10034_s11 + $0x400] ss:$8 sps:$4 sm:$0xff]  }
0x14ab   : > { %7009 = vmatprep.subr.bf16.mxu0 %v9527_v24  ;;  %v9572_v24 = vld [vmem:[%s10034_s11 + $0x4f4] ss:$8 sps:$4 sm:$0xff]  }
0x14ad   : > { %6276 = vmatpush1.bf16.msra.mxu1 %v9486_v51  ;;  %v9570_v51 = vld [vmem:[%s10034_s11 + $0x4f0] ss:$8 sps:$4 sm:$0xff]  }
0x14ae   : > { %6277 = vmatprep.subr.bf16.mxu1 %v9491_v37  ;;  %7010 = vmatpush1.bf16.msra.mxu0 %v9525_v17  ;;  %v9575_v37 = vld [vmem:[%s10034_s11 + $0x3e4] ss:$8 sps:$4 sm:$0xff]   ;;  %v9573_v17 = vld [vmem:[%s10034_s11 + $0x3e0] ss:$8 sps:$4 sm:$0xff]  }
0x14af   : > { %7011 = vmatprep.subr.bf16.mxu0 %v9533_v48  ;;  %v9578_v48 = vld [vmem:[%s10034_s11 + $0x4e4] ss:$8 sps:$4 sm:$0xff]  }
0x14b1   : > { %6278 = vmatpush1.bf16.msra.mxu1 %v9489_v59  ;;  %v9576_v59 = vld [vmem:[%s10034_s11 + $0x4e0] ss:$8 sps:$4 sm:$0xff]  }
0x14b2   : > { %6279 = vmatprep.subr.bf16.mxu1 %v9494_v30  ;;  %7012 = vmatpush1.bf16.msra.mxu0 %v9531_v10  ;;  %v9581_v30 = vld [vmem:[%s10034_s11 + $0x3d4] ss:$8 sps:$4 sm:$0xff]   ;;  %v9579_v10 = vld [vmem:[%s10034_s11 + $0x3d0] ss:$8 sps:$4 sm:$0xff]  }
0x14b3   : > { %7013 = vmatprep.subr.bf16.mxu0 %v9539_v56  ;;  %v9584_v56 = vld [vmem:[%s10034_s11 + $0x4d4] ss:$8 sps:$4 sm:$0xff]  }
0x14b5   : > { %6280 = vmatpush1.bf16.msra.mxu1 %v9492_v14  ;;  %v9582_v14 = vld [vmem:[%s10034_s11 + $0x4d0] ss:$8 sps:$4 sm:$0xff]  }
0x14b6   : > { %6281 = vmatprep.subr.bf16.mxu1 %v9497_v40  ;;  %7014 = vmatpush1.bf16.msra.mxu0 %v9537_v12  ;;  %v9587_v40 = vld [vmem:[%s10034_s11 + $0x3c4] ss:$8 sps:$4 sm:$0xff]   ;;  %v9585_v12 = vld [vmem:[%s10034_s11 + $0x3c0] ss:$8 sps:$4 sm:$0xff]  }
0x14b7   : > { %7015 = vmatprep.subr.bf16.mxu0 %v9545_v60  ;;  %v9590_v60 = vld [vmem:[%s10034_s11 + $0x4c4] ss:$8 sps:$4 sm:$0xff]  }
0x14b9   : > { %6282 = vmatpush1.bf16.msra.mxu1 %v9495_v15  ;;  %v9588_v15 = vld [vmem:[%s10034_s11 + $0x4c0] ss:$8 sps:$4 sm:$0xff]  }
0x14ba   : > { %6283 = vmatprep.subr.bf16.mxu1 %v9500_v16  ;;  %7016 = vmatpush1.bf16.msra.mxu0 %v9543_v25  ;;  %v9593_v16 = vld [vmem:[%s10034_s11 + $0x3b4] ss:$8 sps:$4 sm:$0xff]   ;;  %v9591_v25 = vld [vmem:[%s10034_s11 + $0x3b0] ss:$8 sps:$4 sm:$0xff]  }
0x14bb   : > { %7017 = vmatprep.subr.bf16.mxu0 %v9551_v58  ;;  %v9596_v58 = vld [vmem:[%s10034_s11 + $0x4b4] ss:$8 sps:$4 sm:$0xff]  }
0x14bd   : > { %6284 = vmatpush1.bf16.msra.mxu1 %v9498_v62  ;;  %v9594_v62 = vld [vmem:[%s10034_s11 + $0x4b0] ss:$8 sps:$4 sm:$0xff]  }
0x14be   : > { %6285 = vmatprep.subr.bf16.mxu1 %v9503_v8  ;;  %7018 = vmatpush1.bf16.msra.mxu0 %v9549_v1  ;;  %v9599_v8 = vld [vmem:[%s10034_s11 + $0x3a4] ss:$8 sps:$4 sm:$0xff]   ;;  %v9597_v1 = vld [vmem:[%s10034_s11 + $0x3a0] ss:$8 sps:$4 sm:$0xff]  }
0x14bf   : > { %7019 = vmatprep.subr.bf16.mxu0 %v9557_v2  ;;  %v9602_v2 = vld [vmem:[%s10034_s11 + $0x4a4] ss:$8 sps:$4 sm:$0xff]  }
0x14c1   : > { %6286 = vmatpush1.bf16.msra.mxu1 %v9501_v3  ;;  %v9600_v3 = vld [vmem:[%s10034_s11 + $0x4a0] ss:$8 sps:$4 sm:$0xff]  }
0x14c2   : > { %6287 = vmatprep.subr.bf16.mxu1 %v9506_v5  ;;  %7020 = vmatpush1.bf16.msra.mxu0 %v9555_v38  ;;  %v9603_v5 = vld [vmem:[%s10034_s11 + $0x390] ss:$8 sps:$4 sm:$0xff]   ;;  %v9605_v38 = vld [vmem:[%s10034_s11 + $0x394] ss:$8 sps:$4 sm:$0xff]  }
0x14c3   : > { %7021 = vmatprep.subr.bf16.mxu0 %v9563_v53 }
0x14c5   : > { %6288 = vmatpush1.bf16.msra.mxu1 %v9504_v6  ;;  %v9608_v6 = vld [vmem:[%s10034_s11 + $0x494] ss:$8 sps:$4 sm:$0xff]  }
0x14c6   : > { %6297 = vmatprep.subr.bf16.mxu1 %v9509_v9  ;;  %7022 = vmatpush1.bf16.msra.mxu0 %v9561_v55  ;;  %v9611_v9 = vld [vmem:[%s10034_s11 + $0x384] ss:$8 sps:$4 sm:$0xff]  }
0x14c9   : > { %6298 = vmatpush2.bf16.msra.mxu1 %v9507_v11  ;;  %v9606_v11 = vld [vmem:[%s10034_s11 + $0x490] ss:$8 sps:$4 sm:$0xff]  }
0x14ca   : > { %6299 = vmatprep.subr.bf16.mxu1 %v9512_v29  ;;  %v9609_v29 = vld [vmem:[%s10034_s11 + $0x380] ss:$8 sps:$4 sm:$0xff]  }
0x14cd   : > { %6300 = vmatpush2.bf16.msra.mxu1 %v9510_v63  ;;  %v9614_v63 = vld [vmem:[%s10034_s11 + $0x484] ss:$8 sps:$4 sm:$0xff]  }
0x14ce   : > { %6301 = vmatprep.subr.bf16.mxu1 %v9515_v27  ;;  %v9612_v27 = vld [vmem:[%s10034_s11 + $0x480] ss:$8 sps:$4 sm:$0xff]  }
0x14d1   : > { %6302 = vmatpush2.bf16.msra.mxu1 %v9513_v19  ;;  %v9617_v19 = vld [vmem:[%s10034_s11 + $0x574] ss:$8 sps:$4 sm:$0xff]  }
0x14d2   : > { %6303 = vmatprep.subr.bf16.mxu1 %v9518_v22  ;;  %v11295_v22 = vld [vmem:[%s10029_s9 + $0x6] sm:$0x3f] }
0x14d5   : > { %6304 = vmatpush2.bf16.msra.mxu1 %v9516_v23  ;;  %v5797_v23 = vrot.slane %v11295_v22, %v10435_v34 }
0x14d6   : > { %7050 = vmatprep.subr.bf16.mxu1 %v9524_v4  ;;  %v5805_v4 = vrot.slane %v11295_v22, %v10498_v44 }
0x14d8   : > { %6306 = vmatmul.mubr.bf16.vlgmr.msra.gmra.mxu1 %v11200_v50  ;;  %v9569_v50 = vld [vmem:[%s10034_s11 + $0x3f4] ss:$8 sps:$4 sm:$0xff]  }
0x14d9   : > { %7051 = vmatpush1.bf16.msra.mxu1 %v9522_v7  ;;  %7023 = vmatprep.subr.bf16.mxu0 %v9569_v50 }
0x14da   : > { %7052 = vmatprep.subr.bf16.mxu1 %v9530_v28  ;;  %7024 = vmatpush2.bf16.msra.mxu0 %v9567_v20 }
0x14db   : > { %7025 = vmatprep.subr.bf16.mxu0 %v9575_v37 }
0x14dd   : > { %7053 = vmatpush1.bf16.msra.mxu1 %v9528_v31  ;;  %v5801_v31 = vrot.slane %v11295_v22, %v10432_v33 }
0x14de   : > { %7054 = vmatprep.subr.bf16.mxu1 %v9536_v0  ;;  %7026 = vmatpush2.bf16.msra.mxu0 %v9573_v17  ;;  %v5809_v0 = vrot.slane %v11295_v22, %v10506_v54 }
0x14df   : > { %7027 = vmatprep.subr.bf16.mxu0 %v9581_v30 }
0x14e1   : > { %7055 = vmatpush1.bf16.msra.mxu1 %v9534_v36 }
0x14e2   : > { %7056 = vmatprep.subr.bf16.mxu1 %v9542_v39  ;;  %7028 = vmatpush2.bf16.msra.mxu0 %v9579_v10 }
0x14e3   : > { %7029 = vmatprep.subr.bf16.mxu0 %v9587_v40 }
0x14e5   : > { %7057 = vmatpush1.bf16.msra.mxu1 %v9540_v45 }
0x14e6   : > { %7058 = vmatprep.subr.bf16.mxu1 %v9548_v41  ;;  %7030 = vmatpush2.bf16.msra.mxu0 %v9585_v12 }
0x14e7   : > { %7031 = vmatprep.subr.bf16.mxu0 %v9593_v16 }
0x14e9   : > { %7059 = vmatpush1.bf16.msra.mxu1 %v9546_v42 }
0x14ea   : > { %7060 = vmatprep.subr.bf16.mxu1 %v9554_v46  ;;  %7032 = vmatpush2.bf16.msra.mxu0 %v9591_v25 }
0x14eb   : > { %7033 = vmatprep.subr.bf16.mxu0 %v9599_v8 }
0x14ed   : > { %7061 = vmatpush1.bf16.msra.mxu1 %v9552_v47 }
0x14ee   : > { %7062 = vmatprep.subr.bf16.mxu1 %v9560_v52  ;;  %7034 = vmatpush2.bf16.msra.mxu0 %v9597_v1 }
0x14ef   : > { %7035 = vmatprep.subr.bf16.mxu0 %v9605_v38 }
0x14f1   : > { %7063 = vmatpush1.bf16.msra.mxu1 %v9558_v57 }
0x14f2   : > { %7064 = vmatprep.subr.bf16.mxu1 %v9566_v61  ;;  %7036 = vmatpush2.bf16.msra.mxu0 %v9603_v5 }
0x14f3   : > { %7037 = vmatprep.subr.bf16.mxu0 %v9611_v9 }
0x14f5   : > { %7065 = vmatpush1.bf16.msra.mxu1 %v9564_v43 }
0x14f6   : > { %7066 = vmatprep.subr.bf16.mxu1 %v9572_v24  ;;  %7038 = vmatpush2.bf16.msra.mxu0 %v9609_v29 }
0x14f7   : > { %7093 = vmatprep.subr.bf16.mxu0 %v9617_v19 }
0x14f9   : > { %7067 = vmatpush2.bf16.msra.mxu1 %v9570_v51 }
0x14fa   : > { %7068 = vmatprep.subr.bf16.mxu1 %v9578_v48 }
0x14fd   : > { %7069 = vmatpush2.bf16.msra.mxu1 %v9576_v59 }
0x14fe   : > { %7070 = vmatprep.subr.bf16.mxu1 %v9584_v56 }
0x1501   : > { %7071 = vmatpush2.bf16.msra.mxu1 %v9582_v14 }
0x1502   : > { %7072 = vmatprep.subr.bf16.mxu1 %v9590_v60 }
0x1505   : > { %7073 = vmatpush2.bf16.msra.mxu1 %v9588_v15 }
0x1506   : > { %7074 = vmatprep.subr.bf16.mxu1 %v9596_v58 }
0x1509   : > { %7075 = vmatpush2.bf16.msra.mxu1 %v9594_v62 }
0x150a   : > { %7076 = vmatprep.subr.bf16.mxu1 %v9602_v2 }
0x150d   : > { %7077 = vmatpush2.bf16.msra.mxu1 %v9600_v3 }
0x150e   : > { %7078 = vmatprep.subr.bf16.mxu1 %v9608_v6 }
0x1511   : > { %7079 = vmatpush2.bf16.msra.mxu1 %v9606_v11 }
0x1512   : > { %7080 = vmatprep.subr.bf16.mxu1 %v9614_v63 }
0x1515   : > { %7081 = vmatpush2.bf16.msra.mxu1 %v9612_v27 }
0x1568   : > { %v6221_v7 = vpop.f32.mrf.mxu1  ;;  %v6264_v28 = vpop.f32.mrf.mxu0 }
0x1569   : > { %v11305_v36 = vadd.f32 %v6221_v7, %v5797_v23  ;;  %v11307_v39 = vadd.f32 %v6264_v28, %v5805_v4 }
0x156a   : > { %v6223_v45 = vpop.f32.mrf.mxu1  ;;  %v6266_v41 = vpop.f32.mrf.mxu0 }
0x156b   : > { %v6316_v42 = vmul.f32 %v11305_v36, %v11305_v36  ;;  %v6318_v44 = vmul.f32 %v11307_v39, %v11307_v39  ;;  %v11313_v46 = vadd.f32 %v6223_v45, %v5801_v31  ;;  %v11315_v47 = vadd.f32 %v6266_v41, %v5809_v0 }
0x156c   : > { %v6225_v53 = vpop.f32.mrf.mxu1  ;;  %v6268_v52 = vpop.f32.mrf.mxu0  ;;  %v6340_v48 = vmul.f32 0.7978846, %v11305_v36  ;;  %v6342_v16 = vmul.f32 0.7978846, %v11307_v39 }
0x156d   : > { %v6352_v55 = vmul.f32 0.044715, %v6316_v42  ;;  %v6226_v54 = vadd.f32 %v6225_v53, %v5797_v23  ;;  %v11317_v57 = vadd.f32 %v6268_v52, %v5805_v4  ;;  %v6354_v61 = vmul.f32 0.044715, %v6318_v44 }
0x156e   : > { %v6317_v50 = vmul.f32 %v11313_v46, %v11313_v46  ;;  %v6319_v20 = vmul.f32 %v11315_v47, %v11315_v47  ;;  %v6227_v17 = vpop.f32.mrf.mxu1  ;;  %v6341_v40 = vmul.f32 0.7978846, %v11313_v46  ;;  %v6270_v15 = vpop.f32.mrf.mxu0  ;;  %v6343_v38 = vmul.f32 0.7978846, %v11315_v47 }
0x156f   : > { %v6364_v43 = vadd.f32 1.0, %v6352_v55  ;;  %v6322_v37 = vmul.f32 %v6226_v54, %v6226_v54  ;;  %v6324_v59 = vmul.f32 %v11317_v57, %v11317_v57  ;;  %v6366_v30 = vadd.f32 1.0, %v6354_v61 }
0x1570   : > { %v6353_v24 = vmul.f32 0.044715, %v6317_v50  ;;  %v6355_v51 = vmul.f32 0.044715, %v6319_v20  ;;  %v6228_v60 = vadd.f32 %v6227_v17, %v5801_v31  ;;  %v6346_v58 = vmul.f32 0.7978846, %v6226_v54 }
0x1571   : > { %v6358_v56 = vmul.f32 0.044715, %v6322_v37  ;;  %v6376_v14 = vmul.f32 %v6364_v43, %v6340_v48  ;;  %v6360_v12 = vmul.f32 0.044715, %v6324_v59  ;;  %v6348_v1 = vmul.f32 0.7978846, %v11317_v57 }
0x1572   : > { %v6365_v10 = vadd.f32 1.0, %v6353_v24  ;;  %v6367_v25 = vadd.f32 1.0, %v6355_v51  ;;  %v6323_v3 = vmul.f32 %v6228_v60, %v6228_v60  ;;  %v6378_v5 = vmul.f32 %v6366_v30, %v6342_v16 }
0x1573   : > { %v6370_v62 = vadd.f32 1.0, %v6358_v56  ;;  %v6372_v2 = vadd.f32 1.0, %v6360_v12  ;;  %v6271_v9 = vadd.f32 %v6270_v15, %v5809_v0  ;;  %9751 = vtanh.f32 %v6376_v14 }
0x1574   : > { %v6377_v8 = vmul.f32 %v6365_v10, %v6341_v40  ;;  %v6359_v29 = vmul.f32 0.044715, %v6323_v3  ;;  %v6379_v63 = vmul.f32 %v6367_v25, %v6343_v38  ;;  %v6347_v19 = vmul.f32 0.7978846, %v6228_v60  ;;  %v9621_v38 = vld [vmem:[%s10034_s11 + $0x550] ss:$8 sps:$4 sm:$0xff]  }
0x1575   : > { %v6382_v6 = vmul.f32 %v6370_v62, %v6346_v58  ;;  %v6384_v11 = vmul.f32 %v6372_v2, %v6348_v1  ;;  %v6325_v27 = vmul.f32 %v6271_v9, %v6271_v9  ;;  %v6349_v28 = vmul.f32 0.7978846, %v6271_v9  ;;  %v9615_v58 = vld [vmem:[%s10034_s11 + $0x570] ss:$8 sps:$4 sm:$0xff]   ;;  %v9620_v2 = vld [vmem:[%s10034_s11 + $0x564] ss:$8 sps:$4 sm:$0xff]  }
0x1576   : > { %v6371_v23 = vadd.f32 1.0, %v6359_v29  ;;  %v6334_v43 = vmul.f32 0.5, %v6226_v54  ;;  %v6329_v24 = vmul.f32 0.5, %v11313_v46  ;;  %v6335_v37 = vmul.f32 0.5, %v6228_v60 }
0x1577   : > { %9753 = vtanh.f32 %v6382_v6  ;;  %v6361_v4 = vmul.f32 0.044715, %v6325_v27  ;;  %v6328_v48 = vmul.f32 0.5, %v11305_v36  ;;  %v6336_v14 = vmul.f32 0.5, %v11317_v57  ;;  %v9624_v27 = vld [vmem:[%s10034_s11 + $0x540] ss:$8 sps:$4 sm:$0xff]  }
0x1578   : > { %9755 = vtanh.f32 %v6377_v8  ;;  %v6383_v7 = vmul.f32 %v6371_v23, %v6347_v19  ;;  %v6331_v54 = vmul.f32 0.5, %v11315_v47  ;;  %v6337_v16 = vmul.f32 0.5, %v6271_v9  ;;  %v9629_v23 = vld [vmem:[%s10034_s11 + $0x534] ss:$8 sps:$4 sm:$0xff]  }
0x1579   : > { %9757 = vtanh.f32 %v6378_v5  ;;  %v6373_v31 = vadd.f32 1.0, %v6361_v4  ;;  %v6330_v60 = vmul.f32 0.5, %v11307_v39  ;;  %v9618_v5 = vld [vmem:[%s10034_s11 + $0x560] ss:$8 sps:$4 sm:$0xff]   ;;  %v9623_v39 = vld [vmem:[%s10034_s11 + $0x554] ss:$8 sps:$4 sm:$0xff]   ;;  %v5817_v6 = vrot.slane %v11295_v22, %v3100_v21 }
0x157a   : > { %9759 = vtanh.f32 %v6384_v11  ;;  %v9626_v11 = vld [vmem:[%s10034_s11 + $0x544] ss:$8 sps:$4 sm:$0xff]   ;;  %v9627_v21 = vld [vmem:[%s10034_s11 + $0x530] ss:$8 sps:$4 sm:$0xff]  }
0x157b   : > { %9761 = vtanh.f32 %v6379_v63  ;;  %v6385_v45 = vmul.f32 %v6373_v31, %v6349_v28  ;;  %v9632_v31 = vld [vmem:[%s10034_s11 + $0x524] ss:$8 sps:$4 sm:$0xff]  }
0x157c   : > { %9763 = vtanh.f32 %v6383_v7 }
0x157d   : > { %9765 = vtanh.f32 %v6385_v45 }
0x1580   : > { %v9752_v0 = vpop.eup %9751 }
0x1581   : > { %v6400_v20 = vadd.f32 1.0, %v9752_v0 }
0x1583   : > { %v6412_v15 = vmul.f32 %v6400_v20, %v6328_v48 }
0x1584   : > { %v9754_v41 = vpop.eup %9753 }
0x1585   : > { %v9756_v42 = vpop.eup %9755  ;;  %v6406_v52 = vadd.f32 1.0, %v9754_v41 }
0x1586   : > { %v9758_v44 = vpop.eup %9757  ;;  %v6401_v61 = vadd.f32 1.0, %v9756_v42  ;;  %v5813_v42 = vrot.slane %v11295_v22, %v10480_v18  ;;  %v9633_v18 = vld [vmem:[%s10034_s11 + $0x510] ss:$8 sps:$4 sm:$0xff]  }
0x1587   : > { %v9760_v53 = vpop.eup %9759  ;;  %v6418_v59 = vmul.f32 %v6406_v52, %v6334_v43  ;;  %v6402_v56 = vadd.f32 1.0, %v9758_v44  ;;  %v9630_v52 = vld [vmem:[%s10034_s11 + $0x520] ss:$8 sps:$4 sm:$0xff]  }
0x1588   : > { %v9762_v55 = vpop.eup %9761  ;;  %v6408_v51 = vadd.f32 1.0, %v9760_v53  ;;  %v6413_v40 = vmul.f32 %v6401_v61, %v6329_v24  ;;  %v9635_v61 = vld [vmem:[%s10034_s11 + $0x514] ss:$8 sps:$4 sm:$0xff]  }
0x1589   : > { %v9764_v50 = vpop.eup %9763  ;;  %v6403_v30 = vadd.f32 1.0, %v9762_v55  ;;  %v6424_v1 = vpack.c.bf16 %v6418_v59, %v6412_v15  ;;  %v6414_v57 = vmul.f32 %v6402_v56, %v6330_v60  ;;  %v9641_v59 = vld [vmem:[%s10034_s11 + $0x5f4] ss:$8 sps:$4 sm:$0xff]  }
0x158a   : > { %v6407_v17 = vadd.f32 1.0, %v9764_v50  ;;  %v9766_v10 = vpop.eup %9765  ;;  %v6420_v25 = vmul.f32 %v6408_v51, %v6336_v14  ;;  %v9638_v51 = vld [vmem:[%s10034_s11 + $0x504] ss:$8 sps:$4 sm:$0xff]   ;;  %v9647_v60 = vld [vmem:[%s10034_s11 + $0x5d4] ss:$8 sps:$4 sm:$0xff]  }
0x158b   : > { %v6409_v46 = vadd.f32 1.0, %v9766_v10  ;;  %v6415_v62 = vmul.f32 %v6403_v30, %v6331_v54  ;;  %v9639_v10 = vld [vmem:[%s10034_s11 + $0x5f0] ss:$8 sps:$4 sm:$0xff]   ;;  %v9644_v14 = vld [vmem:[%s10034_s11 + $0x5e4] ss:$8 sps:$4 sm:$0xff]  }
0x158c   : > { %v6419_v12 = vmul.f32 %v6407_v17, %v6335_v37  ;;  %v6426_v47 = vpack.c.bf16 %v6420_v25, %v6414_v57  ;;  %v9636_v17 = vld [vmem:[%s10034_s11 + $0x500] ss:$8 sps:$4 sm:$0xff]   ;;  %v9650_v57 = vld [vmem:[%s10034_s11 + $0x5c4] ss:$8 sps:$4 sm:$0xff]  }
0x158d   : > { %v6421_v8 = vmul.f32 %v6409_v46, %v6337_v16  ;;  %v9642_v54 = vld [vmem:[%s10034_s11 + $0x5e0] ss:$8 sps:$4 sm:$0xff]  }
0x158e   : > { %v6425_v36 = vpack.c.bf16 %v6419_v12, %v6413_v40 }
0x158f   : > { %v6427_v3 = vpack.c.bf16 %v6421_v8, %v6415_v62 }
0x1590   : > { %7039 = vmatprep.mubr.bf16.mxu0 %v6425_v36 }
0x1591   : > { %7040 = vmatmul.mubr.bf16.vlgmr.msra.gmra.mxu0 %v6424_v1  ;;  %7082 = vmatprep.mubr.bf16.mxu1 %v6427_v3  ;;  %v9645_v1 = vld [vmem:[%s10034_s11 + $0x5d0] ss:$8 sps:$4 sm:$0xff]  }
0x1592   : > { %7094 = vmatpush1.bf16.msra.mxu0 %v9615_v58  ;;  %7083 = vmatmul.mubr.bf16.vlgmr.msra.gmra.mxu1 %v6426_v47 }
0x1593   : > { %7095 = vmatprep.subr.bf16.mxu0 %v9620_v2 }
0x1596   : > { %7096 = vmatpush1.bf16.msra.mxu0 %v9618_v5  ;;  %v9648_v5 = vld [vmem:[%s10034_s11 + $0x5c0] ss:$8 sps:$4 sm:$0xff]  }
0x1597   : > { %7097 = vmatprep.subr.bf16.mxu0 %v9623_v39 }
0x1598   : > { %v6307_v9 = vpop.f32.mrf.mxu1 }
0x1599   : > { %v11354_v43 = vadd.f32 %v6307_v9, %v5813_v42  ;;  %v9656_v9 = vld [vmem:[%s10034_s11 + $0x5a4] ss:$8 sps:$4 sm:$0xff]  }
0x159a   : > { %v6309_v29 = vpop.f32.mrf.mxu1  ;;  %7098 = vmatpush1.bf16.msra.mxu0 %v9621_v38  ;;  %v9653_v38 = vld [vmem:[%s10034_s11 + $0x5b4] ss:$8 sps:$4 sm:$0xff]  }
0x159b   : > { %v6310_v63 = vadd.f32 %v6309_v29, %v5817_v6  ;;  %7099 = vmatprep.subr.bf16.mxu0 %v9626_v11  ;;  %v6320_v37 = vmul.f32 %v11354_v43, %v11354_v43  ;;  %v6344_v16 = vmul.f32 0.7978846, %v11354_v43  ;;  %v9654_v11 = vld [vmem:[%s10034_s11 + $0x5a0] ss:$8 sps:$4 sm:$0xff]   ;;  %v9659_v29 = vld [vmem:[%s10034_s11 + $0x594] ss:$8 sps:$4 sm:$0xff]  }
0x159c   : > { %v6311_v19 = vpop.f32.mrf.mxu1 }
0x159d   : > { %v6321_v4 = vmul.f32 %v6310_v63, %v6310_v63  ;;  %v6345_v45 = vmul.f32 0.7978846, %v6310_v63  ;;  %v11351_v55 = vadd.f32 %v6311_v19, %v5813_v42  ;;  %v6356_v30 = vmul.f32 0.044715, %v6320_v37  ;;  %v9657_v19 = vld [vmem:[%s10034_s11 + $0x590] ss:$8 sps:$4 sm:$0xff]  }
0x159e   : > { %v6313_v7 = vpop.f32.mrf.mxu1  ;;  %7100 = vmatpush1.bf16.msra.mxu0 %v9624_v27  ;;  %v6333_v62 = vmul.f32 0.5, %v6310_v63 }
0x159f   : > { %v6357_v28 = vmul.f32 0.044715, %v6321_v4  ;;  %v6314_v32 = vadd.f32 %v6313_v7, %v5817_v6  ;;  %7101 = vmatprep.subr.bf16.mxu0 %v9629_v23  ;;  %v6326_v22 = vmul.f32 %v11351_v55, %v11351_v55  ;;  %v6368_v12 = vadd.f32 1.0, %v6356_v30  ;;  %v9651_v6 = vld [vmem:[%s10034_s11 + $0x5b0] ss:$8 sps:$4 sm:$0xff]  }
0x15a0   : > { %v6350_v15 = vmul.f32 0.7978846, %v11351_v55  ;;  %v9662_v4 = vld [vmem:[%s10034_s11 + $0x584] ss:$8 sps:$4 sm:$0xff]  }
0x15a1   : > { %v6369_v0 = vadd.f32 1.0, %v6357_v28  ;;  %v6327_v41 = vmul.f32 %v6314_v32, %v6314_v32  ;;  %v6351_v50 = vmul.f32 0.7978846, %v6314_v32  ;;  %v6362_v48 = vmul.f32 0.044715, %v6326_v22 }
0x15a2   : > { %7102 = vmatpush1.bf16.msra.mxu0 %v9627_v21  ;;  %v6380_v58 = vmul.f32 %v6368_v12, %v6344_v16  ;;  %v6339_v8 = vmul.f32 0.5, %v6314_v32  ;;  %v6338_v28 = vmul.f32 0.5, %v11351_v55  ;;  %v9660_v32 = vld [vmem:[%s10034_s11 + $0x580] ss:$8 sps:$4 sm:$0xff]   ;;  %v6332_v21 = vmul.f32 0.5, %v11354_v43  ;;  %s11567_s11 = sld [smem:[#allocation19_spill]] (!%p8582_p5) }
0x15a3   : > { %v6381_v44 = vmul.f32 %v6369_v0, %v6345_v45  ;;  %v6363_v53 = vmul.f32 0.044715, %v6327_v41  ;;  %7103 = vmatprep.subr.bf16.mxu0 %v9632_v31  ;;  %v6374_v56 = vadd.f32 1.0, %v6362_v48 }
0x15a5   : > { %9767 = vtanh.f32 %v6381_v44  ;;  %v6375_v20 = vadd.f32 1.0, %v6363_v53  ;;  %v6386_v46 = vmul.f32 %v6374_v56, %v6350_v15 }
0x15a6   : > { %7104 = vmatpush1.bf16.msra.mxu0 %v9630_v52 }
0x15a7   : > { %v6387_v24 = vmul.f32 %v6375_v20, %v6351_v50  ;;  %7105 = vmatprep.subr.bf16.mxu0 %v9635_v61  ;;  %v8581_v20 = vld [vmem:[%s10019_s22 + $0x2] sm:$0x3] }
0x15a8   : > { %v7146_v43 = vrot.slane %v8581_v20, %v10435_v34  ;;  %v7150_v30 = vrot.slane %v8581_v20, %v10432_v33 }
0x15a9   : > { %9769 = vtanh.f32 %v6387_v24 }
0x15aa   : > { %7106 = vmatpush1.bf16.msra.mxu0 %v9633_v18  ;;  %9771 = vtanh.f32 %v6386_v46 }
0x15ab   : > { %7107 = vmatprep.subr.bf16.mxu0 %v9638_v51  ;;  %9773 = vtanh.f32 %v6380_v58 }
0x15ae   : > { %7108 = vmatpush1.bf16.msra.mxu0 %v9636_v17 }
0x15af   : > { %7109 = vmatprep.subr.bf16.mxu0 %v9641_v59 }
0x15b2   : > { %v9768_v40 = vpop.eup %9767  ;;  %7110 = vmatpush2.bf16.msra.mxu0 %v9639_v10 }
0x15b3   : > { %7111 = vmatprep.subr.bf16.mxu0 %v9644_v14  ;;  %v6405_v25 = vadd.f32 1.0, %v9768_v40 }
0x15b5   : > { %v6417_v3 = vmul.f32 %v6405_v25, %v6333_v62 }
0x15b6   : > { %v9770_v36 = vpop.eup %9769  ;;  %7112 = vmatpush2.bf16.msra.mxu0 %v9642_v54 }
0x15b7   : > { %v6411_v2 = vadd.f32 1.0, %v9770_v36  ;;  %7113 = vmatprep.subr.bf16.mxu0 %v9647_v60  ;;  %v9772_v63 = vpop.eup %9771 }
0x15b8   : > { %v9774_v27 = vpop.eup %9773  ;;  %v6410_v23 = vadd.f32 1.0, %v9772_v63 }
0x15b9   : > { %v6423_v47 = vmul.f32 %v6411_v2, %v6339_v8  ;;  %v6404_v7 = vadd.f32 1.0, %v9774_v27 }
0x15ba   : > { %7114 = vmatpush2.bf16.msra.mxu0 %v9645_v1  ;;  %v6422_v31 = vmul.f32 %v6410_v23, %v6338_v28 }
0x15bb   : > { %v6429_v39 = vpack.c.bf16 %v6423_v47, %v6417_v3  ;;  %7115 = vmatprep.subr.bf16.mxu0 %v9650_v57  ;;  %v6416_v45 = vmul.f32 %v6404_v7, %v6332_v21 }
0x15bd   : > { %7125 = vmatprep.mubr.bf16.mxu0 %v6429_v39  ;;  %v6428_v0 = vpack.c.bf16 %v6422_v31, %v6416_v45 }
0x15be   : > { %7116 = vmatpush2.bf16.msra.mxu0 %v9648_v5 }
0x15bf   : > { %7117 = vmatprep.subr.bf16.mxu0 %v9653_v38 }
0x15c2   : > { %7118 = vmatpush2.bf16.msra.mxu0 %v9651_v6 }
0x15c3   : > { %7119 = vmatprep.subr.bf16.mxu0 %v9656_v9 }
0x15c6   : > { %7120 = vmatpush2.bf16.msra.mxu0 %v9654_v11 }
0x15c7   : > { %7121 = vmatprep.subr.bf16.mxu0 %v9659_v29 }
0x15ca   : > { %7122 = vmatpush2.bf16.msra.mxu0 %v9657_v19 }
0x15cb   : > { %7123 = vmatprep.subr.bf16.mxu0 %v9662_v4 }
0x15ce   : > { %7124 = vmatpush2.bf16.msra.mxu0 %v9660_v32 }
0x15d1   : > { %7126 = vmatmul.mubr.bf16.vlgmr.msra.gmra.mxu0 %v6428_v0 }
0x1651   : > { %v7041_v41 = vpop.f32.mrf.mxu0 }
0x1652   : > { %v7084_v42 = vpop.f32.mrf.mxu1 }
0x1653   : > { %v7043_v44 = vpop.f32.mrf.mxu0  ;;  %v7085_v55 = vadd.f32 %v7084_v42, %v7041_v41 }
0x1654   : > { %v7086_v53 = vpop.f32.mrf.mxu1 }
0x1655   : > { %v7045_v52 = vpop.f32.mrf.mxu0  ;;  %v7087_v18 = vadd.f32 %v7086_v53, %v7043_v44 }
0x1656   : > { %v7088_v61 = vpop.f32.mrf.mxu1 }
0x1657   : > { %v7047_v50 = vpop.f32.mrf.mxu0  ;;  %v7089_v17 = vadd.f32 %v7088_v61, %v7045_v52 }
0x1658   : > { %v7090_v51 = vpop.f32.mrf.mxu1 }
0x1659   : > { %v7091_v56 = vadd.f32 %v7090_v51, %v7047_v50 }
0x1691   : > { %v7127_v24 = vpop.f32.mrf.mxu0 }
0x1692   : > { %v7128_v22 = vadd.f32 %v7127_v24, %v7085_v55 }
0x1693   : > { %v7129_v37 = vpop.f32.mrf.mxu0 }
0x1694   : > { %v7136_v48 = vadd.f32 %v7128_v22, %v11103_v13  ;;  %v7130_v59 = vadd.f32 %v7129_v37, %v7087_v18 }
0x1695   : > { %v7131_v10 = vpop.f32.mrf.mxu0 }
0x1696   : > { %v7153_v14 = vadd.f32 %v7146_v43, %v7136_v48  ;;  %v7137_v40 = vadd.f32 %v7130_v59, %v11100_v49  ;;  %v7132_v12 = vadd.f32 %v7131_v10, %v7089_v17 }
0x1697   : > { %v7133_v15 = vpop.f32.mrf.mxu0 }
0x1698   : > { %7157 = vst [vmem:[#allocation2] sm:$0xff] %v7153_v14  ;;  %v7154_v54 = vadd.f32 %v7150_v30, %v7137_v40  ;;  %v7138_v16 = vadd.f32 %v7132_v12, %v11112_v26  ;;  %v7134_v34 = vadd.f32 %v7133_v15, %v7091_v56 }
0x169a   : > { %7158 = vst.msk [vmem:[#allocation2 + $0x8] sm:$0xff] %vm1732_vm3, %v7154_v54  ;;  %v7155_v46 = vadd.f32 %v7146_v43, %v7138_v16  ;;  %v7139_v13 = vadd.f32 %v7134_v34, %v11109_v35  ;;  %7164 = sbr.rel (%p8582_p5) target bundleno = 6242 (0x1862), region = 120 }
0x169c   : > { %7159 = vst [vmem:[#allocation2 + $0x10] sm:$0xff] %v7155_v46  ;;  %v7156_v60 = vadd.f32 %v7150_v30, %v7139_v13 }
0x169e   : > { %7160 = vst.msk [vmem:[#allocation2 + $0x18] sm:$0xff] %vm1732_vm3, %v7156_v60 }
0x169f   : > { %v9781_v33 = vld [vmem:[%s11567_s11 + $0x38] sm:$0xff]   ;;  %v9841_v49 = vmov 0   ;;  %vm7173_vm6 = vcmask 520192   ;;  %v9782_v35 = vld [vmem:[%s11567_s11 + $0x30] sm:$0xff]   ;;  %v9783_v8 = vld [vmem:[%s11567_s11 + $0x28] sm:$0xff]   ;;  %vm7165_vm7 = vcmask 1044480  }
0x16a0   : > { %7308 = vmatprep.subr.bf16.mxu0 %v9841_v49  ;;  %v7174_v26 = vsel %vm7173_vm6, %v7154_v54, 0.0  ;;  %v7188_v36 = vsel %vm7173_vm6, %v7156_v60, 0.0  ;;  %v9784_v47 = vld [vmem:[%s11567_s11 + $0x20] sm:$0xff]   ;;  %v7166_v5 = vsel %vm7165_vm7, %v7153_v14, 0.0  ;;  %v9785_v6 = vld [vmem:[%s11567_s11 + $0x18] sm:$0xff]   ;;  %vm7195_vm8 = vcmask 1040384  }
0x16a1   : > { %7309 = vmatpush1.bf16.msra.mxu0 %v9781_v33  ;;  %v7175_v25 = vrot.slane %v7174_v26, 4  ;;  %v7189_v62 = vrot.slane %v7188_v36, 4  ;;  %v7181_v9 = vsel %vm7165_vm7, %v7155_v46, 0.0  ;;  %v9793_v11 = vld [vmem:[%s11568_s3 + $0x38] sm:$0xff]   ;;  %v7167_v27 = vrot.slane %v7166_v5, 4  ;;  %v9794_v4 = vld [vmem:[%s11568_s3 + $0x30] sm:$0xff]  }
0x16a2   : > { %7310 = vmatprep.subr.bf16.mxu0 %v9841_v49  ;;  %v9842_v19 = vmov 0.0   ;;  %v7182_v23 = vrot.slane %v7181_v9, 4  ;;  %v9786_v28 = vld [vmem:[%s11567_s11 + $0x10] sm:$0xff]   ;;  %v9795_v21 = vld [vmem:[%s11568_s3 + $0x28] sm:$0xff]   ;;  %v9796_v52 = vld [vmem:[%s11568_s3 + $0x20] sm:$0xff]   ;;  %vm9843_vm9 = vmmov 0  }
0x16a3   : > { %v7176_v58 = vadd.f32 %v7175_v25, %v7174_v26  ;;  %v7190_v2 = vadd.f32 %v7189_v62, %v7188_v36  ;;  %8717 = vmatprep.subr.bf16.mxu1 %v9842_v19  ;;  %v7168_v45 = vadd.f32 %v7167_v27, %v7166_v5  ;;  %v9787_v42 = vld [vmem:[%s11567_s11 + $0x8] sm:$0xff]   ;;  %v9788_v61 = vld [vmem:[%s11567_s11] sm:$0xff]   ;;  %v9797_v55 = vld [vmem:[%s11568_s3 + $0x18] sm:$0xff]   ;;  %8733 = vmatprep.mubr.msk.bf16.mxu1 %vm9843_vm9, %v9842_v19  ;;  %vm7477_vm10 = vcmask 25600  }
0x16a4   : > { %8718 = vmatpush3.bf16.msra.mxu1 %v9793_v11  ;;  %v7183_v0 = vadd.f32 %v7182_v23, %v7181_v9  ;;  %v9789_v24 = vld [vmem:[%s11567_s11 + $0x58] sm:$0xff]   ;;  %v9790_v43 = vld [vmem:[%s11567_s11 + $0x50] sm:$0xff]   ;;  %v9791_v17 = vld [vmem:[%s11567_s11 + $0x48] sm:$0xff]  }
0x16a5   : > { %7311 = vmatpush1.bf16.msra.mxu0 %v9782_v35  ;;  %v7177_v1 = vrot.slane %v7176_v58, 2  ;;  %v7191_v3 = vrot.slane %v7190_v2, 2  ;;  %8719 = vmatprep.subr.bf16.mxu1 %v9842_v19  ;;  %v7169_v44 = vrot.slane %v7168_v45, 2  ;;  %v9792_v30 = vld [vmem:[%s11567_s11 + $0x40] sm:$0xff]   ;;  %v9798_v56 = vld [vmem:[%s11568_s3 + $0x10] sm:$0xff]   ;;  %v9799_v14 = vld [vmem:[%s11568_s3 + $0x8] sm:$0xff]  }
0x16a6   : > { %7312 = vmatprep.subr.bf16.mxu0 %v9841_v49  ;;  %v7184_v53 = vrot.slane %v7183_v0, 2  ;;  %v9800_v40 = vld [vmem:[%s11568_s3] sm:$0xff]  }
0x16a7   : > { %v7178_v57 = vadd.f32 %v7177_v1, %v7176_v58  ;;  %v7192_v38 = vadd.f32 %v7191_v3, %v7190_v2  ;;  %v7170_v50 = vadd.f32 %v7169_v44, %v7168_v45  ;;  %v8583_v12 = vld [vmem:[%s11569_s5] ss:$0 sm:$0xff] }
0x16a8   : > { %8720 = vmatpush3.bf16.msra.mxu1 %v9794_v4  ;;  %v7185_v20 = vadd.f32 %v7184_v53, %v7183_v0  ;;  %v8597_v54 = vld [vmem:[%s11570_s19] ss:$0 sm:$0xff] }
0x16a9   : > { %7313 = vmatpush1.bf16.msra.mxu0 %v9783_v8  ;;  %v7179_v39 = vrot.slane %v7178_v57, 1  ;;  %v7193_v63 = vrot.slane %v7192_v38, 1  ;;  %8721 = vmatprep.subr.bf16.mxu1 %v9842_v19  ;;  %v7171_v18 = vrot.slane %v7170_v50, 1  ;;  %v8598_v34 = vld [vmem:[%s11571_s7] ss:$0 sm:$0xff] }
0x16aa   : > { %7314 = vmatprep.subr.bf16.mxu0 %v9841_v49  ;;  %v7186_v22 = vrot.slane %v7185_v20, 1  ;;  %v8599_v25 = vld [vmem:[%s11572_s10] ss:$0 sm:$0xff] }
0x16ab   : > { %v7180_v29 = vadd.f32 %v7179_v39, %v7178_v57  ;;  %v7194_v7 = vadd.f32 %v7193_v63, %v7192_v38  ;;  %v7172_v51 = vadd.f32 %v7171_v18, %v7170_v50 }
0x16ac   : > { %8722 = vmatpush3.bf16.msra.mxu1 %v9795_v21  ;;  %v7187_v37 = vadd.f32 %v7186_v22, %v7185_v20 }
0x16ad   : > { %7315 = vmatpush1.bf16.msra.mxu0 %v9784_v47  ;;  %v7197_v32 = vsel %vm7195_vm8, %v7180_v29, %v7194_v7  ;;  %8723 = vmatprep.subr.bf16.mxu1 %v9842_v19 }
0x16ae   : > { %7316 = vmatprep.subr.bf16.mxu0 %v9841_v49  ;;  %v7199_v31 = vmul.f32 0.2, %v7197_v32  ;;  %v7196_v48 = vsel %vm7195_vm8, %v7172_v51, %v7187_v37 }
0x16af   : > { %v7198_v59 = vmul.f32 0.2, %v7196_v48 }
0x16b0   : > { %v7201_v41 = vpack.c.bf16 %v7199_v31, %v7199_v31  ;;  %8724 = vmatpush3.bf16.msra.mxu1 %v9796_v52 }
0x16b1   : > { %7317 = vmatpush1.bf16.msra.mxu0 %v9785_v6  ;;  %8725 = vmatprep.subr.bf16.mxu1 %v9842_v19  ;;  %v7200_v10 = vpack.c.bf16 %v7198_v59, %v7198_v59 }
0x16b2   : > { %7318 = vmatprep.subr.bf16.mxu0 %v9841_v49  ;;  %8596 = vmatprep.mubr.msk.bf16.mxu0 %vm1732_vm3, %v7201_v41 }
0x16b4   : > { %8726 = vmatpush3.bf16.msra.mxu1 %v9797_v55 }
0x16b5   : > { %7319 = vmatpush1.bf16.msra.mxu0 %v9786_v28  ;;  %8727 = vmatprep.subr.bf16.mxu1 %v9842_v19 }
0x16b6   : > { %7320 = vmatprep.subr.bf16.mxu0 %v9841_v49 }
0x16b8   : > { %8728 = vmatpush3.bf16.msra.mxu1 %v9798_v56 }
0x16b9   : > { %7321 = vmatpush1.bf16.msra.mxu0 %v9787_v42  ;;  %8729 = vmatprep.subr.bf16.mxu1 %v9842_v19 }
0x16ba   : > { %7322 = vmatprep.subr.bf16.mxu0 %v9841_v49 }
0x16bc   : > { %8730 = vmatpush3.bf16.msra.mxu1 %v9799_v14 }
0x16bd   : > { %7323 = vmatpush1.bf16.msra.mxu0 %v9788_v61  ;;  %8731 = vmatprep.subr.bf16.mxu1 %v9842_v19 }
0x16be   : > { %7332 = vmatprep.subr.bf16.mxu0 %v9841_v49 }
0x16c0   : > { %8732 = vmatpush3.bf16.msra.mxu1 %v9800_v40 }
0x16c1   : > { %7333 = vmatpush2.bf16.msra.mxu0 %v9789_v24 }
0x16c2   : > { %7334 = vmatprep.subr.bf16.mxu0 %v9841_v49 }
0x16c5   : > { %7335 = vmatpush2.bf16.msra.mxu0 %v9790_v43 }
0x16c6   : > { %7336 = vmatprep.subr.bf16.mxu0 %v9841_v49 }
0x16c9   : > { %7337 = vmatpush2.bf16.msra.mxu0 %v9791_v17 }
0x16ca   : > { %7338 = vmatprep.subr.bf16.mxu0 %v9841_v49 }
0x16cd   : > { %7339 = vmatpush2.bf16.msra.mxu0 %v9792_v30 }
0x16d0   : > { %7341 = vmatmul.mubr.bf16.vlgmr.msra.gmra.mxu0 %v7200_v10 }
0x1790   : > { %v7342_v15 = vpop.f32.mrf.mxu0 }
0x1791   : > { %v7343_v16 = vadd.f32 %v8583_v12, %v7342_v15 }
0x1792   : > { %v7344_v46 = vpop.f32.mrf.mxu0 }
0x1793   : > { %v7355_v13 = vmul.f32 %v8597_v54, %v7343_v16 }
0x1794   : > { %v7345_v60 = vpop.f32.mrf.mxu0 }
0x1795   : > { %v7363_v33 = vadd.f32 %v8598_v34, %v7355_v13 }
0x1796   : > { %v7346_v49 = vpop.f32.mrf.mxu0 }
0x1797   : > { %v7364_v35 = vmax.f32 %v7363_v33, 0.0 }
0x1799   : > { %v7365_v26 = vpack.c.bf16 %v7364_v35, %v7364_v35 }
0x179b   : > { %8734 = vmatmul.mubr.bf16.vlgmr.msra.gmra.mxu1 %v7365_v26 }
0x185b   : > { %v7471_v36 = vpop.f32.mrf.mxu1 }
0x185c   : > { %v7472_v58 = vadd.f32 %v8599_v25, %v7471_v36 }
0x185d   : > { %v8735_v62 = vpop.f32.mrf.mxu1 }
0x185e   : > { %7478 = vst.msk [vmem:[#allocation3] sm:$0x3] %vm7477_vm10, %v7472_v58 }
0x185f   : > { %v7474_v8 = vpop.f32.mrf.mxu1 }
0x1861   : > { %v8736_v1 = vpop.f32.mrf.mxu1 }
0x1862 PF: > { %p8747_p6 = scmp.eq.s32.totalorder %s9971_s30, 5  ;;  %s9844_s25 = smov [#allocation3]  }
0x1863   : > { %s7486_s23 = sshll.u32 %s9844_s25, 4  ;;  %s7487_s23 = int_to_ptr.vmem [resolvable:$true] %s7486_s23 }
0x1864   : > { %s9801_s6 = scalar_lea.vmem %s7487_s23, 32  ;;  %p9808_p10 = scmp.lt.s32.totalorder %s7487_s23, %s7487_s23 }
0x1865   : > { %p9802_p7 = scmp.ne.s32.totalorder %s7487_s23, %s9801_s6  ;;  %p9809_p11 = scmp.lt.s32.totalorder %s9801_s6, %s9801_s6 }
0x1867   : > { %p9803_p8 = pnand %p9802_p7, %p8747_p6  ;;  %p9810_p12 = por %p9809_p11, %p9808_p10 }
0x1869   : > { %p9804_p9 = pneg %p9803_p8 }
0x186b   : > { %p9811_p13 = pnand %p9810_p12, %p9804_p9 }
0x186d   : > { %9814 = shalt.err (!%p9811_p13)
}
0x186e   : > { %s11573_s8 = sld [smem:[#allocation25_spill]] }
0x1874   : > { %8744 = dma.vmem_to_hbm [thread:$0]  (%p8747_p6), %s7487_s23, 32, %s11573_s8, [#allocation4]  }
0x1875   : > { %9830 = dma.done.wait (%p8747_p6), [#allocation4], 32  }
0x1876   : > { %9832 = vsyncadd (%p8747_p6), [#allocation4], 4294967264 }
0x1877 PF: > { %s11574_s9 = sld [smem:[#allocation6_spill]] }
0x187d   : > { %s34_s4 = sadd.s32 1, %s11574_s9  }
0x187e   : > { %p31_p0 = scmp.ge.s32.totalorder %s34_s4, 8  }
0x1880   :  { %33 = sbr.rel (!%p31_p0) target bundleno = 21 (0x15), region = 192 }
0x1885   :  { %7499 = vsyncpa [#allocation4], 1 }
0x1886   :  { %7501 = vsyncpa [#allocation4 + $0x1], 1 }

</bundles_post_ra>
